<compile_context>
chip_gen: v6e
topology: v6e:2x2x1
jax: 0.10.0
libtpu: 0.0.40
codegen_flags: <defaults>
</compile_context>

<pallas_src>
import jax
import jax.numpy as jnp
from jax.experimental import pallas as pl
from jax.experimental.pallas import tpu as pltpu

EPS = 1e-5            # torch.nn.GroupNorm default
GROUPS = 32           # GroupNorm(32, C)
_COMPUTE_DT = jnp.bfloat16   # MXU input dtype for the conv matmuls (f32 accumulation)

# TODO(synk): whole-image blocks + matmul-based 2x2 pooling are sized for small encoder
# feature maps; large resolutions would need H-row tiling with a two-pass GroupNorm
# (stats then apply) and strided-read pooling to fit v7x's 64 MiB VMEM.


# ----------------------------- in-kernel helpers ---------------------------- #

def _gn_silu(xv, gamma, beta, gmat, gmat_t, cg):
    """GroupNorm + SiLU on a flattened (HW, C) f32 tile.

    Group reductions use small one-hot matmuls (C,G)/(G,C) to stay 2-D and
    lowering-safe; variance uses the centered two-pass form.
    """
    hw = xv.shape[0]
    cnt = float(hw * cg)
    s1 = jnp.sum(xv, axis=0, keepdims=True)                                # (1, C)
    mean_g = jnp.dot(s1, gmat, preferred_element_type=jnp.float32) / cnt   # (1, G)
    mean_c = jnp.dot(mean_g, gmat_t, preferred_element_type=jnp.float32)   # (1, C)
    xc = xv - mean_c
    s2 = jnp.sum(xc * xc, axis=0, keepdims=True)                           # (1, C)
    var_g = jnp.dot(s2, gmat, preferred_element_type=jnp.float32) / cnt    # (1, G)
    rstd_c = jnp.dot(jax.lax.rsqrt(var_g + EPS), gmat_t,
                     preferred_element_type=jnp.float32)                   # (1, C)
    y = xc * rstd_c * gamma + beta
    return y * jax.nn.sigmoid(y)                                           # SiLU


def _conv3x3_im2col(pad_ref, patch_ref, w_ref, b_ref, ho, wo):
    """3x3 'same' conv from an in-kernel zero-padded VMEM scratch.

    Builds the (ho*wo, 9*Cin) im2col patch tile in VMEM, then does ONE bf16
    MXU matmul with f32 accumulation.
    pad_ref: (ho+2, wo+2, Cin) bf16; patch_ref: (ho*wo, 9*Cin) bf16;
    w_ref: (9*Cin, Cout) bf16; b_ref: (1, Cout) f32.  Returns (ho*wo, Cout) f32.
    """
    cin = pad_ref.shape[-1]
    for ky in range(3):
        for kx in range(3):
            tap = pad_ref[pl.ds(ky, ho), pl.ds(kx, wo), :]          # (ho, wo, cin)
            patch_ref[:, pl.ds((ky * 3 + kx) * cin, cin)] = tap.reshape(ho * wo, cin)
    acc = jnp.dot(patch_ref[...], w_ref[...], preferred_element_type=jnp.float32)
    return acc + b_ref[...]


# -------------------------------- kernels ----------------------------------- #

def _make_in_kernel(down):
    """in_layers (+ optional AvgPool of h and x): GN1 + SiLU [+ pool] + Conv3x3."""
    def kernel(*refs):
        if down:
            (x_ref, g_ref, be_ref, gmat_ref, gmt_ref, pmat_ref,
             w1_ref, b1_ref, h_ref, xp_ref, pad_ref, patch_ref) = refs
        else:
            (x_ref, g_ref, be_ref, gmat_ref, gmt_ref,
             w1_ref, b1_ref, h_ref, pad_ref, patch_ref) = refs

        _, H, W, Cin = x_ref.shape
        _, Ho, Wo, Cout = h_ref.shape
        cg = Cin // GROUPS

        xv = x_ref[...].reshape(H * W, Cin).astype(jnp.float32)
        y = _gn_silu(xv, g_ref[...], be_ref[...], gmat_ref[...], gmt_ref[...], cg)

        pad_ref[...] = jnp.zeros(pad_ref.shape, pad_ref.dtype)      # in-kernel zero pad
        if down:
            pmat = pmat_ref[...]                                    # (Ho*Wo, H*W) f32
            # h path: AvgPool2x2(SiLU(GN(x))) fused as a small MXU matmul
            y = jnp.dot(pmat, y, preferred_element_type=jnp.float32)
            # skip path: x_upd = AvgPool2x2(x); fused here so x is read only once
            xp = jnp.dot(pmat, xv, preferred_element_type=jnp.float32)
            xp_ref[...] = xp.reshape(1, Ho, Wo, Cin).astype(xp_ref.dtype)

        pad_ref[pl.ds(1, Ho), pl.ds(1, Wo), :] = (
            y.reshape(Ho, Wo, Cin).astype(pad_ref.dtype))
        out = _conv3x3_im2col(pad_ref, patch_ref, w1_ref, b1_ref, Ho, Wo)
        h_ref[...] = out.reshape(1, Ho, Wo, Cout).astype(h_ref.dtype)
    return kernel


def _make_out_kernel(has_skip):
    """out_layers + skip + residual: GN2 + SiLU + Dropout(eval) + Conv3x3 + skip + add."""
    def kernel(*refs):
        if has_skip:
            (h_ref, x_ref, g_ref, be_ref, gmat_ref, gmt_ref, w2_ref, b2_ref,
             sw_ref, sb_ref, o_ref, pad_ref, patch_ref) = refs
        else:
            (h_ref, x_ref, g_ref, be_ref, gmat_ref, gmt_ref, w2_ref, b2_ref,
             o_ref, pad_ref, patch_ref) = refs

        _, H, W, C = h_ref.shape
        Cin = x_ref.shape[-1]
        cg = C // GROUPS

        hv = h_ref[...].reshape(H * W, C).astype(jnp.float32)
        y = _gn_silu(hv, g_ref[...], be_ref[...], gmat_ref[...], gmt_ref[...], cg)
        # TODO(synk): nn.Dropout is identity in eval mode; training-time dropout would
        # use pltpu.prng_seed / pltpu.prng_random_bits here.

        pad_ref[...] = jnp.zeros(pad_ref.shape, pad_ref.dtype)
        pad_ref[pl.ds(1, H), pl.ds(1, W), :] = y.reshape(H, W, C).astype(pad_ref.dtype)
        h2 = _conv3x3_im2col(pad_ref, patch_ref, w2_ref, b2_ref, H, W)   # (H*W, C) f32

        xv = x_ref[...].reshape(H * W, Cin)
        if has_skip:
            skip = jnp.dot(xv.astype(_COMPUTE_DT), sw_ref[...],
                           preferred_element_type=jnp.float32) + sb_ref[...]
        else:
            skip = xv.astype(jnp.float32)
        # residual add in f32, single cast on the final store
        o_ref[...] = (skip + h2).reshape(1, H, W, C).astype(o_ref.dtype)
    return kernel


# ------------------------------ JAX wrappers -------------------------------- #

def _compiler_params():
    return pltpu.CompilerParams(
        dimension_semantics=("parallel",),      # batch axis -> megacore / v7x 2-TC
        vmem_limit_bytes=64 * 1024 * 1024,
    )


def _group_onehot(c):
    cg = c // GROUPS
    return (jnp.arange(c)[:, None] // cg == jnp.arange(GROUPS)[None, :]).astype(jnp.float32)


def _pool_matrix(h, w):
    """(ho*wo, h*w) one-hot/0.25 matrix: AvgPool2x2 as a single in-kernel matmul."""
    ho, wo = h // 2, w // 2
    rows = jnp.arange(h * w)
    hi, wi = rows // w, rows % w
    cols = (hi // 2) * wo + (wi // 2)
    return 0.25 * (jnp.arange(ho * wo)[:, None] == cols[None, :]).astype(jnp.float32)


def in_block(x, gamma, beta, w, b, down):
    N, H, W, Cin = x.shape
    Cout = w.shape[-1]
    Ho, Wo = (H // 2, W // 2) if down else (H, W)

    gmat = _group_onehot(Cin)
    w2d = w.reshape(9 * Cin, Cout).astype(_COMPUTE_DT)

    args = [x, gamma.reshape(1, Cin).astype(jnp.float32),
            beta.reshape(1, Cin).astype(jnp.float32), gmat, gmat.T]
    in_specs = [
        pl.BlockSpec((1, H, W, Cin), lambda n: (n, 0, 0, 0)),
        pl.BlockSpec((1, Cin), lambda n: (0, 0)),
        pl.BlockSpec((1, Cin), lambda n: (0, 0)),
        pl.BlockSpec((Cin, GROUPS), lambda n: (0, 0)),
        pl.BlockSpec((GROUPS, Cin), lambda n: (0, 0)),
    ]
    if down:
        args.append(_pool_matrix(H, W))
        in_specs.append(pl.BlockSpec((Ho * Wo, H * W), lambda n: (0, 0)))
    args += [w2d, b.reshape(1, Cout).astype(jnp.float32)]
    in_specs += [
        pl.BlockSpec((9 * Cin, Cout), lambda n: (0, 0)),
        pl.BlockSpec((1, Cout), lambda n: (0, 0)),
    ]

    out_shape = [jax.ShapeDtypeStruct((N, Ho, Wo, Cout), jnp.float32)]
    out_specs = [pl.BlockSpec((1, Ho, Wo, Cout), lambda n: (n, 0, 0, 0))]
    if down:
        out_shape.append(jax.ShapeDtypeStruct((N, Ho, Wo, Cin), x.dtype))
        out_specs.append(pl.BlockSpec((1, Ho, Wo, Cin), lambda n: (n, 0, 0, 0)))

    res = pl.pallas_call(
        _make_in_kernel(down),
        out_shape=tuple(out_shape),
        grid=(N,),
        in_specs=in_specs,
        out_specs=tuple(out_specs),
        scratch_shapes=[
            pltpu.VMEM((Ho + 2, Wo + 2, Cin), _COMPUTE_DT),   # zero-padded GN/SiLU(/pool) output
            pltpu.VMEM((Ho * Wo, 9 * Cin), _COMPUTE_DT),      # im2col patch tile
        ],
        compiler_params=_compiler_params(),
    )(*args)
    if down:
        return res[0], res[1]        # h (after conv1), pooled x for the skip path
    return res[0], x


def out_block(h1, x_skip, gamma, beta, w, b, skip_w=None, skip_b=None):
    N, H, W, C = h1.shape
    Cin = x_skip.shape[-1]
    has_skip = skip_w is not None

    gmat = _group_onehot(C)
    w2d = w.reshape(9 * C, C).astype(_COMPUTE_DT)

    args = [h1, x_skip, gamma.reshape(1, C).astype(jnp.float32),
            beta.reshape(1, C).astype(jnp.float32), gmat, gmat.T,
            w2d, b.reshape(1, C).astype(jnp.float32)]
    in_specs = [
        pl.BlockSpec((1, H, W, C), lambda n: (n, 0, 0, 0)),
        pl.BlockSpec((1, H, W, Cin), lambda n: (n, 0, 0, 0)),
        pl.BlockSpec((1, C), lambda n: (0, 0)),
        pl.BlockSpec((1, C), lambda n: (0, 0)),
        pl.BlockSpec((C, GROUPS), lambda n: (0, 0)),
        pl.BlockSpec((GROUPS, C), lambda n: (0, 0)),
        pl.BlockSpec((9 * C, C), lambda n: (0, 0)),
        pl.BlockSpec((1, C), lambda n: (0, 0)),
    ]
    if has_skip:
        args += [skip_w.astype(_COMPUTE_DT), skip_b.reshape(1, C).astype(jnp.float32)]
        in_specs += [pl.BlockSpec((Cin, C), lambda n: (0, 0)),
                     pl.BlockSpec((1, C), lambda n: (0, 0))]

    return pl.pallas_call(
        _make_out_kernel(has_skip),
        out_shape=jax.ShapeDtypeStruct((N, H, W, C), x_skip.dtype),
        grid=(N,),
        in_specs=in_specs,
        out_specs=pl.BlockSpec((1, H, W, C), lambda n: (n, 0, 0, 0)),
        scratch_shapes=[
            pltpu.VMEM((H + 2, W + 2, C), _COMPUTE_DT),
            pltpu.VMEM((H * W, 9 * C), _COMPUTE_DT),
        ],
        compiler_params=_compiler_params(),
    )(*args)


def encoder_res_block(x, p, down):
    """Pallas version of EncoderResBlock.forward (NHWC layout, eval mode)."""
    cin = x.shape[-1]
    cout = p["conv1_w"].shape[-1]
    # Kernel 1: GN(32,cin)+SiLU [+AvgPool2x2 of h and x] + Conv3x3(cin->cout)
    h1, x_skip = in_block(x, p["gn1_gamma"], p["gn1_beta"],
                          p["conv1_w"], p["conv1_b"], down)
    # Kernel 2: GN(32,cout)+SiLU+Dropout(eval)+Conv3x3(zero-init) + skip + residual add
    if cout == cin:
        return out_block(h1, x_skip, p["gn2_gamma"], p["gn2_beta"],
                         p["conv2_w"], p["conv2_b"])
    return out_block(h1, x_skip, p["gn2_gamma"], p["gn2_beta"],
                     p["conv2_w"], p["conv2_b"], p["skip_w"], p["skip_b"])


# ---------------------- deterministic parameter init ------------------------ #

def init_params(key, cin, cout):
    ks = jax.random.split(key, 8)
    p = {
        "gn1_gamma": 1.0 + 0.1 * jax.random.normal(ks[0], (cin,), jnp.float32),
        "gn1_beta": 0.1 * jax.random.normal(ks[1], (cin,), jnp.float32),
        "conv1_w": 0.05 * jax.random.normal(ks[2], (3, 3, cin, cout), jnp.float32),  # HWIO
        "conv1_b": 0.05 * jax.random.normal(ks[3], (cout,), jnp.float32),
        "gn2_gamma": 1.0 + 0.1 * jax.random.normal(ks[4], (cout,), jnp.float32),
        "gn2_beta": 0.1 * jax.random.normal(ks[5], (cout,), jnp.float32),
        # zero_module(Conv2d(cout, cout, 3)) -> weights and bias zeroed
        "conv2_w": jnp.zeros((3, 3, cout, cout), jnp.float32),
        "conv2_b": jnp.zeros((cout,), jnp.float32),
    }
    if cout != cin:
        p["skip_w"] = 0.05 * jax.random.normal(ks[6], (cin, cout), jnp.float32)
        p["skip_b"] = 0.05 * jax.random.normal(ks[7], (cout,), jnp.float32)
    return p


# ----------------------------- pure-JAX reference --------------------------- #

def ref_gn_silu(x, gamma, beta, groups):
    N, H, W, C = x.shape
    xg = x.reshape(N, H, W, groups, C // groups)
    mean = xg.mean(axis=(1, 2, 4), keepdims=True)
    var = jnp.mean((xg - mean) ** 2, axis=(1, 2, 4), keepdims=True)
    y = ((xg - mean) / jnp.sqrt(var + EPS)).reshape(N, H, W, C)
    y = y * gamma[None, None, None, :] + beta[None, None, None, :]
    return y * jax.nn.sigmoid(y)


def ref_pool(x):
    N, H, W, C = x.shape
    return x.reshape(N, H // 2, 2, W // 2, 2, C).mean(axis=(2, 4))


def ref_conv3x3(x, w, b):
    y = jax.lax.conv_general_dilated(
        x, w, window_strides=(1, 1), padding="SAME",
        dimension_numbers=("NHWC", "HWIO", "NHWC"))
    return y + b[None, None, None, :]


def ref_forward(x, p, down, cin, cout):
    h = ref_gn_silu(x, p["gn1_gamma"], p["gn1_beta"], 32)
    if down:
        h = ref_pool(h)
        x = ref_pool(x)
    h = ref_conv3x3(h, p["conv1_w"], p["conv1_b"])
    h = ref_gn_silu(h, p["gn2_gamma"], p["gn2_beta"], 32)
    h = ref_conv3x3(h, p["conv2_w"], p["conv2_b"])
    if cout == cin:
        skip = x
    else:
        skip = jnp.einsum("nhwi,io->nhwo", x, p["skip_w"]) + p["skip_b"]
    return skip + h


# ----------------------------------- main ----------------------------------- #

if __name__ == "__main__":
    key = jax.random.PRNGKey(0)
    kx, kp1, kp2, kp3, kc = jax.random.split(key, 5)

    N, H, W, Cin, Cout = 2, 16, 16, 32, 64   # GroupNorm(32, C) needs C % 32 == 0
    x = jax.random.normal(kx, (N, H, W, Cin), jnp.float32)

    fwd = jax.jit(encoder_res_block, static_argnames="down")

    # Config 1: down=True, 32 -> 64 (AvgPool downsample + 1x1-conv skip).
    p1 = init_params(kp1, Cin, Cout)
    out1 = jax.block_until_ready(fwd(x, p1, down=True))
    ref1 = ref_forward(x, p1, True, Cin, Cout)
    assert out1.shape == (N, H // 2, W // 2, Cout)
    assert bool(jnp.all(jnp.isfinite(out1)))
    assert bool(jnp.allclose(out1, ref1, atol=1e-2, rtol=1e-2)), \
        float(jnp.max(jnp.abs(out1 - ref1)))

    # Config 2: down=False, 32 -> 32 (Identity updates + Identity skip).
    p2 = init_params(kp2, Cin, Cin)
    out2 = jax.block_until_ready(fwd(x, p2, down=False))
    ref2 = ref_forward(x, p2, False, Cin, Cin)
    assert out2.shape == (N, H, W, Cin)
    assert bool(jnp.all(jnp.isfinite(out2)))
    assert bool(jnp.allclose(out2, ref2, atol=1e-2, rtol=1e-2)), \
        float(jnp.max(jnp.abs(out2 - ref2)))

    # Config 3: down=True, 32 -> 32, with a NON-zero second conv purely to exercise the
    # fused out_layers conv + identity-skip path numerically (the real module zero-inits
    # conv2 via zero_module, which configs 1/2 keep faithful to).
    p3 = init_params(kp3, Cin, Cin)
    kc1, kc2 = jax.random.split(kc)
    p3["conv2_w"] = 0.05 * jax.random.normal(kc1, (3, 3, Cin, Cin), jnp.float32)
    p3["conv2_b"] = 0.05 * jax.random.normal(kc2, (Cin,), jnp.float32)
    out3 = jax.block_until_ready(fwd(x, p3, down=True))
    ref3 = ref_forward(x, p3, True, Cin, Cin)
    assert out3.shape == (N, H // 2, W // 2, Cin)
    assert bool(jnp.all(jnp.isfinite(out3)))
    assert bool(jnp.allclose(out3, ref3, atol=1e-2, rtol=1e-2)), \
        float(jnp.max(jnp.abs(out3 - ref3)))

    print("KERNEL_OK")
</pallas_src>

<mosaic_0001>
module attributes {stable_mosaic.version = 11 : i64} {
  func.func @kernel(%arg0: i32, %arg1: memref<1x16x16x32xf32, #tpu.memory_space<vmem>>, %arg2: memref<1x32xf32, #tpu.memory_space<vmem>>, %arg3: memref<1x32xf32, #tpu.memory_space<vmem>>, %arg4: memref<32x32xf32, #tpu.memory_space<vmem>>, %arg5: memref<32x32xf32, #tpu.memory_space<vmem>>, %arg6: memref<64x256xf32, #tpu.memory_space<vmem>>, %arg7: memref<288x64xbf16, #tpu.memory_space<vmem>>, %arg8: memref<1x64xf32, #tpu.memory_space<vmem>>, %arg9: memref<1x8x8x64xf32, #tpu.memory_space<vmem>>, %arg10: memref<1x8x8x32xf32, #tpu.memory_space<vmem>>, %arg11: memref<10x10x32xbf16, #tpu.memory_space<vmem>>, %arg12: memref<64x288xbf16, #tpu.memory_space<vmem>>) attributes {dimension_semantics = [#tpu.dimension_semantics<parallel>], iteration_bounds = array<i64: 2>, scalar_prefetch = 0 : i64, scratch_operands = 2 : i64, tpu.core_type = #tpu.core_type<tc>, window_params = [{transform_indices = @transform_0, window_bounds = array<i64: 1, 16, 16, 32>}, {pipeline_mode = #tpu.pipeline_mode<synchronous>, transform_indices = @transform_1, window_bounds = array<i64: 1, 32>}, {pipeline_mode = #tpu.pipeline_mode<synchronous>, transform_indices = @transform_2, window_bounds = array<i64: 1, 32>}, {pipeline_mode = #tpu.pipeline_mode<synchronous>, transform_indices = @transform_3, window_bounds = array<i64: 32, 32>}, {pipeline_mode = #tpu.pipeline_mode<synchronous>, transform_indices = @transform_4, window_bounds = array<i64: 32, 32>}, {pipeline_mode = #tpu.pipeline_mode<synchronous>, transform_indices = @transform_5, window_bounds = array<i64: 64, 256>}, {pipeline_mode = #tpu.pipeline_mode<synchronous>, transform_indices = @transform_6, window_bounds = array<i64: 288, 64>}, {pipeline_mode = #tpu.pipeline_mode<synchronous>, transform_indices = @transform_7, window_bounds = array<i64: 1, 64>}, {transform_indices = @transform_8, window_bounds = array<i64: 1, 8, 8, 64>}, {transform_indices = @transform_9, window_bounds = array<i64: 1, 8, 8, 32>}]} {
    %c0 = arith.constant 0 : index
    %c0_0 = arith.constant 0 : index
    %c0_1 = arith.constant 0 : index
    %c0_2 = arith.constant 0 : index
    %0 = vector.load %arg1[%c0, %c0_0, %c0_1, %c0_2] : memref<1x16x16x32xf32, #tpu.memory_space<vmem>>, vector<1x16x16x32xf32>
    %1 = vector.shape_cast %0 : vector<1x16x16x32xf32> to vector<256x32xf32>
    %c0_3 = arith.constant 0 : index
    %c0_4 = arith.constant 0 : index
    %2 = vector.load %arg2[%c0_3, %c0_4] : memref<1x32xf32, #tpu.memory_space<vmem>>, vector<1x32xf32>
    %c0_5 = arith.constant 0 : index
    %c0_6 = arith.constant 0 : index
    %3 = vector.load %arg3[%c0_5, %c0_6] : memref<1x32xf32, #tpu.memory_space<vmem>>, vector<1x32xf32>
    %c0_7 = arith.constant 0 : index
    %c0_8 = arith.constant 0 : index
    %4 = vector.load %arg4[%c0_7, %c0_8] : memref<32x32xf32, #tpu.memory_space<vmem>>, vector<32x32xf32>
    %c0_9 = arith.constant 0 : index
    %c0_10 = arith.constant 0 : index
    %5 = vector.load %arg5[%c0_9, %c0_10] : memref<32x32xf32, #tpu.memory_space<vmem>>, vector<32x32xf32>
    %cst = arith.constant dense<0.000000e+00> : vector<32xf32>
    %6 = vector.multi_reduction <add>, %1, %cst [0] : vector<256x32xf32> to vector<32xf32>
    %7 = vector.shape_cast %6 : vector<32xf32> to vector<1x32xf32>
    %cst_11 = arith.constant dense<0.000000e+00> : vector<1x32xf32>
    %8 = tpu.matmul %7, %4, %cst_11 {dimension_numbers = #tpu.dot_dimension_numbers<[1], [0], [0], [1], [0, 0, 1, 1], [], []>} : vector<1x32xf32>, vector<32x32xf32>, vector<1x32xf32> -> vector<1x32xf32>
    %cst_12 = arith.constant 2.560000e+02 : f32
    %9 = vector.broadcast %cst_12 : f32 to vector<1x32xf32>
    %10 = arith.divf %8, %9 : vector<1x32xf32>
    %cst_13 = arith.constant dense<0.000000e+00> : vector<1x32xf32>
    %11 = tpu.matmul %10, %5, %cst_13 {dimension_numbers = #tpu.dot_dimension_numbers<[1], [0], [0], [1], [0, 0, 1, 1], [], []>} : vector<1x32xf32>, vector<32x32xf32>, vector<1x32xf32> -> vector<1x32xf32>
    %12 = vector.broadcast %11 : vector<1x32xf32> to vector<256x32xf32>
    %13 = arith.subf %1, %12 : vector<256x32xf32>
    %14 = arith.mulf %13, %13 : vector<256x32xf32>
    %cst_14 = arith.constant dense<0.000000e+00> : vector<32xf32>
    %15 = vector.multi_reduction <add>, %14, %cst_14 [0] : vector<256x32xf32> to vector<32xf32>
    %16 = vector.shape_cast %15 : vector<32xf32> to vector<1x32xf32>
    %cst_15 = arith.constant dense<0.000000e+00> : vector<1x32xf32>
    %17 = tpu.matmul %16, %4, %cst_15 {dimension_numbers = #tpu.dot_dimension_numbers<[1], [0], [0], [1], [0, 0, 1, 1], [], []>} : vector<1x32xf32>, vector<32x32xf32>, vector<1x32xf32> -> vector<1x32xf32>
    %cst_16 = arith.constant 2.560000e+02 : f32
    %18 = vector.broadcast %cst_16 : f32 to vector<1x32xf32>
    %19 = arith.divf %17, %18 : vector<1x32xf32>
    %cst_17 = arith.constant 9.99999974E-6 : f32
    %20 = vector.broadcast %cst_17 : f32 to vector<1x32xf32>
    %21 = arith.addf %19, %20 : vector<1x32xf32>
    %22 = math.rsqrt %21 : vector<1x32xf32>
    %cst_18 = arith.constant dense<0.000000e+00> : vector<1x32xf32>
    %23 = tpu.matmul %22, %5, %cst_18 {dimension_numbers = #tpu.dot_dimension_numbers<[1], [0], [0], [1], [0, 0, 1, 1], [], []>} : vector<1x32xf32>, vector<32x32xf32>, vector<1x32xf32> -> vector<1x32xf32>
    %24 = vector.broadcast %23 : vector<1x32xf32> to vector<256x32xf32>
    %25 = arith.mulf %13, %24 : vector<256x32xf32>
    %26 = vector.broadcast %2 : vector<1x32xf32> to vector<256x32xf32>
    %27 = arith.mulf %25, %26 : vector<256x32xf32>
    %28 = vector.broadcast %3 : vector<1x32xf32> to vector<256x32xf32>
    %29 = arith.addf %27, %28 : vector<256x32xf32>
    %30 = arith.negf %29 : vector<256x32xf32>
    %31 = math.exp %30 : vector<256x32xf32>
    %cst_19 = arith.constant 1.000000e+00 : f32
    %32 = vector.broadcast %cst_19 : f32 to vector<256x32xf32>
    %33 = arith.addf %32, %31 : vector<256x32xf32>
    %34 = arith.divf %32, %33 : vector<256x32xf32>
    %35 = arith.mulf %29, %34 : vector<256x32xf32>
    %cst_20 = arith.constant 0.000000e+00 : bf16
    %36 = vector.broadcast %cst_20 : bf16 to vector<10x10x32xbf16>
    %c0_21 = arith.constant 0 : index
    %c0_22 = arith.constant 0 : index
    %c0_23 = arith.constant 0 : index
    %37 = vector.load %arg11[%c0_21, %c0_22, %c0_23] : memref<10x10x32xbf16, #tpu.memory_space<vmem>>, vector<10x10x32xbf16>
    tpu.vector_store %arg11[%c0_21, %c0_22, %c0_23], %36 {strides = array<i32>} : memref<10x10x32xbf16, #tpu.memory_space<vmem>>, vector<10x10x32xbf16>,
    %c0_24 = arith.constant 0 : index
    %c0_25 = arith.constant 0 : index
    %38 = vector.load %arg6[%c0_24, %c0_25] : memref<64x256xf32, #tpu.memory_space<vmem>>, vector<64x256xf32>
    %cst_26 = arith.constant dense<0.000000e+00> : vector<64x32xf32>
    %39 = tpu.matmul %38, %35, %cst_26 {dimension_numbers = #tpu.dot_dimension_numbers<[1], [0], [0], [1], [0, 0, 1, 1], [], []>} : vector<64x256xf32>, vector<256x32xf32>, vector<64x32xf32> -> vector<64x32xf32>
    %cst_27 = arith.constant dense<0.000000e+00> : vector<64x32xf32>
    %40 = tpu.matmul %38, %1, %cst_27 {dimension_numbers = #tpu.dot_dimension_numbers<[1], [0], [0], [1], [0, 0, 1, 1], [], []>} : vector<64x256xf32>, vector<256x32xf32>, vector<64x32xf32> -> vector<64x32xf32>
    %41 = vector.shape_cast %40 : vector<64x32xf32> to vector<1x8x8x32xf32>
    %c0_28 = arith.constant 0 : index
    %c0_29 = arith.constant 0 : index
    %c0_30 = arith.constant 0 : index
    %c0_31 = arith.constant 0 : index
    %42 = vector.load %arg10[%c0_28, %c0_29, %c0_30, %c0_31] : memref<1x8x8x32xf32, #tpu.memory_space<vmem>>, vector<1x8x8x32xf32>
    tpu.vector_store %arg10[%c0_28, %c0_29, %c0_30, %c0_31], %41 {strides = array<i32>} : memref<1x8x8x32xf32, #tpu.memory_space<vmem>>, vector<1x8x8x32xf32>,
    %43 = vector.shape_cast %39 : vector<64x32xf32> to vector<8x8x32xf32>
    %44 = arith.truncf %43 : vector<8x8x32xf32> to vector<8x8x32xbf16>
    %c1 = arith.constant 1 : index
    %c1_32 = arith.constant 1 : index
    %c0_33 = arith.constant 0 : index
    %45 = vector.load %arg11[%c1, %c1_32, %c0_33] : memref<10x10x32xbf16, #tpu.memory_space<vmem>>, vector<8x8x32xbf16>
    tpu.vector_store %arg11[%c1, %c1_32, %c0_33], %44 {strides = array<i32>} : memref<10x10x32xbf16, #tpu.memory_space<vmem>>, vector<8x8x32xbf16>,
    %c0_34 = arith.constant 0 : index
    %c0_35 = arith.constant 0 : index
    %c0_36 = arith.constant 0 : index
    %46 = vector.load %arg11[%c0_34, %c0_35, %c0_36] : memref<10x10x32xbf16, #tpu.memory_space<vmem>>, vector<8x8x32xbf16>
    %47 = vector.shape_cast %46 : vector<8x8x32xbf16> to vector<64x32xbf16>
    %c0_37 = arith.constant 0 : index
    %c0_38 = arith.constant 0 : index
    %48 = vector.load %arg12[%c0_37, %c0_38] : memref<64x288xbf16, #tpu.memory_space<vmem>>, vector<64x32xbf16>
    tpu.vector_store %arg12[%c0_37, %c0_38], %47 {strides = array<i32>} : memref<64x288xbf16, #tpu.memory_space<vmem>>, vector<64x32xbf16>,
    %c0_39 = arith.constant 0 : index
    %c1_40 = arith.constant 1 : index
    %c0_41 = arith.constant 0 : index
    %49 = vector.load %arg11[%c0_39, %c1_40, %c0_41] : memref<10x10x32xbf16, #tpu.memory_space<vmem>>, vector<8x8x32xbf16>
    %50 = vector.shape_cast %49 : vector<8x8x32xbf16> to vector<64x32xbf16>
    %c0_42 = arith.constant 0 : index
    %c32 = arith.constant 32 : index
    %51 = vector.load %arg12[%c0_42, %c32] : memref<64x288xbf16, #tpu.memory_space<vmem>>, vector<64x32xbf16>
    tpu.vector_store %arg12[%c0_42, %c32], %50 {strides = array<i32>} : memref<64x288xbf16, #tpu.memory_space<vmem>>, vector<64x32xbf16>,
    %c0_43 = arith.constant 0 : index
    %c2 = arith.constant 2 : index
    %c0_44 = arith.constant 0 : index
    %52 = vector.load %arg11[%c0_43, %c2, %c0_44] : memref<10x10x32xbf16, #tpu.memory_space<vmem>>, vector<8x8x32xbf16>
    %53 = vector.shape_cast %52 : vector<8x8x32xbf16> to vector<64x32xbf16>
    %c0_45 = arith.constant 0 : index
    %c64 = arith.constant 64 : index
    %54 = vector.load %arg12[%c0_45, %c64] : memref<64x288xbf16, #tpu.memory_space<vmem>>, vector<64x32xbf16>
    tpu.vector_store %arg12[%c0_45, %c64], %53 {strides = array<i32>} : memref<64x288xbf16, #tpu.memory_space<vmem>>, vector<64x32xbf16>,
    %c1_46 = arith.constant 1 : index
    %c0_47 = arith.constant 0 : index
    %c0_48 = arith.constant 0 : index
    %55 = vector.load %arg11[%c1_46, %c0_47, %c0_48] : memref<10x10x32xbf16, #tpu.memory_space<vmem>>, vector<8x8x32xbf16>
    %56 = vector.shape_cast %55 : vector<8x8x32xbf16> to vector<64x32xbf16>
    %c0_49 = arith.constant 0 : index
    %c96 = arith.constant 96 : index
    %57 = vector.load %arg12[%c0_49, %c96] : memref<64x288xbf16, #tpu.memory_space<vmem>>, vector<64x32xbf16>
    tpu.vector_store %arg12[%c0_49, %c96], %56 {strides = array<i32>} : memref<64x288xbf16, #tpu.memory_space<vmem>>, vector<64x32xbf16>,
    %c1_50 = arith.constant 1 : index
    %c1_51 = arith.constant 1 : index
    %c0_52 = arith.constant 0 : index
    %58 = vector.load %arg11[%c1_50, %c1_51, %c0_52] : memref<10x10x32xbf16, #tpu.memory_space<vmem>>, vector<8x8x32xbf16>
    %59 = vector.shape_cast %58 : vector<8x8x32xbf16> to vector<64x32xbf16>
    %c0_53 = arith.constant 0 : index
    %c128 = arith.constant 128 : index
    %60 = vector.load %arg12[%c0_53, %c128] : memref<64x288xbf16, #tpu.memory_space<vmem>>, vector<64x32xbf16>
    tpu.vector_store %arg12[%c0_53, %c128], %59 {strides = array<i32>} : memref<64x288xbf16, #tpu.memory_space<vmem>>, vector<64x32xbf16>,
    %c1_54 = arith.constant 1 : index
    %c2_55 = arith.constant 2 : index
    %c0_56 = arith.constant 0 : index
    %61 = vector.load %arg11[%c1_54, %c2_55, %c0_56] : memref<10x10x32xbf16, #tpu.memory_space<vmem>>, vector<8x8x32xbf16>
    %62 = vector.shape_cast %61 : vector<8x8x32xbf16> to vector<64x32xbf16>
    %c0_57 = arith.constant 0 : index
    %c160 = arith.constant 160 : index
    %63 = vector.load %arg12[%c0_57, %c160] : memref<64x288xbf16, #tpu.memory_space<vmem>>, vector<64x32xbf16>
    tpu.vector_store %arg12[%c0_57, %c160], %62 {strides = array<i32>} : memref<64x288xbf16, #tpu.memory_space<vmem>>, vector<64x32xbf16>,
    %c2_58 = arith.constant 2 : index
    %c0_59 = arith.constant 0 : index
    %c0_60 = arith.constant 0 : index
    %64 = vector.load %arg11[%c2_58, %c0_59, %c0_60] : memref<10x10x32xbf16, #tpu.memory_space<vmem>>, vector<8x8x32xbf16>
    %65 = vector.shape_cast %64 : vector<8x8x32xbf16> to vector<64x32xbf16>
    %c0_61 = arith.constant 0 : index
    %c192 = arith.constant 192 : index
    %66 = vector.load %arg12[%c0_61, %c192] : memref<64x288xbf16, #tpu.memory_space<vmem>>, vector<64x32xbf16>
    tpu.vector_store %arg12[%c0_61, %c192], %65 {strides = array<i32>} : memref<64x288xbf16, #tpu.memory_space<vmem>>, vector<64x32xbf16>,
    %c2_62 = arith.constant 2 : index
    %c1_63 = arith.constant 1 : index
    %c0_64 = arith.constant 0 : index
    %67 = vector.load %arg11[%c2_62, %c1_63, %c0_64] : memref<10x10x32xbf16, #tpu.memory_space<vmem>>, vector<8x8x32xbf16>
    %68 = vector.shape_cast %67 : vector<8x8x32xbf16> to vector<64x32xbf16>
    %c0_65 = arith.constant 0 : index
    %c224 = arith.constant 224 : index
    %69 = vector.load %arg12[%c0_65, %c224] : memref<64x288xbf16, #tpu.memory_space<vmem>>, vector<64x32xbf16>
    tpu.vector_store %arg12[%c0_65, %c224], %68 {strides = array<i32>} : memref<64x288xbf16, #tpu.memory_space<vmem>>, vector<64x32xbf16>,
    %c2_66 = arith.constant 2 : index
    %c2_67 = arith.constant 2 : index
    %c0_68 = arith.constant 0 : index
    %70 = vector.load %arg11[%c2_66, %c2_67, %c0_68] : memref<10x10x32xbf16, #tpu.memory_space<vmem>>, vector<8x8x32xbf16>
    %71 = vector.shape_cast %70 : vector<8x8x32xbf16> to vector<64x32xbf16>
    %c0_69 = arith.constant 0 : index
    %c256 = arith.constant 256 : index
    %72 = vector.load %arg12[%c0_69, %c256] : memref<64x288xbf16, #tpu.memory_space<vmem>>, vector<64x32xbf16>
    tpu.vector_store %arg12[%c0_69, %c256], %71 {strides = array<i32>} : memref<64x288xbf16, #tpu.memory_space<vmem>>, vector<64x32xbf16>,
    %c0_70 = arith.constant 0 : index
    %c0_71 = arith.constant 0 : index
    %73 = vector.load %arg12[%c0_70, %c0_71] : memref<64x288xbf16, #tpu.memory_space<vmem>>, vector<64x288xbf16>
    %c0_72 = arith.constant 0 : index
    %c0_73 = arith.constant 0 : index
    %74 = vector.load %arg7[%c0_72, %c0_73] : memref<288x64xbf16, #tpu.memory_space<vmem>>, vector<288x64xbf16>
    %cst_74 = arith.constant dense<0.000000e+00> : vector<64x64xf32>
    %75 = tpu.matmul %73, %74, %cst_74 {dimension_numbers = #tpu.dot_dimension_numbers<[1], [0], [0], [1], [0, 0, 1, 1], [], []>} : vector<64x288xbf16>, vector<288x64xbf16>, vector<64x64xf32> -> vector<64x64xf32>
    %c0_75 = arith.constant 0 : index
    %c0_76 = arith.constant 0 : index
    %76 = vector.load %arg8[%c0_75, %c0_76] : memref<1x64xf32, #tpu.memory_space<vmem>>, vector<1x64xf32>
    %77 = vector.broadcast %76 : vector<1x64xf32> to vector<64x64xf32>
    %78 = arith.addf %75, %77 : vector<64x64xf32>
    %79 = vector.shape_cast %78 : vector<64x64xf32> to vector<1x8x8x64xf32>
    %c0_77 = arith.constant 0 : index
    %c0_78 = arith.constant 0 : index
    %c0_79 = arith.constant 0 : index
    %c0_80 = arith.constant 0 : index
    %80 = vector.load %arg9[%c0_77, %c0_78, %c0_79, %c0_80] : memref<1x8x8x64xf32, #tpu.memory_space<vmem>>, vector<1x8x8x64xf32>
    tpu.vector_store %arg9[%c0_77, %c0_78, %c0_79, %c0_80], %79 {strides = array<i32>} : memref<1x8x8x64xf32, #tpu.memory_space<vmem>>, vector<1x8x8x64xf32>,
    return
  }
  func.func @transform_0(%arg0: i32) -> (i32, i32, i32, i32) {
    %c0_i32 = arith.constant 0 : i32
    %c0_i32_0 = arith.constant 0 : i32
    %c0_i32_1 = arith.constant 0 : i32
    %c0_i32_2 = arith.constant 0 : i32
    return %arg0, %c0_i32, %c0_i32_0, %c0_i32_1 : i32, i32, i32, i32
  }
  func.func @transform_1(%arg0: i32) -> (i32, i32) {
    %c0_i32 = arith.constant 0 : i32
    %c0_i32_0 = arith.constant 0 : i32
    %c0_i32_1 = arith.constant 0 : i32
    return %c0_i32, %c0_i32_0 : i32, i32
  }
  func.func @transform_2(%arg0: i32) -> (i32, i32) {
    %c0_i32 = arith.constant 0 : i32
    %c0_i32_0 = arith.constant 0 : i32
    %c0_i32_1 = arith.constant 0 : i32
    return %c0_i32, %c0_i32_0 : i32, i32
  }
  func.func @transform_3(%arg0: i32) -> (i32, i32) {
    %c0_i32 = arith.constant 0 : i32
    %c0_i32_0 = arith.constant 0 : i32
    %c0_i32_1 = arith.constant 0 : i32
    return %c0_i32, %c0_i32_0 : i32, i32
  }
  func.func @transform_4(%arg0: i32) -> (i32, i32) {
    %c0_i32 = arith.constant 0 : i32
    %c0_i32_0 = arith.constant 0 : i32
    %c0_i32_1 = arith.constant 0 : i32
    return %c0_i32, %c0_i32_0 : i32, i32
  }
  func.func @transform_5(%arg0: i32) -> (i32, i32) {
    %c0_i32 = arith.constant 0 : i32
    %c0_i32_0 = arith.constant 0 : i32
    %c0_i32_1 = arith.constant 0 : i32
    return %c0_i32, %c0_i32_0 : i32, i32
  }
  func.func @transform_6(%arg0: i32) -> (i32, i32) {
    %c0_i32 = arith.constant 0 : i32
    %c0_i32_0 = arith.constant 0 : i32
    %c0_i32_1 = arith.constant 0 : i32
    return %c0_i32, %c0_i32_0 : i32, i32
  }
  func.func @transform_7(%arg0: i32) -> (i32, i32) {
    %c0_i32 = arith.constant 0 : i32
    %c0_i32_0 = arith.constant 0 : i32
    %c0_i32_1 = arith.constant 0 : i32
    return %c0_i32, %c0_i32_0 : i32, i32
  }
  func.func @transform_8(%arg0: i32) -> (i32, i32, i32, i32) {
    %c0_i32 = arith.constant 0 : i32
    %c0_i32_0 = arith.constant 0 : i32
    %c0_i32_1 = arith.constant 0 : i32
    %c0_i32_2 = arith.constant 0 : i32
    return %arg0, %c0_i32, %c0_i32_0, %c0_i32_1 : i32, i32, i32, i32
  }
  func.func @transform_9(%arg0: i32) -> (i32, i32, i32, i32) {
    %c0_i32 = arith.constant 0 : i32
    %c0_i32_0 = arith.constant 0 : i32
    %c0_i32_1 = arith.constant 0 : i32
    %c0_i32_2 = arith.constant 0 : i32
    return %arg0, %c0_i32, %c0_i32_0, %c0_i32_1 : i32, i32, i32, i32
  }
}

module attributes {stable_mosaic.version = 11 : i64} {
  func.func @kernel(%arg0: i32, %arg1: memref<1x8x8x64xf32, #tpu.memory_space<vmem>>, %arg2: memref<1x8x8x32xf32, #tpu.memory_space<vmem>>, %arg3: memref<1x64xf32, #tpu.memory_space<vmem>>, %arg4: memref<1x64xf32, #tpu.memory_space<vmem>>, %arg5: memref<64x32xf32, #tpu.memory_space<vmem>>, %arg6: memref<32x64xf32, #tpu.memory_space<vmem>>, %arg7: memref<576x64xbf16, #tpu.memory_space<vmem>>, %arg8: memref<1x64xf32, #tpu.memory_space<vmem>>, %arg9: memref<32x64xbf16, #tpu.memory_space<vmem>>, %arg10: memref<1x64xf32, #tpu.memory_space<vmem>>, %arg11: memref<1x8x8x64xf32, #tpu.memory_space<vmem>>, %arg12: memref<10x10x64xbf16, #tpu.memory_space<vmem>>, %arg13: memref<64x576xbf16, #tpu.memory_space<vmem>>) attributes {dimension_semantics = [#tpu.dimension_semantics<parallel>], iteration_bounds = array<i64: 2>, scalar_prefetch = 0 : i64, scratch_operands = 2 : i64, tpu.core_type = #tpu.core_type<tc>, window_params = [{transform_indices = @transform_0, window_bounds = array<i64: 1, 8, 8, 64>}, {transform_indices = @transform_1, window_bounds = array<i64: 1, 8, 8, 32>}, {pipeline_mode = #tpu.pipeline_mode<synchronous>, transform_indices = @transform_2, window_bounds = array<i64: 1, 64>}, {pipeline_mode = #tpu.pipeline_mode<synchronous>, transform_indices = @transform_3, window_bounds = array<i64: 1, 64>}, {pipeline_mode = #tpu.pipeline_mode<synchronous>, transform_indices = @transform_4, window_bounds = array<i64: 64, 32>}, {pipeline_mode = #tpu.pipeline_mode<synchronous>, transform_indices = @transform_5, window_bounds = array<i64: 32, 64>}, {pipeline_mode = #tpu.pipeline_mode<synchronous>, transform_indices = @transform_6, window_bounds = array<i64: 576, 64>}, {pipeline_mode = #tpu.pipeline_mode<synchronous>, transform_indices = @transform_7, window_bounds = array<i64: 1, 64>}, {pipeline_mode = #tpu.pipeline_mode<synchronous>, transform_indices = @transform_8, window_bounds = array<i64: 32, 64>}, {pipeline_mode = #tpu.pipeline_mode<synchronous>, transform_indices = @transform_9, window_bounds = array<i64: 1, 64>}, {transform_indices = @transform_10, window_bounds = array<i64: 1, 8, 8, 64>}]} {
    %c0 = arith.constant 0 : index
    %c0_0 = arith.constant 0 : index
    %c0_1 = arith.constant 0 : index
    %c0_2 = arith.constant 0 : index
    %0 = vector.load %arg1[%c0, %c0_0, %c0_1, %c0_2] : memref<1x8x8x64xf32, #tpu.memory_space<vmem>>, vector<1x8x8x64xf32>
    %1 = vector.shape_cast %0 : vector<1x8x8x64xf32> to vector<64x64xf32>
    %c0_3 = arith.constant 0 : index
    %c0_4 = arith.constant 0 : index
    %2 = vector.load %arg3[%c0_3, %c0_4] : memref<1x64xf32, #tpu.memory_space<vmem>>, vector<1x64xf32>
    %c0_5 = arith.constant 0 : index
    %c0_6 = arith.constant 0 : index
    %3 = vector.load %arg4[%c0_5, %c0_6] : memref<1x64xf32, #tpu.memory_space<vmem>>, vector<1x64xf32>
    %c0_7 = arith.constant 0 : index
    %c0_8 = arith.constant 0 : index
    %4 = vector.load %arg5[%c0_7, %c0_8] : memref<64x32xf32, #tpu.memory_space<vmem>>, vector<64x32xf32>
    %c0_9 = arith.constant 0 : index
    %c0_10 = arith.constant 0 : index
    %5 = vector.load %arg6[%c0_9, %c0_10] : memref<32x64xf32, #tpu.memory_space<vmem>>, vector<32x64xf32>
    %cst = arith.constant dense<0.000000e+00> : vector<64xf32>
    %6 = vector.multi_reduction <add>, %1, %cst [0] : vector<64x64xf32> to vector<64xf32>
    %7 = vector.shape_cast %6 : vector<64xf32> to vector<1x64xf32>
    %cst_11 = arith.constant dense<0.000000e+00> : vector<1x32xf32>
    %8 = tpu.matmul %7, %4, %cst_11 {dimension_numbers = #tpu.dot_dimension_numbers<[1], [0], [0], [1], [0, 0, 1, 1], [], []>} : vector<1x64xf32>, vector<64x32xf32>, vector<1x32xf32> -> vector<1x32xf32>
    %cst_12 = arith.constant 1.280000e+02 : f32
    %9 = vector.broadcast %cst_12 : f32 to vector<1x32xf32>
    %10 = arith.divf %8, %9 : vector<1x32xf32>
    %cst_13 = arith.constant dense<0.000000e+00> : vector<1x64xf32>
    %11 = tpu.matmul %10, %5, %cst_13 {dimension_numbers = #tpu.dot_dimension_numbers<[1], [0], [0], [1], [0, 0, 1, 1], [], []>} : vector<1x32xf32>, vector<32x64xf32>, vector<1x64xf32> -> vector<1x64xf32>
    %12 = vector.broadcast %11 : vector<1x64xf32> to vector<64x64xf32>
    %13 = arith.subf %1, %12 : vector<64x64xf32>
    %14 = arith.mulf %13, %13 : vector<64x64xf32>
    %cst_14 = arith.constant dense<0.000000e+00> : vector<64xf32>
    %15 = vector.multi_reduction <add>, %14, %cst_14 [0] : vector<64x64xf32> to vector<64xf32>
    %16 = vector.shape_cast %15 : vector<64xf32> to vector<1x64xf32>
    %cst_15 = arith.constant dense<0.000000e+00> : vector<1x32xf32>
    %17 = tpu.matmul %16, %4, %cst_15 {dimension_numbers = #tpu.dot_dimension_numbers<[1], [0], [0], [1], [0, 0, 1, 1], [], []>} : vector<1x64xf32>, vector<64x32xf32>, vector<1x32xf32> -> vector<1x32xf32>
    %cst_16 = arith.constant 1.280000e+02 : f32
    %18 = vector.broadcast %cst_16 : f32 to vector<1x32xf32>
    %19 = arith.divf %17, %18 : vector<1x32xf32>
    %cst_17 = arith.constant 9.99999974E-6 : f32
    %20 = vector.broadcast %cst_17 : f32 to vector<1x32xf32>
    %21 = arith.addf %19, %20 : vector<1x32xf32>
    %22 = math.rsqrt %21 : vector<1x32xf32>
    %cst_18 = arith.constant dense<0.000000e+00> : vector<1x64xf32>
    %23 = tpu.matmul %22, %5, %cst_18 {dimension_numbers = #tpu.dot_dimension_numbers<[1], [0], [0], [1], [0, 0, 1, 1], [], []>} : vector<1x32xf32>, vector<32x64xf32>, vector<1x64xf32> -> vector<1x64xf32>
    %24 = vector.broadcast %23 : vector<1x64xf32> to vector<64x64xf32>
    %25 = arith.mulf %13, %24 : vector<64x64xf32>
    %26 = vector.broadcast %2 : vector<1x64xf32> to vector<64x64xf32>
    %27 = arith.mulf %25, %26 : vector<64x64xf32>
    %28 = vector.broadcast %3 : vector<1x64xf32> to vector<64x64xf32>
    %29 = arith.addf %27, %28 : vector<64x64xf32>
    %30 = arith.negf %29 : vector<64x64xf32>
    %31 = math.exp %30 : vector<64x64xf32>
    %cst_19 = arith.constant 1.000000e+00 : f32
    %32 = vector.broadcast %cst_19 : f32 to vector<64x64xf32>
    %33 = arith.addf %32, %31 : vector<64x64xf32>
    %34 = arith.divf %32, %33 : vector<64x64xf32>
    %35 = arith.mulf %29, %34 : vector<64x64xf32>
    %cst_20 = arith.constant 0.000000e+00 : bf16
    %36 = vector.broadcast %cst_20 : bf16 to vector<10x10x64xbf16>
    %c0_21 = arith.constant 0 : index
    %c0_22 = arith.constant 0 : index
    %c0_23 = arith.constant 0 : index
    %37 = vector.load %arg12[%c0_21, %c0_22, %c0_23] : memref<10x10x64xbf16, #tpu.memory_space<vmem>>, vector<10x10x64xbf16>
    tpu.vector_store %arg12[%c0_21, %c0_22, %c0_23], %36 {strides = array<i32>} : memref<10x10x64xbf16, #tpu.memory_space<vmem>>, vector<10x10x64xbf16>,
    %38 = vector.shape_cast %35 : vector<64x64xf32> to vector<8x8x64xf32>
    %39 = arith.truncf %38 : vector<8x8x64xf32> to vector<8x8x64xbf16>
    %c1 = arith.constant 1 : index
    %c1_24 = arith.constant 1 : index
    %c0_25 = arith.constant 0 : index
    %40 = vector.load %arg12[%c1, %c1_24, %c0_25] : memref<10x10x64xbf16, #tpu.memory_space<vmem>>, vector<8x8x64xbf16>
    tpu.vector_store %arg12[%c1, %c1_24, %c0_25], %39 {strides = array<i32>} : memref<10x10x64xbf16, #tpu.memory_space<vmem>>, vector<8x8x64xbf16>,
    %c0_26 = arith.constant 0 : index
    %c0_27 = arith.constant 0 : index
    %c0_28 = arith.constant 0 : index
    %41 = vector.load %arg12[%c0_26, %c0_27, %c0_28] : memref<10x10x64xbf16, #tpu.memory_space<vmem>>, vector<8x8x64xbf16>
    %42 = vector.shape_cast %41 : vector<8x8x64xbf16> to vector<64x64xbf16>
    %c0_29 = arith.constant 0 : index
    %c0_30 = arith.constant 0 : index
    %43 = vector.load %arg13[%c0_29, %c0_30] : memref<64x576xbf16, #tpu.memory_space<vmem>>, vector<64x64xbf16>
    tpu.vector_store %arg13[%c0_29, %c0_30], %42 {strides = array<i32>} : memref<64x576xbf16, #tpu.memory_space<vmem>>, vector<64x64xbf16>,
    %c0_31 = arith.constant 0 : index
    %c1_32 = arith.constant 1 : index
    %c0_33 = arith.constant 0 : index
    %44 = vector.load %arg12[%c0_31, %c1_32, %c0_33] : memref<10x10x64xbf16, #tpu.memory_space<vmem>>, vector<8x8x64xbf16>
    %45 = vector.shape_cast %44 : vector<8x8x64xbf16> to vector<64x64xbf16>
    %c0_34 = arith.constant 0 : index
    %c64 = arith.constant 64 : index
    %46 = vector.load %arg13[%c0_34, %c64] : memref<64x576xbf16, #tpu.memory_space<vmem>>, vector<64x64xbf16>
    tpu.vector_store %arg13[%c0_34, %c64], %45 {strides = array<i32>} : memref<64x576xbf16, #tpu.memory_space<vmem>>, vector<64x64xbf16>,
    %c0_35 = arith.constant 0 : index
    %c2 = arith.constant 2 : index
    %c0_36 = arith.constant 0 : index
    %47 = vector.load %arg12[%c0_35, %c2, %c0_36] : memref<10x10x64xbf16, #tpu.memory_space<vmem>>, vector<8x8x64xbf16>
    %48 = vector.shape_cast %47 : vector<8x8x64xbf16> to vector<64x64xbf16>
    %c0_37 = arith.constant 0 : index
    %c128 = arith.constant 128 : index
    %49 = vector.load %arg13[%c0_37, %c128] : memref<64x576xbf16, #tpu.memory_space<vmem>>, vector<64x64xbf16>
    tpu.vector_store %arg13[%c0_37, %c128], %48 {strides = array<i32>} : memref<64x576xbf16, #tpu.memory_space<vmem>>, vector<64x64xbf16>,
    %c1_38 = arith.constant 1 : index
    %c0_39 = arith.constant 0 : index
    %c0_40 = arith.constant 0 : index
    %50 = vector.load %arg12[%c1_38, %c0_39, %c0_40] : memref<10x10x64xbf16, #tpu.memory_space<vmem>>, vector<8x8x64xbf16>
    %51 = vector.shape_cast %50 : vector<8x8x64xbf16> to vector<64x64xbf16>
    %c0_41 = arith.constant 0 : index
    %c192 = arith.constant 192 : index
    %52 = vector.load %arg13[%c0_41, %c192] : memref<64x576xbf16, #tpu.memory_space<vmem>>, vector<64x64xbf16>
    tpu.vector_store %arg13[%c0_41, %c192], %51 {strides = array<i32>} : memref<64x576xbf16, #tpu.memory_space<vmem>>, vector<64x64xbf16>,
    %c1_42 = arith.constant 1 : index
    %c1_43 = arith.constant 1 : index
    %c0_44 = arith.constant 0 : index
    %53 = vector.load %arg12[%c1_42, %c1_43, %c0_44] : memref<10x10x64xbf16, #tpu.memory_space<vmem>>, vector<8x8x64xbf16>
    %54 = vector.shape_cast %53 : vector<8x8x64xbf16> to vector<64x64xbf16>
    %c0_45 = arith.constant 0 : index
    %c256 = arith.constant 256 : index
    %55 = vector.load %arg13[%c0_45, %c256] : memref<64x576xbf16, #tpu.memory_space<vmem>>, vector<64x64xbf16>
    tpu.vector_store %arg13[%c0_45, %c256], %54 {strides = array<i32>} : memref<64x576xbf16, #tpu.memory_space<vmem>>, vector<64x64xbf16>,
    %c1_46 = arith.constant 1 : index
    %c2_47 = arith.constant 2 : index
    %c0_48 = arith.constant 0 : index
    %56 = vector.load %arg12[%c1_46, %c2_47, %c0_48] : memref<10x10x64xbf16, #tpu.memory_space<vmem>>, vector<8x8x64xbf16>
    %57 = vector.shape_cast %56 : vector<8x8x64xbf16> to vector<64x64xbf16>
    %c0_49 = arith.constant 0 : index
    %c320 = arith.constant 320 : index
    %58 = vector.load %arg13[%c0_49, %c320] : memref<64x576xbf16, #tpu.memory_space<vmem>>, vector<64x64xbf16>
    tpu.vector_store %arg13[%c0_49, %c320], %57 {strides = array<i32>} : memref<64x576xbf16, #tpu.memory_space<vmem>>, vector<64x64xbf16>,
    %c2_50 = arith.constant 2 : index
    %c0_51 = arith.constant 0 : index
    %c0_52 = arith.constant 0 : index
    %59 = vector.load %arg12[%c2_50, %c0_51, %c0_52] : memref<10x10x64xbf16, #tpu.memory_space<vmem>>, vector<8x8x64xbf16>
    %60 = vector.shape_cast %59 : vector<8x8x64xbf16> to vector<64x64xbf16>
    %c0_53 = arith.constant 0 : index
    %c384 = arith.constant 384 : index
    %61 = vector.load %arg13[%c0_53, %c384] : memref<64x576xbf16, #tpu.memory_space<vmem>>, vector<64x64xbf16>
    tpu.vector_store %arg13[%c0_53, %c384], %60 {strides = array<i32>} : memref<64x576xbf16, #tpu.memory_space<vmem>>, vector<64x64xbf16>,
    %c2_54 = arith.constant 2 : index
    %c1_55 = arith.constant 1 : index
    %c0_56 = arith.constant 0 : index
    %62 = vector.load %arg12[%c2_54, %c1_55, %c0_56] : memref<10x10x64xbf16, #tpu.memory_space<vmem>>, vector<8x8x64xbf16>
    %63 = vector.shape_cast %62 : vector<8x8x64xbf16> to vector<64x64xbf16>
    %c0_57 = arith.constant 0 : index
    %c448 = arith.constant 448 : index
    %64 = vector.load %arg13[%c0_57, %c448] : memref<64x576xbf16, #tpu.memory_space<vmem>>, vector<64x64xbf16>
    tpu.vector_store %arg13[%c0_57, %c448], %63 {strides = array<i32>} : memref<64x576xbf16, #tpu.memory_space<vmem>>, vector<64x64xbf16>,
    %c2_58 = arith.constant 2 : index
    %c2_59 = arith.constant 2 : index
    %c0_60 = arith.constant 0 : index
    %65 = vector.load %arg12[%c2_58, %c2_59, %c0_60] : memref<10x10x64xbf16, #tpu.memory_space<vmem>>, vector<8x8x64xbf16>
    %66 = vector.shape_cast %65 : vector<8x8x64xbf16> to vector<64x64xbf16>
    %c0_61 = arith.constant 0 : index
    %c512 = arith.constant 512 : index
    %67 = vector.load %arg13[%c0_61, %c512] : memref<64x576xbf16, #tpu.memory_space<vmem>>, vector<64x64xbf16>
    tpu.vector_store %arg13[%c0_61, %c512], %66 {strides = array<i32>} : memref<64x576xbf16, #tpu.memory_space<vmem>>, vector<64x64xbf16>,
    %c0_62 = arith.constant 0 : index
    %c0_63 = arith.constant 0 : index
    %68 = vector.load %arg13[%c0_62, %c0_63] : memref<64x576xbf16, #tpu.memory_space<vmem>>, vector<64x576xbf16>
    %c0_64 = arith.constant 0 : index
    %c0_65 = arith.constant 0 : index
    %69 = vector.load %arg7[%c0_64, %c0_65] : memref<576x64xbf16, #tpu.memory_space<vmem>>, vector<576x64xbf16>
    %cst_66 = arith.constant dense<0.000000e+00> : vector<64x64xf32>
    %70 = tpu.matmul %68, %69, %cst_66 {dimension_numbers = #tpu.dot_dimension_numbers<[1], [0], [0], [1], [0, 0, 1, 1], [], []>} : vector<64x576xbf16>, vector<576x64xbf16>, vector<64x64xf32> -> vector<64x64xf32>
    %c0_67 = arith.constant 0 : index
    %c0_68 = arith.constant 0 : index
    %71 = vector.load %arg8[%c0_67, %c0_68] : memref<1x64xf32, #tpu.memory_space<vmem>>, vector<1x64xf32>
    %72 = vector.broadcast %71 : vector<1x64xf32> to vector<64x64xf32>
    %73 = arith.addf %70, %72 : vector<64x64xf32>
    %c0_69 = arith.constant 0 : index
    %c0_70 = arith.constant 0 : index
    %c0_71 = arith.constant 0 : index
    %c0_72 = arith.constant 0 : index
    %74 = vector.load %arg2[%c0_69, %c0_70, %c0_71, %c0_72] : memref<1x8x8x32xf32, #tpu.memory_space<vmem>>, vector<1x8x8x32xf32>
    %75 = vector.shape_cast %74 : vector<1x8x8x32xf32> to vector<64x32xf32>
    %76 = arith.truncf %75 : vector<64x32xf32> to vector<64x32xbf16>
    %c0_73 = arith.constant 0 : index
    %c0_74 = arith.constant 0 : index
    %77 = vector.load %arg9[%c0_73, %c0_74] : memref<32x64xbf16, #tpu.memory_space<vmem>>, vector<32x64xbf16>
    %cst_75 = arith.constant dense<0.000000e+00> : vector<64x64xf32>
    %78 = tpu.matmul %76, %77, %cst_75 {dimension_numbers = #tpu.dot_dimension_numbers<[1], [0], [0], [1], [0, 0, 1, 1], [], []>} : vector<64x32xbf16>, vector<32x64xbf16>, vector<64x64xf32> -> vector<64x64xf32>
    %c0_76 = arith.constant 0 : index
    %c0_77 = arith.constant 0 : index
    %79 = vector.load %arg10[%c0_76, %c0_77] : memref<1x64xf32, #tpu.memory_space<vmem>>, vector<1x64xf32>
    %80 = vector.broadcast %79 : vector<1x64xf32> to vector<64x64xf32>
    %81 = arith.addf %78, %80 : vector<64x64xf32>
    %82 = arith.addf %81, %73 : vector<64x64xf32>
    %83 = vector.shape_cast %82 : vector<64x64xf32> to vector<1x8x8x64xf32>
    %c0_78 = arith.constant 0 : index
    %c0_79 = arith.constant 0 : index
    %c0_80 = arith.constant 0 : index
    %c0_81 = arith.constant 0 : index
    %84 = vector.load %arg11[%c0_78, %c0_79, %c0_80, %c0_81] : memref<1x8x8x64xf32, #tpu.memory_space<vmem>>, vector<1x8x8x64xf32>
    tpu.vector_store %arg11[%c0_78, %c0_79, %c0_80, %c0_81], %83 {strides = array<i32>} : memref<1x8x8x64xf32, #tpu.memory_space<vmem>>, vector<1x8x8x64xf32>,
    return
  }
  func.func @transform_0(%arg0: i32) -> (i32, i32, i32, i32) {
    %c0_i32 = arith.constant 0 : i32
    %c0_i32_0 = arith.constant 0 : i32
    %c0_i32_1 = arith.constant 0 : i32
    %c0_i32_2 = arith.constant 0 : i32
    return %arg0, %c0_i32, %c0_i32_0, %c0_i32_1 : i32, i32, i32, i32
  }
  func.func @transform_1(%arg0: i32) -> (i32, i32, i32, i32) {
    %c0_i32 = arith.constant 0 : i32
    %c0_i32_0 = arith.constant 0 : i32
    %c0_i32_1 = arith.constant 0 : i32
    %c0_i32_2 = arith.constant 0 : i32
    return %arg0, %c0_i32, %c0_i32_0, %c0_i32_1 : i32, i32, i32, i32
  }
  func.func @transform_2(%arg0: i32) -> (i32, i32) {
    %c0_i32 = arith.constant 0 : i32
    %c0_i32_0 = arith.constant 0 : i32
    %c0_i32_1 = arith.constant 0 : i32
    return %c0_i32, %c0_i32_0 : i32, i32
  }
  func.func @transform_3(%arg0: i32) -> (i32, i32) {
    %c0_i32 = arith.constant 0 : i32
    %c0_i32_0 = arith.constant 0 : i32
    %c0_i32_1 = arith.constant 0 : i32
    return %c0_i32, %c0_i32_0 : i32, i32
  }
  func.func @transform_4(%arg0: i32) -> (i32, i32) {
    %c0_i32 = arith.constant 0 : i32
    %c0_i32_0 = arith.constant 0 : i32
    %c0_i32_1 = arith.constant 0 : i32
    return %c0_i32, %c0_i32_0 : i32, i32
  }
  func.func @transform_5(%arg0: i32) -> (i32, i32) {
    %c0_i32 = arith.constant 0 : i32
    %c0_i32_0 = arith.constant 0 : i32
    %c0_i32_1 = arith.constant 0 : i32
    return %c0_i32, %c0_i32_0 : i32, i32
  }
  func.func @transform_6(%arg0: i32) -> (i32, i32) {
    %c0_i32 = arith.constant 0 : i32
    %c0_i32_0 = arith.constant 0 : i32
    %c0_i32_1 = arith.constant 0 : i32
    return %c0_i32, %c0_i32_0 : i32, i32
  }
  func.func @transform_7(%arg0: i32) -> (i32, i32) {
    %c0_i32 = arith.constant 0 : i32
    %c0_i32_0 = arith.constant 0 : i32
    %c0_i32_1 = arith.constant 0 : i32
    return %c0_i32, %c0_i32_0 : i32, i32
  }
  func.func @transform_8(%arg0: i32) -> (i32, i32) {
    %c0_i32 = arith.constant 0 : i32
    %c0_i32_0 = arith.constant 0 : i32
    %c0_i32_1 = arith.constant 0 : i32
    return %c0_i32, %c0_i32_0 : i32, i32
  }
  func.func @transform_9(%arg0: i32) -> (i32, i32) {
    %c0_i32 = arith.constant 0 : i32
    %c0_i32_0 = arith.constant 0 : i32
    %c0_i32_1 = arith.constant 0 : i32
    return %c0_i32, %c0_i32_0 : i32, i32
  }
  func.func @transform_10(%arg0: i32) -> (i32, i32, i32, i32) {
    %c0_i32 = arith.constant 0 : i32
    %c0_i32_0 = arith.constant 0 : i32
    %c0_i32_1 = arith.constant 0 : i32
    %c0_i32_2 = arith.constant 0 : i32
    return %arg0, %c0_i32, %c0_i32_0, %c0_i32_1 : i32, i32, i32, i32
  }
}

</mosaic_0001>

<bundles_post_ra>
// kernel: encoder_res_block.2
= control target key start
LH: loop header
LB: loop body
LE: loop exit
PB: predicated region body
PF: predicated region fallthrough
CT: control target
= control target key end

     0   :  { %s3581_s30 = smov 0   ;;  %s5002_s0 = inlined_call_operand.vmem [shape: f32[2,16,16,32], index: 0, kind: input, shape index: {}]   ;;  %s5003_s1 = inlined_call_operand.vmem [shape: f32[1,32], index: 1, kind: input, shape index: {}]   ;;  %s5004_s2 = inlined_call_operand.vmem [shape: f32[1,32], index: 2, kind: input, shape index: {}]   ;;  %s5005_s3 = inlined_call_operand.vmem [shape: f32[32,32], index: 3, kind: input, shape index: {}]   ;;  %s5006_s4 = inlined_call_operand.vmem [shape: f32[32,32], index: 4, kind: input, shape index: {}]   ;;  %s5007_s5 = inlined_call_operand.vmem [shape: f32[64,256], index: 5, kind: input, shape index: {}]   ;;  %s5008_s6 = inlined_call_operand.vmem [shape: bf16[288,64], index: 6, kind: input, shape index: {}]   ;;  %s5009_s7 = inlined_call_operand.vmem [shape: f32[1,64], index: 7, kind: input, shape index: {}]   ;;  %s5010_s8 = inlined_call_operand.vmem [shape: f32[2,8,8,64], index: 8, kind: output, shape index: {0}]   ;;  %s5011_s9 = inlined_call_operand.vmem [shape: f32[2,8,8,32], index: 9, kind: output, shape index: {1}]  }
   0x1 LB: > { %s2976_s10 = sadd.s32 4294967295, %s3523_s30   ;;  %p2980_p0 = scmp.ge.s32.totalorder %s3523_s30, 1  ;;  %s3523_s30 = sphi %s3581_s30, %s20_s30  }
   0x2   : > { %p290_p1 = scmp.lt.s32.totalorder %s3523_s30, 3 }
   0x4   : > { %p291_p2 = pnand %p2980_p0, %p290_p1 }
   0x6   : > { %294 = sbr.rel (%p291_p2) target bundleno = 1697 (0x6a1), region = 52 }
   0xb   : > { %v384_v0 = vld [vmem:[%s5005_s3 + $0x18] sm:$0xff]  ;;  %p331_p3 = scmp.lt.s32.totalorder %s2976_s10, 1  ;;  %v3525_v1 = vmov 0.0   ;;  %v383_v2 = vld [vmem:[%s5005_s3 + $0x10] sm:$0xff]  ;;  %vm3526_vm0 = vmmov 0   ;;  %v382_v3 = vld [vmem:[%s5005_s3 + $0x8] sm:$0xff] }
   0xc   : > { %3283 = vmatprep.subr.mxu1 %v3525_v1  ;;  %3291 = vmatprep.mubr.msk.f32.mxu1 %vm3526_vm0, %v3525_v1  ;;  %v381_v4 = vld [vmem:[%s5005_s3] sm:$0xff]  ;;  %vm389_vm1 = vcmask 261120   ;;  %vm1229_vm2 = vcmask 257024   ;;  %vm1231_vm3 = vcmask 253952   ;;  %vm1864_vm4 = vcmask 1042432   ;;  %s3528_s29 = smov 64  }
   0xd   : > { %3284 = vmatpush3.msra.mxu1 %v384_v0  ;;  %s5092_s10 = smov (!%p331_p3, %s2976_s10), 1  ;;  %3305 = vmatprep.subr.mxu0 %v3525_v1  ;;  %vm1865_vm5 = vcmask 1046532   ;;  %vm1684_vm7 = vsmask.f32 3328  ;;  %vm1685_vm8 = vsmask.f32 7440 }
   0xe   : > { %3285 = vmatprep.subr.mxu1 %v3525_v1  ;;  %3306 = vmatpush3.msra.mxu0 %v384_v0  ;;  %s3094_s19 = sshll.u32 %s5092_s10, 8  ;;  %vm4485_vm6 = vmor %vm1864_vm4, %vm1865_vm5  ;;  %s3529_s13 = smov 32   ;;  %vm1599_vm10 = vsmask.f32 7938  ;;  %vm1605_vm11 = vsmask.f32 256 }
   0xf   : > { %3286 = vmatpush3.msra.mxu1 %v383_v2  ;;  %3307 = vmatprep.subr.mxu0 %v3525_v1  ;;  %s3614_s22 = scalar_lea.vmem %s5002_s0, %s3094_s19  ;;  %vm4493_vm9 = vmor %vm1684_vm7, %vm1685_vm8  ;;  %s3530_s16 = smov 96   ;;  %vm1823_vm14 = vcmask 519424   ;;  %vm1923_vm15 = vcmask 781824  }
  0x10   : > { %3287 = vmatprep.subr.mxu1 %v3525_v1  ;;  %3308 = vmatpush3.msra.mxu0 %v383_v2  ;;  %v3617_v5 = vld [vmem:[%s3614_s22] sm:$0xff]  ;;  %v3620_v6 = vld [vmem:[%s3614_s22 + $0x8] sm:$0xff]  ;;  %v3623_v7 = vld [vmem:[%s3614_s22 + $0x10] sm:$0xff]  ;;  %s3095_s17 = sshll.u32 %s5092_s10, 6 }
  0x11   : > { %3288 = vmatpush3.msra.mxu1 %v382_v3  ;;  %3309 = vmatprep.subr.mxu0 %v3525_v1  ;;  %v3628_v8 = vld [vmem:[%s3614_s22 + $0x18] sm:$0xff]  ;;  %v390_v9 = vsel %vm389_vm1, %v3617_v5, 0.0  ;;  %v391_v10 = vsel %vm389_vm1, %v3620_v6, 0.0  ;;  %v393_v11 = vsel %vm389_vm1, %v3623_v7, 0.0  ;;  %v3637_v12 = vld [vmem:[%s3614_s22 + $0x20] sm:$0xff]  ;;  %v3644_v15 = vld [vmem:[%s3614_s22 + $0x28] sm:$0xff]  ;;  %s4855_s19 = scalar_lea.vmem %s5011_s9, %s3095_s17 }
  0x12   : > { %3289 = vmatprep.subr.mxu1 %v3525_v1  ;;  %3310 = vmatpush3.msra.mxu0 %v382_v3  ;;  %v392_v13 = vadd.f32 %v391_v10, %v390_v9  ;;  %v395_v14 = vsel %vm389_vm1, %v3628_v8, 0.0  ;;  %v397_v17 = vsel %vm389_vm1, %v3637_v12, 0.0  ;;  %v3651_v18 = vld [vmem:[%s3614_s22 + $0x30] sm:$0xff]  ;;  %v3654_v20 = vld [vmem:[%s3614_s22 + $0x38] sm:$0xff]  ;;  %v3657_v21 = vld [vmem:[%s3614_s22 + $0x40] sm:$0xff]  ;;  %v399_v23 = vsel %vm389_vm1, %v3644_v15, 0.0 }
  0x13   : > { %3290 = vmatpush3.msra.mxu1 %v381_v4  ;;  %3311 = vmatprep.subr.mxu0 %v3525_v1  ;;  %v3660_v22 = vld [vmem:[%s3614_s22 + $0x48] sm:$0xff]  ;;  %v3665_v24 = vld [vmem:[%s3614_s22 + $0x50] sm:$0xff]  ;;  %v3668_v25 = vld [vmem:[%s3614_s22 + $0x58] sm:$0xff]  ;;  %v401_v27 = vsel %vm389_vm1, %v3651_v18, 0.0  ;;  %v403_v29 = vsel %vm389_vm1, %v3654_v20, 0.0  ;;  %v405_v30 = vsel %vm389_vm1, %v3657_v21, 0.0 }
  0x14   : > { %3294 = vmatprep.subr.mxu1 %v3525_v1  ;;  %3312 = vmatpush3.msra.mxu0 %v381_v4  ;;  %v394_v16 = vadd.f32 %v393_v11, %v392_v13  ;;  %v407_v31 = vsel %vm389_vm1, %v3660_v22, 0.0  ;;  %v409_v32 = vsel %vm389_vm1, %v3665_v24, 0.0  ;;  %v411_v33 = vsel %vm389_vm1, %v3668_v25, 0.0  ;;  %v3683_v36 = vld [vmem:[%s3614_s22 + $0x60] sm:$0xff]  ;;  %v3686_v39 = vld [vmem:[%s3614_s22 + $0x68] sm:$0xff]  ;;  %v3691_v42 = vld [vmem:[%s3614_s22 + $0x70] sm:$0xff] }
  0x15   : > { %3313 = vmatprep.mubr.msk.f32.mxu0 %vm3526_vm0, %v3525_v1  ;;  %v413_v41 = vsel %vm389_vm1, %v3683_v36, 0.0  ;;  %v415_v44 = vsel %vm389_vm1, %v3686_v39, 0.0  ;;  %v3696_v45 = vld [vmem:[%s3614_s22 + $0x78] sm:$0xff]  ;;  %v417_v47 = vsel %vm389_vm1, %v3691_v42, 0.0  ;;  %v3701_v48 = vld [vmem:[%s3614_s22 + $0x80] sm:$0xff]  ;;  %v3706_v51 = vld [vmem:[%s3614_s22 + $0x88] sm:$0xff] }
  0x16   : > { %v396_v19 = vadd.f32 %v395_v14, %v394_v16  ;;  %v419_v50 = vsel %vm389_vm1, %v3696_v45, 0.0  ;;  %v421_v53 = vsel %vm389_vm1, %v3701_v48, 0.0  ;;  %v3711_v54 = vld [vmem:[%s3614_s22 + $0x90] sm:$0xff]  ;;  %v423_v56 = vsel %vm389_vm1, %v3706_v51, 0.0  ;;  %v3716_v57 = vld [vmem:[%s3614_s22 + $0x98] sm:$0xff]  ;;  %v3721_v60 = vld [vmem:[%s3614_s22 + $0xa0] sm:$0xff] }
  0x17   : > { %v425_v59 = vsel %vm389_vm1, %v3711_v54, 0.0  ;;  %v427_v62 = vsel %vm389_vm1, %v3716_v57, 0.0  ;;  %v3726_v63 = vld [vmem:[%s3614_s22 + $0xa8] sm:$0xff]  ;;  %v429_v2 = vsel %vm389_vm1, %v3721_v60, 0.0  ;;  %v3731_v3 = vld [vmem:[%s3614_s22 + $0xb0] sm:$0xff]  ;;  %v3736_v10 = vld [vmem:[%s3614_s22 + $0xb8] sm:$0xff] }
  0x18   : > { %v398_v26 = vadd.f32 %v397_v17, %v396_v19  ;;  %v431_v9 = vsel %vm389_vm1, %v3726_v63, 0.0  ;;  %v433_v13 = vsel %vm389_vm1, %v3731_v3, 0.0  ;;  %v3741_v14 = vld [vmem:[%s3614_s22 + $0xc0] sm:$0xff]  ;;  %v435_v17 = vsel %vm389_vm1, %v3736_v10, 0.0  ;;  %v3746_v19 = vld [vmem:[%s3614_s22 + $0xc8] sm:$0xff]  ;;  %vm4511_vm12 = vmand %vm1229_vm2, %vm1599_vm10 }
  0x19   : > { %vm4516_vm13 = vmand %vm1231_vm3, %vm1605_vm11 }
  0x1a   : > { %v400_v28 = vadd.f32 %v399_v23, %v398_v26  ;;  %v437_v26 = vsel %vm389_vm1, %v3741_v14, 0.0 }
  0x1c   : > { %v402_v34 = vadd.f32 %v401_v27, %v400_v28  ;;  %v3751_v27 = vld [vmem:[%s3614_s22 + $0xd0] sm:$0xff] }
  0x1e   : > { %v404_v35 = vadd.f32 %v403_v29, %v402_v34  ;;  %v439_v29 = vsel %vm389_vm1, %v3746_v19, 0.0 }
  0x20   : > { %v406_v37 = vadd.f32 %v405_v30, %v404_v35  ;;  %v3756_v30 = vld [vmem:[%s3614_s22 + $0xd8] sm:$0xff] }
  0x21   : > { %v443_v35 = vsel %vm389_vm1, %v3756_v30, 0.0 }
  0x22   : > { %v408_v38 = vadd.f32 %v407_v31, %v406_v37  ;;  %v3766_v37 = vld [vmem:[%s3614_s22 + $0xe8] sm:$0xff] }
  0x24   : > { %v410_v40 = vadd.f32 %v409_v32, %v408_v38  ;;  %v441_v32 = vsel %vm389_vm1, %v3751_v27, 0.0 }
  0x26   : > { %v412_v43 = vadd.f32 %v411_v33, %v410_v40  ;;  %v3761_v33 = vld [vmem:[%s3614_s22 + $0xe0] sm:$0xff] }
  0x27   : > { %v445_v40 = vsel %vm389_vm1, %v3761_v33, 0.0 }
  0x28   : > { %v414_v46 = vadd.f32 %v413_v41, %v412_v43  ;;  %v3771_v41 = vld [vmem:[%s3614_s22 + $0xf0] sm:$0xff] }
  0x2a   : > { %v416_v49 = vadd.f32 %v415_v44, %v414_v46  ;;  %v447_v44 = vsel %vm389_vm1, %v3766_v37, 0.0  ;;  %v3776_v46 = vld [vmem:[%s3614_s22 + $0xf8] sm:$0xff]  ;;  %s4981_s22 = scalar_lea.vmem %s5010_s8, %s3095_s17 }
  0x2c   : > { %v418_v52 = vadd.f32 %v417_v47, %v416_v49  ;;  %v449_v49 = vsel %vm389_vm1, %v3771_v41, 0.0 }
  0x2e   : > { %v420_v55 = vadd.f32 %v419_v50, %v418_v52  ;;  %v451_v52 = vsel %vm389_vm1, %v3776_v46, 0.0 }
  0x30   : > { %v422_v58 = vadd.f32 %v421_v53, %v420_v55 }
  0x32   : > { %v424_v61 = vadd.f32 %v423_v56, %v422_v58 }
  0x34   : > { %v426_v0 = vadd.f32 %v425_v59, %v424_v61 }
  0x36   : > { %v428_v4 = vadd.f32 %v427_v62, %v426_v0 }
  0x38   : > { %v430_v11 = vadd.f32 %v429_v2, %v428_v4  ;;  %v388_v2 = vld [vmem:[%s5006_s4 + $0x18] sm:$0xff]  ;;  %v387_v4 = vld [vmem:[%s5006_s4 + $0x10] sm:$0xff] }
  0x3a   : > { %v432_v16 = vadd.f32 %v431_v9, %v430_v11  ;;  %v386_v9 = vld [vmem:[%s5006_s4 + $0x8] sm:$0xff]  ;;  %v385_v11 = vld [vmem:[%s5006_s4] sm:$0xff] }
  0x3c   : > { %v434_v23 = vadd.f32 %v433_v13, %v432_v16 }
  0x3e   : > { %v436_v28 = vadd.f32 %v435_v17, %v434_v23  ;;  %v607_v23 = vlaneseq }
  0x40   : > { %v438_v31 = vadd.f32 %v437_v26, %v436_v28  ;;  %v3808_v26 = vshrl.u32 %v607_v23, 7 }
  0x42   : > { %v440_v34 = vadd.f32 %v439_v29, %v438_v31  ;;  %v5012_v31 = vsub.s32 0, %v3808_v26 }
  0x44   : > { %v442_v38 = vadd.f32 %v441_v32, %v440_v34 }
  0x46   : > { %v444_v43 = vadd.f32 %v443_v35, %v442_v38 }
  0x48   : > { %v446_v47 = vadd.f32 %v445_v40, %v444_v43 }
  0x4a   : > { %v448_v50 = vadd.f32 %v447_v44, %v446_v47 }
  0x4c   : > { %v450_v53 = vadd.f32 %v449_v49, %v448_v50 }
  0x4e   : > { %v452_v55 = vadd.f32 %v451_v52, %v450_v53 }
  0x50   : > { %v453_v56 = vrot.slane %v452_v55, 4 }
  0x52   : > { %v454_v58 = vadd.f32 %v453_v56, %v452_v55 }
  0x54   : > { %v455_v59 = vrot.slane %v454_v58, 2 }
  0x56   : > { %v456_v61 = vadd.f32 %v455_v59, %v454_v58 }
  0x58   : > { %v457_v62 = vrot.slane %v456_v61, 1 }
  0x5a   : > { %v458_v0 = vadd.f32 %v457_v62, %v456_v61 }
  0x5c   : > { %3292 = vmatmul.mubr.msk.f32.vlgmr.msra.gmra.mxu1 %vm389_vm1, %v458_v0 }
  0x5d   : > { %3295 = vmatpush3.msra.mxu1 %v388_v2  ;;  %3302 = vmatprep.mubr.msk.f32.mxu1 %vm3526_vm0, %v3525_v1 }
  0x5e   : > { %3296 = vmatprep.subr.mxu1 %v3525_v1 }
  0x5f   : > { %3297 = vmatpush3.msra.mxu1 %v387_v4 }
  0x60   : > { %3298 = vmatprep.subr.mxu1 %v3525_v1 }
  0x61   : > { %3299 = vmatpush3.msra.mxu1 %v386_v9 }
  0x62   : > { %3300 = vmatprep.subr.mxu1 %v3525_v1 }
  0x63   : > { %3301 = vmatpush3.msra.mxu1 %v385_v11 }
  0x64   : > { %3316 = vmatprep.subr.mxu1 %v3525_v1 }
 0x11c   : > { %v528_v13 = vpop.f32.mrf.mxu1 }
 0x11d   : > { %v533_v16 = vmul.f32 0.00390625, %v528_v13 }
 0x11e   : > { %v3293_v17 = vpop.f32.mrf.mxu1 }
 0x11f   : > { %3303 = vmatmul.mubr.msk.f32.vlgmr.msra.gmra.mxu1 %vm389_vm1, %v533_v16 }
 0x120   : > { %3317 = vmatpush3.msra.mxu1 %v388_v2  ;;  %3324 = vmatprep.mubr.msk.f32.mxu1 %vm3526_vm0, %v3525_v1  ;;  %vm1972_vm0 = vcmask 1044224  }
 0x121   : > { %3318 = vmatprep.subr.mxu1 %v3525_v1 }
 0x122   : > { %3319 = vmatpush3.msra.mxu1 %v387_v4 }
 0x123   : > { %3320 = vmatprep.subr.mxu1 %v3525_v1 }
 0x124   : > { %3321 = vmatpush3.msra.mxu1 %v386_v9 }
 0x125   : > { %3322 = vmatprep.subr.mxu1 %v3525_v1 }
 0x126   : > { %3323 = vmatpush3.msra.mxu1 %v385_v11 }
 0x127   : > { %3181 = vmatprep.subr.mxu1 %v3776_v46 }
 0x1df   : > { %v603_v28 = vpop.f32.mrf.mxu1 }
 0x1e0   : > { %v3813_v32 = vrot.slane %v603_v28, %v5012_v31 }
 0x1e1   : > { %v3304_v29 = vpop.f32.mrf.mxu1 }
 0x1e2   : > { %v3817_v34 = vsub.f32 %v3617_v5, %v3813_v32  ;;  %v3821_v1 = vsub.f32 %v3620_v6, %v3813_v32  ;;  %v3825_v35 = vsub.f32 %v3623_v7, %v3813_v32  ;;  %v3829_v38 = vsub.f32 %v3628_v8, %v3813_v32 }
 0x1e3   : > { %v3837_v44 = vsub.f32 %v3637_v12, %v3813_v32  ;;  %v3843_v49 = vsub.f32 %v3644_v15, %v3813_v32  ;;  %v3851_v56 = vsub.f32 %v3651_v18, %v3813_v32  ;;  %v3858_v62 = vsub.f32 %v3654_v20, %v3813_v32 }
 0x1e4   : > { %5036 = vst [vmem:[#allocation4_spill] sm:$0xff] %v3817_v34  ;;  %5037 = vst [vmem:[#allocation5_spill] sm:$0xff] %v3821_v1  ;;  %v643_v40 = vmul.f32 %v3817_v34, %v3817_v34  ;;  %v644_v43 = vmul.f32 %v3821_v1, %v3821_v1  ;;  %v645_v47 = vmul.f32 %v3825_v35, %v3825_v35 }
 0x1e5   : > { %5038 = vst [vmem:[#allocation6_spill] sm:$0xff] %v3825_v35  ;;  %5039 = vst [vmem:[#allocation7_spill] sm:$0xff] %v3829_v38  ;;  %v646_v50 = vmul.f32 %v3829_v38, %v3829_v38  ;;  %v647_v58 = vmul.f32 %v3837_v44, %v3837_v44  ;;  %v648_v0 = vmul.f32 %v3843_v49, %v3843_v49 }
 0x1e6   : > { %5040 = vst [vmem:[#allocation8_spill] sm:$0xff] %v3837_v44  ;;  %5041 = vst [vmem:[#allocation9_spill] sm:$0xff] %v3843_v49  ;;  %v675_v52 = vsel %vm389_vm1, %v643_v40, 0.0  ;;  %v676_v53 = vsel %vm389_vm1, %v644_v43, 0.0  ;;  %v678_v59 = vsel %vm389_vm1, %v645_v47, 0.0  ;;  %v3865_v9 = vsub.f32 %v3657_v21, %v3813_v32 }
 0x1e7   : > { %v677_v55 = vadd.f32 %v676_v53, %v675_v52  ;;  %5042 = vst [vmem:[#allocation10_spill] sm:$0xff] %v3851_v56  ;;  %5043 = vst [vmem:[#allocation11_spill] sm:$0xff] %v3858_v62  ;;  %v680_v2 = vsel %vm389_vm1, %v646_v50, 0.0  ;;  %v649_v11 = vmul.f32 %v3851_v56, %v3851_v56  ;;  %v682_v13 = vsel %vm389_vm1, %v647_v58, 0.0 }
 0x1e8   : > { %5044 = vst [vmem:[#allocation12_spill] sm:$0xff] %v3865_v9  ;;  %v3872_v17 = vsub.f32 %v3660_v22, %v3813_v32  ;;  %v650_v23 = vmul.f32 %v3858_v62, %v3858_v62  ;;  %v684_v28 = vsel %vm389_vm1, %v648_v0, 0.0  ;;  %v3879_v40 = vsub.f32 %v3665_v24, %v3813_v32 }
 0x1e9   : > { %v679_v61 = vadd.f32 %v678_v59, %v677_v55  ;;  %v651_v43 = vmul.f32 %v3865_v9, %v3865_v9  ;;  %v686_v47 = vsel %vm389_vm1, %v649_v11, 0.0  ;;  %v3886_v52 = vsub.f32 %v3668_v25, %v3813_v32 }
 0x1ea   : > { %5045 = vst [vmem:[#allocation13_spill] sm:$0xff] %v3872_v17  ;;  %v652_v53 = vmul.f32 %v3872_v17, %v3872_v17  ;;  %v688_v55 = vsel %vm389_vm1, %v650_v23, 0.0  ;;  %v3893_v59 = vsub.f32 %v3683_v36, %v3813_v32  ;;  %v3907_v23 = vsub.f32 %v3691_v42, %v3813_v32 }
 0x1eb   : > { %v681_v4 = vadd.f32 %v680_v2, %v679_v61  ;;  %v653_v61 = vmul.f32 %v3879_v40, %v3879_v40  ;;  %v690_v0 = vsel %vm389_vm1, %v651_v43, 0.0  ;;  %v654_v11 = vmul.f32 %v3886_v52, %v3886_v52 }
 0x1ed   : > { %v683_v16 = vadd.f32 %v682_v13, %v681_v4  ;;  %v3900_v4 = vsub.f32 %v3686_v39, %v3813_v32  ;;  %v692_v13 = vsel %vm389_vm1, %v652_v53, 0.0  ;;  %v696_v53 = vsel %vm389_vm1, %v654_v11, 0.0 }
 0x1ef   : > { %v685_v29 = vadd.f32 %v684_v28, %v683_v16  ;;  %v655_v28 = vmul.f32 %v3893_v59, %v3893_v59 }
 0x1f1   : > { %v687_v50 = vadd.f32 %v686_v47, %v685_v29  ;;  %v694_v29 = vsel %vm389_vm1, %v653_v61, 0.0  ;;  %v3914_v47 = vsub.f32 %v3696_v45, %v3813_v32  ;;  %v698_v61 = vsel %vm389_vm1, %v655_v28, 0.0 }
 0x1f3   : > { %v689_v58 = vadd.f32 %v688_v55, %v687_v50  ;;  %v656_v50 = vmul.f32 %v3900_v4, %v3900_v4 }
 0x1f5   : > { %v691_v2 = vadd.f32 %v690_v0, %v689_v58  ;;  %v3921_v58 = vsub.f32 %v3701_v48, %v3813_v32  ;;  %v657_v0 = vmul.f32 %v3907_v23, %v3907_v23  ;;  %v700_v11 = vsel %vm389_vm1, %v656_v50, 0.0 }
 0x1f7   : > { %v693_v16 = vadd.f32 %v692_v13, %v691_v2  ;;  %5046 = vst [vmem:[#allocation14_spill] sm:$0xff] %v3921_v58  ;;  %v3928_v13 = vsub.f32 %v3706_v51, %v3813_v32  ;;  %v702_v28 = vsel %vm389_vm1, %v657_v0, 0.0 }
 0x1f9   : > { %v695_v43 = vadd.f32 %v694_v29, %v693_v16  ;;  %5047 = vst [vmem:[#allocation15_spill] sm:$0xff] %v3928_v13  ;;  %v658_v16 = vmul.f32 %v3914_v47, %v3914_v47  ;;  %v660_v31 = vmul.f32 %v3928_v13, %v3928_v13 }
 0x1fb   : > { %v697_v55 = vadd.f32 %v696_v53, %v695_v43  ;;  %v3935_v43 = vsub.f32 %v3711_v54, %v3813_v32  ;;  %v659_v53 = vmul.f32 %v3921_v58, %v3921_v58  ;;  %v704_v50 = vsel %vm389_vm1, %v658_v16, 0.0 }
 0x1fc   : > { %v708_v16 = vsel %vm389_vm1, %v660_v31, 0.0 }
 0x1fd   : > { %v699_v2 = vadd.f32 %v698_v61, %v697_v55  ;;  %5048 = vst [vmem:[#allocation16_spill] sm:$0xff] %v3935_v43  ;;  %v3942_v61 = vsub.f32 %v3716_v57, %v3813_v32  ;;  %v661_v34 = vmul.f32 %v3935_v43, %v3935_v43  ;;  %v706_v0 = vsel %vm389_vm1, %v659_v53, 0.0 }
 0x1ff   : > { %v701_v29 = vadd.f32 %v700_v11, %v699_v2  ;;  %5049 = vst [vmem:[#allocation17_spill] sm:$0xff] %v3942_v61  ;;  %v3949_v11 = vsub.f32 %v3721_v60, %v3813_v32  ;;  %v662_v58 = vmul.f32 %v3942_v61, %v3942_v61  ;;  %v710_v53 = vsel %vm389_vm1, %v661_v34, 0.0 }
 0x201   : > { %v703_v55 = vadd.f32 %v702_v28, %v701_v29  ;;  %5050 = vst [vmem:[#allocation18_spill] sm:$0xff] %v3949_v11  ;;  %v3956_v28 = vsub.f32 %v3726_v63, %v3813_v32  ;;  %v663_v1 = vmul.f32 %v3949_v11, %v3949_v11  ;;  %v712_v31 = vsel %vm389_vm1, %v662_v58, 0.0 }
 0x203   : > { %v705_v2 = vadd.f32 %v704_v50, %v703_v55  ;;  %5051 = vst [vmem:[#allocation19_spill] sm:$0xff] %v3956_v28  ;;  %v3963_v50 = vsub.f32 %v3731_v3, %v3813_v32  ;;  %v664_v13 = vmul.f32 %v3956_v28, %v3956_v28  ;;  %v714_v34 = vsel %vm389_vm1, %v663_v1, 0.0 }
 0x205   : > { %v707_v29 = vadd.f32 %v706_v0, %v705_v2  ;;  %5052 = vst [vmem:[#allocation20_spill] sm:$0xff] %v3963_v50  ;;  %v3970_v0 = vsub.f32 %v3736_v10, %v3813_v32  ;;  %v665_v35 = vmul.f32 %v3963_v50, %v3963_v50  ;;  %v716_v58 = vsel %vm389_vm1, %v664_v13, 0.0 }
 0x207   : > { %v709_v55 = vadd.f32 %v708_v16, %v707_v29  ;;  %5053 = vst [vmem:[#allocation21_spill] sm:$0xff] %v3970_v0  ;;  %v3977_v16 = vsub.f32 %v3741_v14, %v3813_v32  ;;  %v666_v43 = vmul.f32 %v3970_v0, %v3970_v0  ;;  %v718_v1 = vsel %vm389_vm1, %v665_v35, 0.0 }
 0x209   : > { %v711_v2 = vadd.f32 %v710_v53, %v709_v55  ;;  %5054 = vst [vmem:[#allocation22_spill] sm:$0xff] %v3977_v16  ;;  %v3984_v53 = vsub.f32 %v3746_v19, %v3813_v32  ;;  %v667_v38 = vmul.f32 %v3977_v16, %v3977_v16  ;;  %v720_v13 = vsel %vm389_vm1, %v666_v43, 0.0 }
 0x20b   : > { %v713_v29 = vadd.f32 %v712_v31, %v711_v2  ;;  %5055 = vst [vmem:[#allocation23_spill] sm:$0xff] %v3984_v53  ;;  %v3991_v31 = vsub.f32 %v3751_v27, %v3813_v32  ;;  %v668_v61 = vmul.f32 %v3984_v53, %v3984_v53  ;;  %v722_v35 = vsel %vm389_vm1, %v667_v38, 0.0 }
 0x20d   : > { %v715_v55 = vadd.f32 %v714_v34, %v713_v29  ;;  %v3998_v34 = vsub.f32 %v3756_v30, %v3813_v32  ;;  %v669_v44 = vmul.f32 %v3991_v31, %v3991_v31  ;;  %v724_v43 = vsel %vm389_vm1, %v668_v61, 0.0 }
 0x20f   : > { %v717_v2 = vadd.f32 %v716_v58, %v715_v55  ;;  %v4005_v58 = vsub.f32 %v3761_v33, %v3813_v32  ;;  %v670_v11 = vmul.f32 %v3998_v34, %v3998_v34  ;;  %v726_v38 = vsel %vm389_vm1, %v669_v44, 0.0 }
 0x211   : > { %v719_v29 = vadd.f32 %v718_v1, %v717_v2  ;;  %v4012_v1 = vsub.f32 %v3766_v37, %v3813_v32  ;;  %v671_v49 = vmul.f32 %v4005_v58, %v4005_v58  ;;  %v728_v61 = vsel %vm389_vm1, %v670_v11, 0.0 }
 0x213   : > { %v721_v55 = vadd.f32 %v720_v13, %v719_v29  ;;  %v4019_v13 = vsub.f32 %v3771_v41, %v3813_v32  ;;  %v672_v28 = vmul.f32 %v4012_v1, %v4012_v1  ;;  %v730_v56 = vsel %vm389_vm1, %v671_v49, 0.0 }
 0x215   : > { %v723_v2 = vadd.f32 %v722_v35, %v721_v55  ;;  %v4026_v35 = vsub.f32 %v3776_v46, %v3813_v32 }
 0x217   : > { %v725_v29 = vadd.f32 %v724_v43, %v723_v2  ;;  %v673_v43 = vmul.f32 %v4019_v13, %v4019_v13  ;;  %v674_v44 = vmul.f32 %v4026_v35, %v4026_v35 }
 0x219   : > { %v727_v55 = vadd.f32 %v726_v38, %v725_v29  ;;  %v732_v29 = vsel %vm389_vm1, %v672_v28, 0.0  ;;  %v734_v46 = vsel %vm389_vm1, %v673_v43, 0.0  ;;  %v736_v62 = vsel %vm389_vm1, %v674_v44, 0.0 }
 0x21b   : > { %v729_v2 = vadd.f32 %v728_v61, %v727_v55 }
 0x21d   : > { %v731_v50 = vadd.f32 %v730_v56, %v729_v2 }
 0x21f   : > { %v733_v38 = vadd.f32 %v732_v29, %v731_v50 }
 0x221   : > { %v735_v32 = vadd.f32 %v734_v46, %v733_v38 }
 0x223   : > { %v737_v0 = vadd.f32 %v736_v62, %v735_v32 }
 0x225   : > { %v738_v11 = vrot.slane %v737_v0, 4 }
 0x227   : > { %v739_v55 = vadd.f32 %v738_v11, %v737_v0 }
 0x229   : > { %v740_v61 = vrot.slane %v739_v55, 2 }
 0x22b   : > { %v741_v9 = vadd.f32 %v740_v61, %v739_v55 }
 0x22d   : > { %v742_v16 = vrot.slane %v741_v9, 1 }
 0x22f   : > { %v743_v17 = vadd.f32 %v742_v16, %v741_v9 }
 0x231   : > { %3314 = vmatmul.mubr.msk.f32.vlgmr.msra.gmra.mxu0 %vm389_vm1, %v743_v17 }
 0x2f1   : > { %v813_v49 = vpop.f32.mrf.mxu0 }
 0x2f2   : > { %v817_v56 = vmul.f32 0.00390625, %v813_v49 }
 0x2f3   : > { %v3315_v2 = vpop.f32.mrf.mxu0 }
 0x2f4   : > { %v818_v53 = vadd.f32 1e-05, %v817_v56 }
 0x2f6   : > { %3387 = vrsqrt.f32 %v818_v53 }
 0x303   : > { %v3388_v28 = vpop.eup %3387 }
 0x304   : > { %3325 = vmatmul.mubr.msk.f32.vlgmr.msra.gmra.mxu1 %vm389_vm1, %v3388_v28 }
 0x305   : > { %3182 = vmatpush3.msra.mxu1 %v3696_v45  ;;  %v4162_v45 = vld [vmem:[%s5007_s5 + $0x70] sm:$0xff] }
 0x306   : > { %3183 = vmatprep.subr.mxu1 %v3771_v41  ;;  %5058 = vst [vmem:[#allocation26_spill] sm:$0xff] %v4162_v45 }
 0x307   : > { %3184 = vmatpush3.msra.mxu1 %v3691_v42  ;;  %v4155_v42 = vld [vmem:[%s5007_s5 + $0x78] sm:$0xff] }
 0x308   : > { %3185 = vmatprep.subr.mxu1 %v3766_v37  ;;  %5057 = vst [vmem:[#allocation25_spill] sm:$0xff] %v4155_v42 }
 0x309   : > { %3186 = vmatpush3.msra.mxu1 %v3686_v39  ;;  %v4150_v39 = vld [vmem:[%s5007_s5 + $0x60] sm:$0xff] }
 0x30a   : > { %3187 = vmatprep.subr.mxu1 %v3761_v33  ;;  %5056 = vst [vmem:[#allocation24_spill] sm:$0xff] %v4150_v39 }
 0x30b   : > { %3188 = vmatpush3.msra.mxu1 %v3683_v36  ;;  %v4143_v36 = vld [vmem:[%s5007_s5 + $0x68] sm:$0xff] }
 0x30c   : > { %3189 = vmatprep.subr.mxu1 %v3756_v30 }
 0x30d   : > { %3190 = vmatpush3.msra.mxu1 %v3668_v25  ;;  %v4138_v25 = vld [vmem:[%s5007_s5 + $0x50] sm:$0xff] }
 0x30e   : > { %3191 = vmatprep.subr.mxu1 %v3751_v27 }
 0x30f   : > { %3192 = vmatpush3.msra.mxu1 %v3665_v24  ;;  %v4131_v24 = vld [vmem:[%s5007_s5 + $0x58] sm:$0xff] }
 0x310   : > { %3193 = vmatprep.subr.mxu1 %v3746_v19  ;;  %v4185_v19 = vld [vmem:[%s5004_s2] ss:$0 sm:$0xff] }
 0x311   : > { %3194 = vmatpush3.msra.mxu1 %v3660_v22  ;;  %v4126_v22 = vld [vmem:[%s5007_s5 + $0x40] sm:$0xff] }
 0x312   : > { %3195 = vmatprep.subr.mxu1 %v3741_v14 }
 0x313   : > { %3196 = vmatpush3.msra.mxu1 %v3657_v21  ;;  %v4119_v21 = vld [vmem:[%s5007_s5 + $0x48] sm:$0xff] }
 0x314   : > { %3197 = vmatprep.subr.mxu1 %v3736_v10 }
 0x315   : > { %3198 = vmatpush3.msra.mxu1 %v3654_v20  ;;  %v4114_v20 = vld [vmem:[%s5007_s5 + $0x30] sm:$0xff] }
 0x316   : > { %3199 = vmatprep.subr.mxu1 %v3731_v3 }
 0x317   : > { %3200 = vmatpush3.msra.mxu1 %v3651_v18  ;;  %v4107_v18 = vld [vmem:[%s5007_s5 + $0x38] sm:$0xff] }
 0x318   : > { %3201 = vmatprep.subr.mxu1 %v3726_v63 }
 0x319   : > { %3202 = vmatpush3.msra.mxu1 %v3644_v15  ;;  %v4102_v15 = vld [vmem:[%s5007_s5 + $0x20] sm:$0xff] }
 0x31a   : > { %3203 = vmatprep.subr.mxu1 %v3721_v60  ;;  %v4172_v60 = vld [vmem:[%s5003_s1] ss:$0 sm:$0xff] }
 0x31b   : > { %3204 = vmatpush3.msra.mxu1 %v3637_v12  ;;  %v1252_v12 = vld [vmem:[%s5007_s5 + $0x8] sm:$0xff] }
 0x31c   : > { %3205 = vmatprep.subr.mxu1 %v3716_v57  ;;  %1331 = vmatprep.mubr.f32.mxu0 %v1252_v12 }
 0x31d   : > { %3206 = vmatpush3.msra.mxu1 %v3628_v8  ;;  %v4078_v8 = vld [vmem:[%s5007_s5] sm:$0xff]  ;;  %1436 = vmatprep.mubr.f32.mxu1 %v1252_v12 }
 0x31e   : > { %3207 = vmatprep.subr.mxu1 %v3711_v54 }
 0x31f   : > { %3208 = vmatpush3.msra.mxu1 %v3623_v7  ;;  %v4083_v7 = vld [vmem:[%s5007_s5 + $0x18] sm:$0xff] }
 0x320   : > { %3209 = vmatprep.subr.mxu1 %v3706_v51  ;;  %v5059_v51 = vsub.s32 0, %v3808_v26 }
 0x321   : > { %3210 = vmatpush3.msra.mxu1 %v3620_v6  ;;  %v4095_v6 = vld [vmem:[%s5007_s5 + $0x28] sm:$0xff] }
 0x322   : > { %3211 = vmatprep.subr.mxu1 %v3701_v48 }
 0x323   : > { %3212 = vmatpush3.msra.mxu1 %v3617_v5  ;;  %v4090_v5 = vld [vmem:[%s5007_s5 + $0x10] sm:$0xff] }
 0x324   : > { %1437 = vmatmul.mubr.f32.vlgmr.msra.gmra.mxu1 %v4078_v8 }
 0x325   : > { %1441 = vmatprep.mubr.f32.mxu1 %v4083_v7 }
 0x328   : > { %1442 = vmatmul.mubr.f32.gmra.mxu1 %v4090_v5 }
 0x329   : > { %1446 = vmatprep.mubr.f32.mxu1 %v4095_v6 }
 0x32c   : > { %1447 = vmatmul.mubr.f32.gmra.mxu1 %v4102_v15 }
 0x32d   : > { %1451 = vmatprep.mubr.f32.mxu1 %v4107_v18 }
 0x330   : > { %1452 = vmatmul.mubr.f32.gmra.mxu1 %v4114_v20 }
 0x331   : > { %1456 = vmatprep.mubr.f32.mxu1 %v4119_v21 }
 0x334   : > { %1457 = vmatmul.mubr.f32.gmra.mxu1 %v4126_v22 }
 0x335   : > { %1461 = vmatprep.mubr.f32.mxu1 %v4131_v24 }
 0x338   : > { %1462 = vmatmul.mubr.f32.gmra.mxu1 %v4138_v25 }
 0x339   : > { %1466 = vmatprep.mubr.f32.mxu1 %v4143_v36 }
 0x33c   : > { %1467 = vmatmul.mubr.f32.gmra.mxu1 %v4150_v39 }
 0x33d   : > { %1471 = vmatprep.mubr.f32.mxu1 %v4155_v42 }
 0x340   : > { %1472 = vmatmul.mubr.f32.gmra.mxu1 %v4162_v45 }
 0x3c4   : > { %v889_v48 = vpop.f32.mrf.mxu1 }
 0x3c5   : > { %v4167_v54 = vrot.slane %v889_v48, %v5059_v51  ;;  %v5061_v48 = vld [vmem:[#allocation13_spill] sm:$0xff] }
 0x3c6   : > { %v3326_v57 = vpop.f32.mrf.mxu1 }
 0x3c7   : > { %v928_v63 = vmul.f32 %v4167_v54, %v4026_v35  ;;  %v912_v3 = vmul.f32 %v4167_v54, %v3914_v47  ;;  %v927_v10 = vmul.f32 %v4167_v54, %v4019_v13  ;;  %v911_v14 = vmul.f32 %v4167_v54, %v3907_v23 }
 0x3c8   : > { %v926_v27 = vmul.f32 %v4167_v54, %v4012_v1  ;;  %v910_v30 = vmul.f32 %v4167_v54, %v3900_v4  ;;  %v925_v33 = vmul.f32 %v4167_v54, %v4005_v58  ;;  %v909_v37 = vmul.f32 %v4167_v54, %v3893_v59 }
 0x3c9   : > { %v966_v41 = vmul.f32 %v4172_v60, %v928_v63  ;;  %v950_v26 = vmul.f32 %v4172_v60, %v912_v3  ;;  %v965_v62 = vmul.f32 %v4172_v60, %v927_v10  ;;  %v949_v9 = vmul.f32 %v4172_v60, %v911_v14 }
 0x3ca   : > { %v964_v17 = vmul.f32 %v4172_v60, %v926_v27  ;;  %v948_v23 = vmul.f32 %v4172_v60, %v910_v30  ;;  %v963_v4 = vmul.f32 %v4172_v60, %v925_v33  ;;  %v947_v47 = vmul.f32 %v4172_v60, %v909_v37 }
 0x3cb   : > { %v4204_v50 = vadd.f32 %v4185_v19, %v966_v41  ;;  %v4207_v59 = vadd.f32 %v4185_v19, %v950_v26  ;;  %v4210_v0 = vadd.f32 %v4185_v19, %v965_v62  ;;  %v4213_v16 = vadd.f32 %v4185_v19, %v949_v9  ;;  %v5062_v41 = vld [vmem:[#allocation22_spill] sm:$0xff] }
 0x3cc   : > { %v4216_v53 = vadd.f32 %v4185_v19, %v964_v17  ;;  %v4219_v58 = vadd.f32 %v4185_v19, %v948_v23  ;;  %v4222_v1 = vadd.f32 %v4185_v19, %v963_v4  ;;  %v4225_v13 = vadd.f32 %v4185_v19, %v947_v47  ;;  %v5063_v17 = vld [vmem:[#allocation12_spill] sm:$0xff] }
 0x3cd   : > { %v3024_v35 = vmul.f32 -1.442695, %v4204_v50  ;;  %v3008_v43 = vmul.f32 -1.442695, %v4207_v59  ;;  %v3023_v44 = vmul.f32 -1.442695, %v4210_v0  ;;  %v924_v29 = vmul.f32 %v4167_v54, %v3998_v34 }
 0x3ce   : > { %v3007_v38 = vmul.f32 -1.442695, %v4213_v16  ;;  %v3022_v46 = vmul.f32 -1.442695, %v4216_v53  ;;  %v3006_v32 = vmul.f32 -1.442695, %v4219_v58  ;;  %v908_v11 = vmul.f32 %v4167_v54, %v3886_v52 }
 0x3cf   : > { %3389 = vpow2.f32 %v3024_v35  ;;  %v3021_v55 = vmul.f32 -1.442695, %v4222_v1  ;;  %v3005_v61 = vmul.f32 -1.442695, %v4225_v13  ;;  %v962_v49 = vmul.f32 %v4172_v60, %v924_v29  ;;  %v5060_v52 = vld [vmem:[#allocation23_spill] sm:$0xff] }
 0x3d0   : > { %3391 = vpow2.f32 %v3008_v43  ;;  %v946_v56 = vmul.f32 %v4172_v60, %v908_v11  ;;  %v923_v34 = vmul.f32 %v4167_v54, %v3991_v31  ;;  %v907_v2 = vmul.f32 %v4167_v54, %v3879_v40  ;;  %v5066_v11 = vld [vmem:[#allocation20_spill] sm:$0xff] }
 0x3d1   : > { %3393 = vpow2.f32 %v3023_v44  ;;  %v4246_v28 = vadd.f32 %v4185_v19, %v962_v49  ;;  %v922_v12 = vmul.f32 %v4167_v54, %v5060_v52  ;;  %v906_v51 = vmul.f32 %v4167_v54, %v5061_v48  ;;  %v5064_v44 = vld [vmem:[#allocation21_spill] sm:$0xff] }
 0x3d2   : > { %3395 = vpow2.f32 %v3007_v38  ;;  %v4253_v57 = vadd.f32 %v4185_v19, %v946_v56  ;;  %v961_v63 = vmul.f32 %v4172_v60, %v923_v34  ;;  %v945_v31 = vmul.f32 %v4172_v60, %v907_v2  ;;  %v5065_v38 = vld [vmem:[#allocation11_spill] sm:$0xff] }
 0x3d3   : > { %3397 = vpow2.f32 %v3022_v46  ;;  %v3020_v40 = vmul.f32 -1.442695, %v4246_v28  ;;  %v960_v3 = vmul.f32 %v4172_v60, %v922_v12  ;;  %v944_v10 = vmul.f32 %v4172_v60, %v906_v51 }
 0x3d4   : > { %3399 = vpow2.f32 %v3006_v32  ;;  %v3004_v14 = vmul.f32 -1.442695, %v4253_v57  ;;  %v4262_v27 = vadd.f32 %v4185_v19, %v961_v63  ;;  %v4265_v30 = vadd.f32 %v4185_v19, %v945_v31 }
 0x3d5   : > { %3401 = vpow2.f32 %v3021_v55  ;;  %v4268_v33 = vadd.f32 %v4185_v19, %v960_v3  ;;  %v4271_v37 = vadd.f32 %v4185_v19, %v944_v10  ;;  %v921_v26 = vmul.f32 %v4167_v54, %v5062_v41 }
 0x3d6   : > { %3403 = vpow2.f32 %v3005_v61  ;;  %v3019_v62 = vmul.f32 -1.442695, %v4262_v27  ;;  %v3003_v9 = vmul.f32 -1.442695, %v4265_v30  ;;  %v905_v23 = vmul.f32 %v4167_v54, %v5063_v17  ;;  %v5067_v61 = vld [vmem:[#allocation10_spill] sm:$0xff] }
 0x3d7   : > { %3405 = vpow2.f32 %v3020_v40  ;;  %v3018_v4 = vmul.f32 -1.442695, %v4268_v33  ;;  %v3002_v47 = vmul.f32 -1.442695, %v4271_v37  ;;  %v959_v35 = vmul.f32 %v4172_v60, %v921_v26 }
 0x3d8   : > { %3407 = vpow2.f32 %v3004_v14  ;;  %v943_v43 = vmul.f32 %v4172_v60, %v905_v23  ;;  %v920_v29 = vmul.f32 %v4167_v54, %v5064_v44  ;;  %v904_v46 = vmul.f32 %v4167_v54, %v5065_v38 }
 0x3d9   : > { %3409 = vpow2.f32 %v3019_v62  ;;  %v4288_v32 = vadd.f32 %v4185_v19, %v959_v35  ;;  %v919_v55 = vmul.f32 %v4167_v54, %v5066_v11  ;;  %v903_v49 = vmul.f32 %v4167_v54, %v5067_v61 }
 0x3da   : > { %3411 = vpow2.f32 %v3003_v9  ;;  %v4295_v56 = vadd.f32 %v4185_v19, %v943_v43  ;;  %v958_v34 = vmul.f32 %v4172_v60, %v920_v29  ;;  %v942_v2 = vmul.f32 %v4172_v60, %v904_v46  ;;  %v5068_v43 = vld [vmem:[#allocation19_spill] sm:$0xff]  ;;  %v5069_v29 = vld [vmem:[#allocation9_spill] sm:$0xff] }
 0x3db   : > { %3413 = vpow2.f32 %v3018_v4  ;;  %v3017_v52 = vmul.f32 -1.442695, %v4288_v32  ;;  %v957_v12 = vmul.f32 %v4172_v60, %v919_v55  ;;  %v941_v48 = vmul.f32 %v4172_v60, %v903_v49  ;;  %v5070_v55 = vld [vmem:[#allocation18_spill] sm:$0xff]  ;;  %v5071_v49 = vld [vmem:[#allocation8_spill] sm:$0xff] }
 0x3dc   : > { %v3390_v51 = vpop.eup %3389  ;;  %3415 = vpow2.f32 %v3002_v47  ;;  %v3001_v63 = vmul.f32 -1.442695, %v4295_v56  ;;  %v4304_v31 = vadd.f32 %v4185_v19, %v958_v34  ;;  %v4307_v40 = vadd.f32 %v4185_v19, %v942_v2 }
 0x3dd   : > { %v3392_v3 = vpop.eup %3391  ;;  %v1132_v10 = vadd.f32 1.0, %v3390_v51  ;;  %3417 = vpow2.f32 %v3017_v52  ;;  %v4310_v26 = vadd.f32 %v4185_v19, %v957_v12  ;;  %v4313_v62 = vadd.f32 %v4185_v19, %v941_v48 }
 0x3de   : > { %v3394_v14 = vpop.eup %3393  ;;  %v1116_v41 = vadd.f32 1.0, %v3392_v3  ;;  %3419 = vpow2.f32 %v3001_v63  ;;  %v4316_v23 = vmul.f32 -1.442695, %v4304_v31  ;;  %v4319_v4 = vmul.f32 -1.442695, %v4307_v40 }
 0x3df   : > { %v3396_v9 = vpop.eup %3395  ;;  %3421 = vrcp.f32 %v1132_v10  ;;  %v1131_v17 = vadd.f32 1.0, %v3394_v14  ;;  %v918_v44 = vmul.f32 %v4167_v54, %v5068_v43  ;;  %v902_v38 = vmul.f32 %v4167_v54, %v5069_v29 }
 0x3e0   : > { %v3398_v47 = vpop.eup %3397  ;;  %3423 = vrcp.f32 %v1116_v41  ;;  %v1115_v35 = vadd.f32 1.0, %v3396_v9  ;;  %v917_v61 = vmul.f32 %v4167_v54, %v5070_v55  ;;  %v901_v34 = vmul.f32 %v4167_v54, %v5071_v49 }
 0x3e1   : > { %v3400_v46 = vpop.eup %3399  ;;  %3425 = vrcp.f32 %v1131_v17  ;;  %v1130_v11 = vadd.f32 1.0, %v3398_v47  ;;  %v956_v12 = vmul.f32 %v4172_v60, %v918_v44  ;;  %v940_v48 = vmul.f32 %v4172_v60, %v902_v38 }
 0x3e2   : > { %v3402_v2 = vpop.eup %3401  ;;  %3427 = vrcp.f32 %v1115_v35  ;;  %v1114_v52 = vadd.f32 1.0, %v3400_v46  ;;  %v955_v3 = vmul.f32 %v4172_v60, %v917_v61  ;;  %v939_v10 = vmul.f32 %v4172_v60, %v901_v34 }
 0x3e3   : > { %v3404_v51 = vpop.eup %3403  ;;  %3429 = vrcp.f32 %v1130_v11  ;;  %v1129_v63 = vadd.f32 1.0, %v3402_v2  ;;  %v4334_v9 = vadd.f32 %v4185_v19, %v956_v12  ;;  %v4337_v17 = vadd.f32 %v4185_v19, %v940_v48  ;;  %v5072_v12 = vld [vmem:[#allocation17_spill] sm:$0xff] }
 0x3e4   : > { %v3406_v14 = vpop.eup %3405  ;;  %3431 = vrcp.f32 %v1114_v52  ;;  %v1113_v41 = vadd.f32 1.0, %v3404_v51  ;;  %v3015_v43 = vmul.f32 -1.442695, %v4310_v26  ;;  %v4341_v44 = vmul.f32 -1.442695, %v4313_v62  ;;  %v5073_v51 = vld [vmem:[#allocation7_spill] sm:$0xff] }
 0x3e5   : > { %v3408_v47 = vpop.eup %3407  ;;  %3433 = vrcp.f32 %v1129_v63  ;;  %v1128_v35 = vadd.f32 1.0, %v3406_v14  ;;  %v4344_v46 = vadd.f32 %v4185_v19, %v955_v3  ;;  %v4347_v11 = vadd.f32 %v4185_v19, %v939_v10  ;;  %v5074_v14 = vld [vmem:[#allocation16_spill] sm:$0xff] }
 0x3e6   : > { %v3410_v29 = vpop.eup %3409  ;;  %3435 = vrcp.f32 %v1113_v41  ;;  %v1112_v38 = vadd.f32 1.0, %v3408_v47  ;;  %v4350_v49 = vmul.f32 -1.442695, %v4334_v9  ;;  %v4353_v34 = vmul.f32 -1.442695, %v4337_v17  ;;  %v5075_v47 = vld [vmem:[#allocation6_spill] sm:$0xff] }
 0x3e7   : > { %v3412_v55 = vpop.eup %3411  ;;  %3437 = vrcp.f32 %v1128_v35  ;;  %v1127_v61 = vadd.f32 1.0, %v3410_v29  ;;  %v916_v48 = vmul.f32 %v4167_v54, %v5072_v12  ;;  %v900_v63 = vmul.f32 %v4167_v54, %v5073_v51 }
 0x3e8   : > { %v3414_v2 = vpop.eup %3413  ;;  %3439 = vrcp.f32 %v1112_v38  ;;  %v1111_v52 = vadd.f32 1.0, %v3412_v55  ;;  %v915_v41 = vmul.f32 %v4167_v54, %v5074_v14  ;;  %v899_v35 = vmul.f32 %v4167_v54, %v5075_v47 }
 0x3e9   : > { %v3416_v3 = vpop.eup %3415  ;;  %3441 = vrcp.f32 %v1127_v61  ;;  %v1126_v10 = vadd.f32 1.0, %v3414_v2  ;;  %v954_v38 = vmul.f32 %v4172_v60, %v916_v48  ;;  %v938_v55 = vmul.f32 %v4172_v60, %v900_v63 }
 0x3ea   : > { %v3418_v29 = vpop.eup %3417  ;;  %3443 = vrcp.f32 %v1111_v52  ;;  %v1110_v45 = vadd.f32 1.0, %v3416_v3  ;;  %v953_v51 = vmul.f32 %v4172_v60, %v915_v41  ;;  %v937_v61 = vmul.f32 %v4172_v60, %v899_v35 }
 0x3eb   : > { %v3420_v12 = vpop.eup %3419  ;;  %3445 = vrcp.f32 %v1126_v10  ;;  %v1125_v42 = vadd.f32 1.0, %v3418_v29  ;;  %v4368_v39 = vadd.f32 %v4185_v19, %v954_v38  ;;  %v4371_v52 = vadd.f32 %v4185_v19, %v938_v55 }
 0x3ec   : > { %v3422_v2 = vpop.eup %3421  ;;  %3447 = vrcp.f32 %v1110_v45  ;;  %v1109_v14 = vadd.f32 1.0, %v3420_v12  ;;  %v3013_v63 = vmul.f32 -1.442695, %v4344_v46  ;;  %v2997_v10 = vmul.f32 -1.442695, %v4347_v11  ;;  %v5076_v12 = vld [vmem:[#allocation15_spill] sm:$0xff] }
 0x3ed   : > { %v3424_v3 = vpop.eup %3423  ;;  %v1228_v48 = vmul.f32 %v3422_v2, %v4204_v50  ;;  %3449 = vrcp.f32 %v1125_v42  ;;  %v4378_v45 = vadd.f32 %v4185_v19, %v953_v51  ;;  %v4381_v35 = vadd.f32 %v4185_v19, %v937_v61  ;;  %v5077_v61 = vld [vmem:[#allocation5_spill] sm:$0xff] }
 0x3ee   : > { %v3426_v41 = vpop.eup %3425  ;;  %v1212_v47 = vmul.f32 %v3424_v3, %v4207_v59  ;;  %3451 = vrcp.f32 %v1109_v14  ;;  %v3012_v42 = vmul.f32 -1.442695, %v4368_v39  ;;  %v2996_v50 = vmul.f32 -1.442695, %v4371_v52 }
 0x3ef   : > { %v3428_v29 = vpop.eup %3427  ;;  %3125 = vmatprep.subr.mxu0 %v1228_v48  ;;  %v1227_v38 = vmul.f32 %v3426_v41, %v4210_v0  ;;  %3453 = vpow2.f32 %v4316_v23  ;;  %v914_v51 = vmul.f32 %v4167_v54, %v5076_v12  ;;  %v898_v2 = vmul.f32 %v4167_v54, %v5077_v61  ;;  %v5078_v23 = vld [vmem:[#allocation14_spill] sm:$0xff]  ;;  %v5079_v48 = vld [vmem:[#allocation4_spill] sm:$0xff] }
 0x3f0   : > { %v3430_v55 = vpop.eup %3429  ;;  %3126 = vmatpush3.msra.mxu0 %v1212_v47  ;;  %v1211_v59 = vmul.f32 %v3428_v29, %v4213_v16  ;;  %3455 = vpow2.f32 %v4319_v4  ;;  %v913_v3 = vmul.f32 %v4167_v54, %v5078_v23  ;;  %v897_v41 = vmul.f32 %v4167_v54, %v5079_v48 }
 0x3f1   : > { %v3432_v14 = vpop.eup %3431  ;;  %3127 = vmatprep.subr.mxu0 %v1227_v38  ;;  %v1226_v0 = vmul.f32 %v3430_v55, %v4216_v53  ;;  %3457 = vpow2.f32 %v3015_v43  ;;  %v952_v47 = vmul.f32 %v4172_v60, %v914_v51  ;;  %v936_v29 = vmul.f32 %v4172_v60, %v898_v2 }
 0x3f2   : > { %v3434_v16 = vpop.eup %3433  ;;  %3128 = vmatpush3.msra.mxu0 %v1211_v59  ;;  %v1210_v4 = vmul.f32 %v3432_v14, %v4219_v58  ;;  %3459 = vpow2.f32 %v4341_v44  ;;  %v951_v43 = vmul.f32 %v4172_v60, %v913_v3  ;;  %v935_v54 = vmul.f32 %v4172_v60, %v897_v41 }
 0x3f3   : > { %v3436_v38 = vpop.eup %3435  ;;  %3129 = vmatprep.subr.mxu0 %v1226_v0  ;;  %v1225_v53 = vmul.f32 %v3434_v16, %v4222_v1  ;;  %3461 = vpow2.f32 %v4350_v49  ;;  %v4409_v44 = vadd.f32 %v4185_v19, %v952_v47  ;;  %v4412_v59 = vadd.f32 %v4185_v19, %v936_v29 }
 0x3f4   : > { %v3438_v55 = vpop.eup %3437  ;;  %3130 = vmatpush3.msra.mxu0 %v1210_v4  ;;  %v1209_v58 = vmul.f32 %v3436_v38, %v4225_v13  ;;  %3463 = vpow2.f32 %v4353_v34  ;;  %v3011_v49 = vmul.f32 -1.442695, %v4378_v45  ;;  %v4417_v60 = vadd.f32 %v4185_v19, %v951_v43 }
 0x3f5   : > { %v3440_v12 = vpop.eup %3439  ;;  %3131 = vmatprep.subr.mxu0 %v1225_v53  ;;  %v1224_v1 = vmul.f32 %v3438_v55, %v4246_v28  ;;  %3465 = vpow2.f32 %v3013_v63  ;;  %v2995_v34 = vmul.f32 -1.442695, %v4381_v35  ;;  %v4422_v61 = vadd.f32 %v4185_v19, %v935_v54 }
 0x3f6   : > { %v3442_v51 = vpop.eup %3441  ;;  %3132 = vmatpush3.msra.mxu0 %v1209_v58  ;;  %v1208_v13 = vmul.f32 %v3440_v12, %v4253_v57  ;;  %3467 = vpow2.f32 %v2997_v10  ;;  %v3010_v63 = vmul.f32 -1.442695, %v4409_v44  ;;  %v2994_v57 = vmul.f32 -1.442695, %v4412_v59 }
 0x3f7   : > { %v3444_v2 = vpop.eup %3443  ;;  %3133 = vmatprep.subr.mxu0 %v1224_v1  ;;  %v1223_v28 = vmul.f32 %v3442_v51, %v4262_v27  ;;  %3469 = vpow2.f32 %v3012_v42  ;;  %v3009_v19 = vmul.f32 -1.442695, %v4417_v60  ;;  %v2993_v42 = vmul.f32 -1.442695, %v4422_v61 }
 0x3f8   : > { %v3446_v14 = vpop.eup %3445  ;;  %3134 = vmatpush3.msra.mxu0 %v1208_v13  ;;  %v1207_v0 = vmul.f32 %v3444_v2, %v4265_v30  ;;  %3471 = vpow2.f32 %v2996_v50 }
 0x3f9   : > { %v3448_v10 = vpop.eup %3447  ;;  %3135 = vmatprep.subr.mxu0 %v1223_v28  ;;  %v1222_v23 = vmul.f32 %v3446_v14, %v4268_v33  ;;  %3473 = vpow2.f32 %v3011_v49 }
 0x3fa   : > { %v3450_v3 = vpop.eup %3449  ;;  %3136 = vmatpush3.msra.mxu0 %v1207_v0  ;;  %v1206_v27 = vmul.f32 %v3448_v10, %v4271_v37  ;;  %3475 = vpow2.f32 %v2995_v34 }
 0x3fb   : > { %v3452_v48 = vpop.eup %3451  ;;  %3137 = vmatprep.subr.mxu0 %v1222_v23  ;;  %v1221_v30 = vmul.f32 %v3450_v3, %v4288_v32  ;;  %3477 = vpow2.f32 %v3010_v63 }
 0x3fc   : > { %v3454_v50 = vpop.eup %3453  ;;  %3138 = vmatpush3.msra.mxu0 %v1206_v27  ;;  %v1205_v41 = vmul.f32 %v3452_v48, %v4295_v56  ;;  %3479 = vpow2.f32 %v2994_v57 }
 0x3fd   : > { %v3456_v33 = vpop.eup %3455  ;;  %3139 = vmatprep.subr.mxu0 %v1221_v30  ;;  %v1124_v16 = vadd.f32 1.0, %v3454_v50  ;;  %3481 = vpow2.f32 %v3009_v19 }
 0x3fe   : > { %v3458_v4 = vpop.eup %3457  ;;  %3140 = vmatpush3.msra.mxu0 %v1205_v41  ;;  %v1108_v37 = vadd.f32 1.0, %v3456_v33  ;;  %3483 = vpow2.f32 %v2993_v42 }
 0x3ff   : > { %v3460_v47 = vpop.eup %3459  ;;  %3485 = vrcp.f32 %v1124_v16  ;;  %v1123_v29 = vadd.f32 1.0, %v3458_v4 }
 0x400   : > { %v3462_v38 = vpop.eup %3461  ;;  %3487 = vrcp.f32 %v1108_v37  ;;  %v1107_v32 = vadd.f32 1.0, %v3460_v47 }
 0x401   : > { %v3464_v53 = vpop.eup %3463  ;;  %3489 = vrcp.f32 %v1123_v29  ;;  %v1122_v43 = vadd.f32 1.0, %v3462_v38 }
 0x402   : > { %v3466_v54 = vpop.eup %3465  ;;  %3491 = vrcp.f32 %v1107_v32  ;;  %v1106_v56 = vadd.f32 1.0, %v3464_v53 }
 0x403   : > { %v3468_v55 = vpop.eup %3467  ;;  %3493 = vrcp.f32 %v1122_v43  ;;  %v1121_v58 = vadd.f32 1.0, %v3466_v54 }
 0x404   : > { %v3470_v12 = vpop.eup %3469  ;;  %3495 = vrcp.f32 %v1106_v56  ;;  %v1105_v1 = vadd.f32 1.0, %v3468_v55 }
 0x405   : > { %v3472_v49 = vpop.eup %3471  ;;  %3497 = vrcp.f32 %v1121_v58  ;;  %v1120_v51 = vadd.f32 1.0, %v3470_v12 }
 0x406   : > { %v3474_v13 = vpop.eup %3473  ;;  %3499 = vrcp.f32 %v1105_v1  ;;  %v1104_v34 = vadd.f32 1.0, %v3472_v49 }
 0x407   : > { %v3476_v2 = vpop.eup %3475  ;;  %3501 = vrcp.f32 %v1120_v51  ;;  %v1119_v28 = vadd.f32 1.0, %v3474_v13 }
 0x408   : > { %v3478_v63 = vpop.eup %3477  ;;  %3503 = vrcp.f32 %v1104_v34  ;;  %v1103_v14 = vadd.f32 1.0, %v3476_v2 }
 0x409   : > { %v3480_v0 = vpop.eup %3479  ;;  %3505 = vrcp.f32 %v1119_v28  ;;  %v1118_v57 = vadd.f32 1.0, %v3478_v63  ;;  %v3354_v28 = vld [vmem:[%s5008_s6 + $0x88] sm:$0xff]  }
 0x40a   : > { %v3482_v10 = vpop.eup %3481  ;;  %3507 = vrcp.f32 %v1103_v14  ;;  %v1102_v23 = vadd.f32 1.0, %v3480_v0  ;;  %3327 = vmatprep.subr.bf16.mxu1 %v3354_v28  ;;  %v3355_v14 = vld [vmem:[%s5008_s6 + $0x80] sm:$0xff]  }
 0x40b   : > { %v3484_v19 = vpop.eup %3483  ;;  %3509 = vrcp.f32 %v1118_v57  ;;  %v1117_v3 = vadd.f32 1.0, %v3482_v10  ;;  %3328 = vmatpush3.bf16.msra.mxu1 %v3354_v28 }
 0x40c   : > { %v3486_v27 = vpop.eup %3485  ;;  %3511 = vrcp.f32 %v1102_v23  ;;  %v1101_v42 = vadd.f32 1.0, %v3484_v19  ;;  %3329 = vmatprep.subr.bf16.mxu1 %v3355_v14 }
 0x40d   : > { %v3488_v48 = vpop.eup %3487  ;;  %v1220_v30 = vmul.f32 %v3486_v27, %v4304_v31  ;;  %3513 = vrcp.f32 %v1117_v3 }
 0x40e   : > { %v3490_v50 = vpop.eup %3489  ;;  %v1204_v41 = vmul.f32 %v3488_v48, %v4307_v40  ;;  %3515 = vrcp.f32 %v1101_v42 }
 0x40f   : > { %v3492_v33 = vpop.eup %3491  ;;  %3141 = vmatprep.subr.mxu0 %v1220_v30  ;;  %v1219_v16 = vmul.f32 %v3490_v50, %v4310_v26  ;;  %3330 = vmatpush3.bf16.msra.mxu1 %v3355_v14 }
 0x410   : > { %v3494_v4 = vpop.eup %3493  ;;  %3142 = vmatpush3.msra.mxu0 %v1204_v41  ;;  %v1203_v37 = vmul.f32 %v3492_v33, %v4313_v62 }
 0x411   : > { %v3496_v47 = vpop.eup %3495  ;;  %3143 = vmatprep.subr.mxu0 %v1219_v16  ;;  %v1218_v29 = vmul.f32 %v3494_v4, %v4334_v9 }
 0x412   : > { %v3498_v38 = vpop.eup %3497  ;;  %3144 = vmatpush3.msra.mxu0 %v1203_v37  ;;  %v1202_v31 = vmul.f32 %v3496_v47, %v4337_v17 }
 0x413   : > { %v3500_v32 = vpop.eup %3499  ;;  %3145 = vmatprep.subr.mxu0 %v1218_v29  ;;  %v1217_v40 = vmul.f32 %v3498_v38, %v4344_v46 }
 0x414   : > { %v3502_v53 = vpop.eup %3501  ;;  %3146 = vmatpush3.msra.mxu0 %v1202_v31  ;;  %v1201_v26 = vmul.f32 %v3500_v32, %v4347_v11 }
 0x415   : > { %v3504_v43 = vpop.eup %3503  ;;  %3147 = vmatprep.subr.mxu0 %v1217_v40  ;;  %v1216_v62 = vmul.f32 %v3502_v53, %v4368_v39 }
 0x416   : > { %v3506_v54 = vpop.eup %3505  ;;  %3148 = vmatpush3.msra.mxu0 %v1201_v26  ;;  %v1200_v9 = vmul.f32 %v3504_v43, %v4371_v52 }
 0x417   : > { %v3508_v56 = vpop.eup %3507  ;;  %3149 = vmatprep.subr.mxu0 %v1216_v62  ;;  %v1215_v17 = vmul.f32 %v3506_v54, %v4378_v45 }
 0x418   : > { %v3510_v55 = vpop.eup %3509  ;;  %3150 = vmatpush3.msra.mxu0 %v1200_v9  ;;  %v1199_v46 = vmul.f32 %v3508_v56, %v4381_v35 }
 0x419   : > { %v3512_v58 = vpop.eup %3511  ;;  %3151 = vmatprep.subr.mxu0 %v1215_v17  ;;  %v1214_v11 = vmul.f32 %v3510_v55, %v4409_v44 }
 0x41a   : > { %v3514_v12 = vpop.eup %3513  ;;  %3152 = vmatpush3.msra.mxu0 %v1199_v46  ;;  %v1198_v39 = vmul.f32 %v3512_v58, %v4412_v59 }
 0x41b   : > { %v3516_v1 = vpop.eup %3515  ;;  %3153 = vmatprep.subr.mxu0 %v1214_v11  ;;  %v1213_v52 = vmul.f32 %v3514_v12, %v4417_v60 }
 0x41c   : > { %3154 = vmatpush3.msra.mxu0 %v1198_v39  ;;  %v1197_v49 = vmul.f32 %v3516_v1, %v4422_v61 }
 0x41d   : > { %3155 = vmatprep.subr.mxu0 %v1213_v52 }
 0x41e   : > { %3156 = vmatpush3.msra.mxu0 %v1197_v49 }
 0x41f   : > { %1332 = vmatmul.mubr.f32.vlgmr.msra.gmra.mxu0 %v4078_v8  ;;  %v5080_v8 = vld [vmem:[#allocation24_spill] sm:$0xff] }
 0x420   : > { %1336 = vmatprep.mubr.f32.mxu0 %v4083_v7  ;;  %v5081_v7 = vld [vmem:[#allocation25_spill] sm:$0xff] }
 0x423   : > { %1337 = vmatmul.mubr.f32.gmra.mxu0 %v4090_v5  ;;  %v5082_v5 = vld [vmem:[#allocation26_spill] sm:$0xff] }
 0x424   : > { %1341 = vmatprep.mubr.f32.mxu0 %v4095_v6  ;;  %v3527_v6 = vmov 0  }
 0x425   : > { %1233 = vst.msk [vmem:[#allocation2 + $0x8] sm:$0xf] %vm1229_vm2, %v3527_v6  ;;  %1230 = vst.msk [vmem:[#allocation2] sm:$0xf] %vm1229_vm2, %v3527_v6 }
 0x426   : > { %1234 = vst.msk [vmem:[#allocation2 + $0xc] sm:$0x1] %vm1231_vm3, %v3527_v6  ;;  %1232 = vst.msk [vmem:[#allocation2 + $0x4] sm:$0x1] %vm1231_vm3, %v3527_v6 }
 0x427   : > { %1342 = vmatmul.mubr.f32.gmra.mxu0 %v4102_v15  ;;  %1235 = vst.msk [vmem:[#allocation2 + $0x10] sm:$0xf] %vm1229_vm2, %v3527_v6  ;;  %1237 = vst.msk [vmem:[#allocation2 + $0x18] sm:$0xf] %vm1229_vm2, %v3527_v6 }
 0x428   : > { %1346 = vmatprep.mubr.f32.mxu0 %v4107_v18  ;;  %1236 = vst.msk [vmem:[#allocation2 + $0x14] sm:$0x1] %vm1231_vm3, %v3527_v6  ;;  %1238 = vst.msk [vmem:[#allocation2 + $0x1c] sm:$0x1] %vm1231_vm3, %v3527_v6 }
 0x429   : > { %1239 = vst.msk [vmem:[#allocation2 + $0x20] sm:$0xf] %vm1229_vm2, %v3527_v6  ;;  %1241 = vst.msk [vmem:[#allocation2 + $0x28] sm:$0xf] %vm1229_vm2, %v3527_v6 }
 0x42a   : > { %1240 = vst.msk [vmem:[#allocation2 + $0x24] sm:$0x1] %vm1231_vm3, %v3527_v6  ;;  %1242 = vst.msk [vmem:[#allocation2 + $0x2c] sm:$0x1] %vm1231_vm3, %v3527_v6 }
 0x42b   : > { %1347 = vmatmul.mubr.f32.gmra.mxu0 %v4114_v20  ;;  %1243 = vst.msk [vmem:[#allocation2 + $0x30] sm:$0xf] %vm1229_vm2, %v3527_v6  ;;  %1245 = vst.msk [vmem:[#allocation2 + $0x38] sm:$0xf] %vm1229_vm2, %v3527_v6 }
 0x42c   : > { %1351 = vmatprep.mubr.f32.mxu0 %v4119_v21  ;;  %1244 = vst.msk [vmem:[#allocation2 + $0x34] sm:$0x1] %vm1231_vm3, %v3527_v6  ;;  %1246 = vst.msk [vmem:[#allocation2 + $0x3c] sm:$0x1] %vm1231_vm3, %v3527_v6  ;;  %v1832_v15 = vld [vmem:[#allocation2] sm:$0xe] }
 0x42d   : > { %1247 = vst.msk [vmem:[#allocation2 + $0x40] sm:$0xf] %vm1229_vm2, %v3527_v6  ;;  %1249 = vst.msk [vmem:[#allocation2 + $0x48] sm:$0xf] %vm1229_vm2, %v3527_v6  ;;  %v1833_v18 = vld [vmem:[#allocation2 + $0x4] sm:$0x1] }
 0x42e   : > { %1248 = vst.msk [vmem:[#allocation2 + $0x44] sm:$0x1] %vm1231_vm3, %v3527_v6  ;;  %1250 = vst.msk [vmem:[#allocation2 + $0x4c] sm:$0x1] %vm1231_vm3, %v3527_v6  ;;  %v3033_v21 = vrot.slane %v1832_v15, 9 }
 0x42f   : > { %1352 = vmatmul.mubr.f32.gmra.mxu0 %v4126_v22  ;;  %v1869_v22 = vrot.slane %v1833_v18, 5  ;;  %v1652_v3 = vld [vmem:[#allocation2] sm:$0xf]  ;;  %v1601_v31 = vld [vmem:[#allocation2 + $0x8] sm:$0xf] }
 0x430   : > { %1356 = vmatprep.mubr.f32.mxu0 %v4131_v24  ;;  %1660 = vst.msk [vmem:[#allocation3] sm:$0xf] %vm1229_vm2, %v1652_v3  ;;  %v1607_v40 = vld [vmem:[#allocation2 + $0xc] sm:$0x1]  ;;  %v1610_v58 = vld [vmem:[#allocation2 + $0x10] sm:$0xf] }
 0x431   : > { %v1870_v24 = vsel %vm4485_vm6, %v3033_v21, %v1869_v22  ;;  %v1613_v11 = vld [vmem:[#allocation2 + $0x14] sm:$0x1]  ;;  %v1616_v22 = vld [vmem:[#allocation2 + $0x18] sm:$0xf] }
 0x432   : > { %1899 = vrot.lane.b32.xlu0 %v1870_v24, %s3528_s29 }
 0x433   : > { %1357 = vmatmul.mubr.f32.gmra.mxu0 %v4138_v25  ;;  %v1668_v25 = vld [vmem:[#allocation2] sm:$0xf] }
 0x434   : > { %1361 = vmatprep.mubr.f32.mxu0 %v4143_v36  ;;  %v1669_v36 = vld [vmem:[#allocation2 + $0x4] sm:$0x1]  ;;  %v1688_v45 = vshrl.u32 %v1668_v25, 16  ;;  %v1691_v35 = vshll.u32 %v1668_v25, 16  ;;  %v2229_v61 = vld [vmem:[#allocation2 + $0x48] sm:$0xf] }
 0x435   : > { %v1697_v44 = vshll.u32 %v1669_v36, 16  ;;  %2252 = vrot.lane.b32.xlu1 %v2229_v61, %s3528_s29  ;;  %v2444_v0 = vld [vmem:[#allocation2 + $0x48] sm:$0xe]  ;;  %v2445_v57 = vld [vmem:[#allocation2 + $0x4c] sm:$0x1] }
 0x436   : > { %v1690_v59 = vrot.slane %v1688_v45, 4  ;;  %v1693_v60 = vrot.slane %v1691_v35, 5  ;;  %v3056_v10 = vrot.slane %v2444_v0, 9  ;;  %v2492_v23 = vrot.slane %v2445_v57, 5  ;;  %v1619_v25 = vld [vmem:[#allocation2 + $0x1c] sm:$0x1] }
 0x437   : > { %1362 = vmatmul.mubr.f32.gmra.mxu0 %v5080_v8  ;;  %v1699_v13 = vrot.slane %v1697_v44, 5  ;;  %v1625_v61 = vld [vmem:[#allocation2 + $0x24] sm:$0x1] }
 0x438   : > { %1366 = vmatprep.mubr.f32.mxu0 %v5081_v7  ;;  %v1694_v51 = vor.u32 %v1693_v60, %v1690_v59  ;;  %v2493_v19 = vsel %vm4485_vm6, %v3056_v10, %v2492_v23  ;;  %v1622_v60 = vld [vmem:[#allocation2 + $0x20] sm:$0xf] }
 0x439   : > { %2509 = vst.msk [vmem:[#allocation3 + $0x5c] sm:$0xf] %vm1229_vm2, %v2493_v19 }
 0x43a   : > { %v1695_v2 = vrot.slane %v1694_v51, 4 }
 0x43b   : > { %1367 = vmatmul.mubr.f32.gmra.mxu0 %v5082_v5 }
 0x43c   : > { %v1700_v63 = vsel %vm4493_vm9, %v1695_v2, %v1699_v13 }
 0x43d   : > { %1799 = vrot.lane.b32.xlu0 %v1700_v63, %s3529_s13 }
 0x4df   : > { %v3157_v27 = vpop.f32.mrf.mxu0 }
 0x4e1   : > { %v3158_v42 = vpop.f32.mrf.mxu0 }
 0x4e2   : > { %v3159_v48 = vadd.f32 %v3158_v42, %v3157_v27 }
 0x4e3   : > { %v3160_v30 = vpop.f32.mrf.mxu0 }
 0x4e4   : > { %v3097_v50 = vpack.c.bf16 %v3159_v48, %v3159_v48 }
 0x4e5   : > { %v3161_v41 = vpop.f32.mrf.mxu0 }
 0x4e6   : > { %v1518_v33 = vshrl.u32 %v3097_v50, 16  ;;  %v3162_v16 = vadd.f32 %v3161_v41, %v3160_v30  ;;  %v1521_v47 = vshll.u32 %v3097_v50, 16  ;;  %v1628_v50 = vld [vmem:[#allocation2 + $0x28] sm:$0xf]  ;;  %v1631_v41 = vld [vmem:[#allocation2 + $0x2c] sm:$0x1] }
 0x4e7   : > { %v3163_v4 = vpop.f32.mrf.mxu0 }
 0x4e8   : > { %v1520_v37 = vrot.slane %v1518_v33, 7  ;;  %v3098_v38 = vpack.c.bf16 %v3162_v16, %v3162_v16 }
 0x4e9   : > { %v3164_v53 = vpop.f32.mrf.mxu0 }
 0x4ea   : > { %v1523_v26 = vor.u32 %v1521_v47, %v1520_v37  ;;  %v1524_v43 = vrot.slane %v1520_v37, 4  ;;  %v1526_v62 = vshrl.u32 %v3098_v38, 16  ;;  %v1529_v54 = vshll.u32 %v3098_v38, 16 }
 0x4eb   : > { %v3165_v9 = vadd.f32 %v3164_v53, %v3163_v4  ;;  %v3166_v56 = vpop.f32.mrf.mxu0 }
 0x4ec   : > { %v1602_v17 = vsel %vm4511_vm12, %v1523_v26, %v1601_v31  ;;  %v1608_v55 = vsel %vm4516_vm13, %v1524_v43, %v1607_v40  ;;  %v1528_v46 = vrot.slane %v1526_v62, 7 }
 0x4ed   : > { %1603 = vst [vmem:[#allocation2 + $0x8] sm:$0xf] %v1602_v17  ;;  %1609 = vst [vmem:[#allocation2 + $0xc] sm:$0x1] %v1608_v55  ;;  %v3099_v12 = vpack.c.bf16 %v3165_v9, %v3165_v9  ;;  %v3167_v39 = vpop.f32.mrf.mxu0 }
 0x4ee   : > { %v1531_v1 = vor.u32 %v1529_v54, %v1528_v46  ;;  %v1532_v52 = vrot.slane %v1528_v46, 4  ;;  %v3168_v49 = vadd.f32 %v3167_v39, %v3166_v56 }
 0x4ef   : > { %v1534_v8 = vshrl.u32 %v3099_v12, 16  ;;  %v1537_v7 = vshll.u32 %v3099_v12, 16  ;;  %v3169_v5 = vpop.f32.mrf.mxu0 }
 0x4f0   : > { %v1611_v6 = vsel %vm4511_vm12, %v1531_v1, %v1610_v58  ;;  %v1614_v15 = vsel %vm4516_vm13, %v1532_v52, %v1613_v11  ;;  %v3100_v18 = vpack.c.bf16 %v3168_v49, %v3168_v49  ;;  %v1900_v1 = vpop.permute.xlu0 %1899 }
 0x4f1   : > { %1612 = vst [vmem:[#allocation2 + $0x10] sm:$0xf] %v1611_v6  ;;  %1615 = vst [vmem:[#allocation2 + $0x14] sm:$0x1] %v1614_v15  ;;  %v1536_v21 = vrot.slane %v1534_v8, 7  ;;  %v3170_v24 = vpop.f32.mrf.mxu0 }
 0x4f2   : > { %v1542_v36 = vshrl.u32 %v3100_v18, 16  ;;  %v1545_v45 = vshll.u32 %v3100_v18, 16  ;;  %v3171_v35 = vadd.f32 %v3170_v24, %v3169_v5 }
 0x4f3   : > { %v1539_v44 = vor.u32 %v1537_v7, %v1536_v21  ;;  %v1540_v59 = vrot.slane %v1536_v21, 4  ;;  %v3172_v51 = vpop.f32.mrf.mxu0 }
 0x4f4   : > { %v1544_v13 = vrot.slane %v1542_v36, 7  ;;  %v3101_v2 = vpack.c.bf16 %v3171_v35, %v3171_v35  ;;  %v1932_v28 = vld [vmem:[#allocation2 + $0x8] sm:$0xf]  ;;  %v2126_v57 = vld [vmem:[#allocation2 + $0xc] sm:$0x1] }
 0x4f5   : > { %v2125_v63 = vld [vmem:[#allocation2 + $0x8] sm:$0xe]  ;;  %v1617_v14 = vsel %vm4511_vm12, %v1539_v44, %v1616_v22  ;;  %v1620_v0 = vsel %vm4516_vm13, %v1540_v59, %v1619_v25  ;;  %1948 = vrot.lane.b32.xlu0 %v1932_v28, %s3530_s16  ;;  %v3173_v19 = vpop.f32.mrf.mxu0  ;;  %v1835_v30 = vld [vmem:[#allocation2 + $0xc] sm:$0x1]  ;;  %v2159_v33 = vrot.slane %v2126_v57, 5 }
 0x4f6   : > { %v3041_v10 = vrot.slane %v2125_v63, 9  ;;  %v1834_v23 = vld [vmem:[#allocation2 + $0x8] sm:$0xe]  ;;  %1618 = vst [vmem:[#allocation2 + $0x18] sm:$0xf] %v1617_v14  ;;  %v1547_v3 = vor.u32 %v1545_v45, %v1544_v13  ;;  %v1548_v27 = vrot.slane %v1544_v13, 4  ;;  %v3174_v47 = vadd.f32 %v3173_v19, %v3172_v51 }
 0x4f7   : > { %1621 = vst [vmem:[#allocation2 + $0x1c] sm:$0x1] %v1620_v0  ;;  %v1550_v42 = vshrl.u32 %v3101_v2, 16  ;;  %v1553_v48 = vshll.u32 %v3101_v2, 16  ;;  %v3034_v16 = vrot.slane %v1834_v23, 9  ;;  %v1873_v4 = vrot.slane %v1835_v30, 5  ;;  %v3175_v38 = vpop.f32.mrf.mxu0 }
 0x4f8   : > { %v1670_v37 = vld [vmem:[#allocation2 + $0x8] sm:$0xf]  ;;  %v2430_v31 = vld [vmem:[#allocation2 + $0x10] sm:$0xe]  ;;  %v2431_v40 = vld [vmem:[#allocation2 + $0x14] sm:$0x1]  ;;  %v1623_v53 = vsel %vm4511_vm12, %v1547_v3, %v1622_v60  ;;  %v1626_v26 = vsel %vm4516_vm13, %v1548_v27, %v1625_v61  ;;  %v2160_v56 = vsel %vm4485_vm6, %v3041_v10, %v2159_v33  ;;  %v4545_v7 = vpack.c.bf16 %v3174_v47, %v3174_v47  ;;  %v1800_v3 = vpop.permute.xlu0 %1799 }
 0x4f9   : > { %v1552_v43 = vrot.slane %v1550_v42, 7  ;;  %v1702_v62 = vshrl.u32 %v1670_v37, 16  ;;  %v3049_v54 = vrot.slane %v2430_v31, 9  ;;  %v2464_v9 = vrot.slane %v2431_v40, 5  ;;  %1624 = vst [vmem:[#allocation2 + $0x20] sm:$0xf] %v1623_v53  ;;  %v3176_v46 = vpop.f32.mrf.mxu0  ;;  %2189 = vrot.lane.b32.xlu1 %v2160_v56, %s3529_s13 }
 0x4fa   : > { %1627 = vst [vmem:[#allocation2 + $0x24] sm:$0x1] %v1626_v26  ;;  %v2222_v17 = vld [vmem:[#allocation2 + $0x10] sm:$0xf]  ;;  %v1837_v12 = vld [vmem:[#allocation2 + $0x14] sm:$0x1]  ;;  %v3177_v5 = vadd.f32 %v3176_v46, %v3175_v38  ;;  %v1874_v25 = vsel %vm4485_vm6, %v3034_v16, %v1873_v4 }
 0x4fb   : > { %v1836_v55 = vld [vmem:[#allocation2 + $0x10] sm:$0xe]  ;;  %v1555_v58 = vor.u32 %v1553_v48, %v1552_v43  ;;  %v1556_v11 = vrot.slane %v1552_v43, 4  ;;  %2238 = vrot.lane.b32.xlu0 %v2222_v17, %s3528_s29  ;;  %v1877_v52 = vrot.slane %v1837_v12, 5  ;;  %v2465_v8 = vsel %vm4485_vm6, %v3049_v54, %v2464_v9  ;;  %v2128_v18 = vld [vmem:[#allocation2 + $0x14] sm:$0x1] }
 0x4fc   : > { %v3035_v39 = vrot.slane %v1836_v55, 9  ;;  %v4541_v49 = vld [vmem:[#allocation2 + $0x10] sm:$0xe]  ;;  %v1671_v21 = vld [vmem:[#allocation2 + $0xc] sm:$0x1]  ;;  %v1704_v35 = vrot.slane %v1702_v62, 4  ;;  %v4567_v14 = vpack.c.bf16 %v3177_v5, %v3177_v5 }
 0x4fd   : > { %v1629_v6 = vsel %vm4511_vm12, %v1555_v58, %v1628_v50  ;;  %v1632_v15 = vsel %vm4516_vm13, %v1556_v11, %v1631_v41  ;;  %2502 = vst.msk [vmem:[#allocation3 + $0x8] sm:$0xf] %vm1229_vm2, %v2465_v8  ;;  %v2432_v22 = vld [vmem:[#allocation2 + $0x18] sm:$0xe]  ;;  %v3042_v45 = vrot.slane %v4541_v49, 9  ;;  %1901 = vrot.lane.b32.xlu1 %v1874_v25, %s3528_s29  ;;  %v1705_v61 = vshll.u32 %v1670_v37, 16  ;;  %v3178_v41 = vpop.f32.mrf.mxu0 }
 0x4fe   : > { %v2433_v24 = vld [vmem:[#allocation2 + $0x1c] sm:$0x1]  ;;  %1630 = vst [vmem:[#allocation2 + $0x28] sm:$0xf] %v1629_v6  ;;  %1633 = vst [vmem:[#allocation2 + $0x2c] sm:$0x1] %v1632_v15  ;;  %v1878_v36 = vsel %vm4485_vm6, %v3035_v39, %v1877_v52 }
 0x4ff   : > { %v3050_v44 = vrot.slane %v2432_v22, 9  ;;  %v2468_v59 = vrot.slane %v2433_v24, 5  ;;  %1903 = vrot.lane.b32.xlu0 %v1878_v36, %s3528_s29  ;;  %v1934_v60 = vld [vmem:[#allocation2 + $0x18] sm:$0xf]  ;;  %v1711_v13 = vshll.u32 %v1671_v21, 16  ;;  %v1558_v63 = vshrl.u32 %v4545_v7, 16 }
 0x500   : > { %v3359_v51 = vld [vmem:[%s5008_s6 + $0x78] sm:$0xff]   ;;  %v2434_v0 = vld [vmem:[#allocation2 + $0x20] sm:$0xe]  ;;  %v2163_v10 = vrot.slane %v2128_v18, 5  ;;  %v1707_v23 = vrot.slane %v1705_v61, 5  ;;  %v1561_v37 = vshll.u32 %v4545_v7, 16 }
 0x501   : > { %v4562_v2 = vld [vmem:[#allocation2 + $0x18] sm:$0xe]  ;;  %v4564_v28 = vld [vmem:[#allocation2 + $0x1c] sm:$0x1]  ;;  %v2435_v57 = vld [vmem:[#allocation2 + $0x24] sm:$0x1]  ;;  %v2469_v19 = vsel %vm4485_vm6, %v3050_v44, %v2468_v59  ;;  %3237 = vmatprep.subr.bf16.mxu0 %v3359_v51 }
 0x502   : > { %v3051_v27 = vrot.slane %v2434_v0, 9  ;;  %v2472_v42 = vrot.slane %v2435_v57, 5  ;;  %v1933_v48 = vld [vmem:[#allocation2 + $0x10] sm:$0xf]  ;;  %2503 = vst.msk [vmem:[#allocation3 + $0x14] sm:$0xf] %vm1229_vm2, %v2469_v19  ;;  %v1708_v33 = vor.u32 %v1707_v23, %v1704_v35  ;;  %v2164_v9 = vsel %vm4485_vm6, %v3042_v45, %v2163_v10 }
 0x503   : > { %v1634_v30 = vld [vmem:[#allocation2 + $0x30] sm:$0xf]  ;;  %v1637_v50 = vld [vmem:[#allocation2 + $0x34] sm:$0x1]  ;;  %1824 = vst.msk [vmem:[#allocation3] sm:$0xf] %vm1823_vm14, %v1800_v3  ;;  %1950 = vrot.lane.b32.xlu1 %v1933_v48, %s3530_s16  ;;  %1952 = vrot.lane.b32.xlu0 %v1934_v60, %s3530_s16 }
 0x504   : > { %v3043_v16 = vrot.slane %v4562_v2, 9  ;;  %v1560_v4 = vrot.slane %v1558_v63, 7  ;;  %v4577_v47 = vld [vmem:[#allocation2 + $0x18] sm:$0xe]  ;;  %v2270_v38 = vld [vmem:[#allocation2 + $0x10] sm:$0xf]  ;;  %v2473_v40 = vsel %vm4485_vm6, %v3051_v27, %v2472_v42 }
 0x505   : > { %1924 = vst.msk [vmem:[#allocation3] sm:$0xf] %vm1923_vm15, %v1900_v1  ;;  %v3360_v31 = vld [vmem:[%s5008_s6 + $0x38] sm:$0xff]   ;;  %v1713_v53 = vrot.slane %v1711_v13, 5  ;;  %v2167_v26 = vrot.slane %v4564_v28, 5  ;;  %v1566_v43 = vshrl.u32 %v4567_v14, 16  ;;  %v3179_v1 = vpop.f32.mrf.mxu0 }
 0x506   : > { %2504 = vst.msk [vmem:[#allocation3 + $0x20] sm:$0xf] %vm1229_vm2, %v2473_v40  ;;  %v2436_v62 = vld [vmem:[#allocation2 + $0x28] sm:$0xe]  ;;  %v2437_v54 = vld [vmem:[#allocation2 + $0x2c] sm:$0x1]  ;;  %v1563_v17 = vor.u32 %v1561_v37, %v1560_v4  ;;  %3238 = vmatpush3.bf16.msra.mxu0 %v3360_v31  ;;  %v3180_v13 = vadd.f32 %v3179_v1, %v3178_v41 }
 0x507   : > { %v1709_v56 = vrot.slane %v1708_v33, 4  ;;  %v1564_v55 = vrot.slane %v1560_v4, 4  ;;  %v3052_v46 = vrot.slane %v2436_v62, 9  ;;  %v2476_v58 = vrot.slane %v2437_v54, 5  ;;  %v1640_v39 = vld [vmem:[#allocation2 + $0x38] sm:$0xf]  ;;  %2191 = vrot.lane.b32.xlu1 %v2164_v9, %s3529_s13 }
 0x508   : > { %v3036_v11 = vrot.slane %v4577_v47, 9  ;;  %v1568_v12 = vrot.slane %v1566_v43, 7  ;;  %v3361_v52 = vld [vmem:[%s5008_s6 + $0x70] sm:$0xff]   ;;  %v1635_v8 = vsel %vm4511_vm12, %v1563_v17, %v1634_v30  ;;  %v1839_v5 = vld [vmem:[#allocation2 + $0x1c] sm:$0x1]  ;;  %v1569_v6 = vshll.u32 %v4567_v14, 16 }
 0x509   : > { %v1714_v49 = vsel %vm4493_vm9, %v1709_v56, %v1713_v53  ;;  %v1638_v7 = vsel %vm4516_vm13, %v1564_v55, %v1637_v50  ;;  %v1643_v15 = vld [vmem:[#allocation2 + $0x3c] sm:$0x1]  ;;  %v3362_v18 = vld [vmem:[%s5008_s6 + $0x30] sm:$0xff]   ;;  %v2477_v21 = vsel %vm4485_vm6, %v3052_v46, %v2476_v58  ;;  %v2223_v22 = vld [vmem:[#allocation2 + $0x18] sm:$0xf]  ;;  %v2287_v36 = vshrl.u32 %v2270_v38, 16  ;;  %3239 = vmatprep.subr.bf16.mxu0 %v3361_v52 }
 0x50a   : > { %1801 = vrot.lane.b32.xlu0 %v1714_v49, %s3529_s13  ;;  %1636 = vst [vmem:[#allocation2 + $0x30] sm:$0xf] %v1635_v8  ;;  %1639 = vst [vmem:[#allocation2 + $0x34] sm:$0x1] %v1638_v7  ;;  %v1572_v24 = vrot.slane %v1568_v12, 4  ;;  %v2290_v45 = vshll.u32 %v2270_v38, 16  ;;  %v2168_v44 = vsel %vm4485_vm6, %v3043_v16, %v2167_v26  ;;  %v1571_v60 = vor.u32 %v1569_v6, %v1568_v12 }
 0x50b   : > { %v2271_v25 = vld [vmem:[#allocation2 + $0x14] sm:$0x1]  ;;  %v3363_v35 = vld [vmem:[%s5008_s6 + $0x68] sm:$0xff]   ;;  %2505 = vst.msk [vmem:[#allocation3 + $0x2c] sm:$0xf] %vm1229_vm2, %v2477_v21  ;;  %3240 = vmatpush3.bf16.msra.mxu0 %v3362_v18  ;;  %v1881_v28 = vrot.slane %v1839_v5, 5  ;;  %2240 = vrot.lane.b32.xlu1 %v2223_v22, %s3528_s29  ;;  %v4633_v4 = vpack.c.bf16 %v3180_v13, %v3180_v13 }
 0x50c   : > { %v3353_v59 = vld [vmem:[#allocation3 + $0x8] ss:$12 sps:$4 sm:$0xff]   ;;  %v4614_v61 = vld [vmem:[#allocation2 + $0x20] sm:$0xe]  ;;  %v4618_v2 = vld [vmem:[#allocation2 + $0x48] sm:$0xf]  ;;  %v1644_v63 = vsel %vm4516_vm13, %v1572_v24, %v1643_v15  ;;  %3241 = vmatprep.subr.bf16.mxu0 %v3363_v35  ;;  %v1641_v23 = vsel %vm4511_vm12, %v1571_v60, %v1640_v39 }
 0x50d   : > { %v4616_v51 = vld [vmem:[#allocation2 + $0x24] sm:$0x1]  ;;  %v2289_v14 = vrot.slane %v2287_v36, 4  ;;  %v2292_v0 = vrot.slane %v2290_v45, 5  ;;  %v1672_v57 = vld [vmem:[#allocation2 + $0x10] sm:$0xf]  ;;  %3331 = vmatprep.mubr.msk.bf16.mxu1 %vm389_vm1, %v3353_v59  ;;  %v1882_v37 = vsel %vm4485_vm6, %v3036_v11, %v1881_v28 }
 0x50e   : > { %v3364_v10 = vld [vmem:[%s5008_s6 + $0x28] sm:$0xff]   ;;  %1645 = vst [vmem:[#allocation2 + $0x3c] sm:$0x1] %v1644_v63  ;;  %v2296_v19 = vshll.u32 %v2271_v25, 16  ;;  %v1673_v3 = vld [vmem:[#allocation2 + $0x14] sm:$0x1]  ;;  %2193 = vrot.lane.b32.xlu0 %v2168_v44, %s3529_s13 }
 0x50f   : > { %v1716_v27 = vshrl.u32 %v1672_v57, 16  ;;  %v1719_v42 = vshll.u32 %v1672_v57, 16  ;;  %v3365_v48 = vld [vmem:[%s5008_s6 + $0x60] sm:$0xff]   ;;  %1642 = vst [vmem:[#allocation2 + $0x38] sm:$0xf] %v1641_v23  ;;  %v2293_v30 = vor.u32 %v2292_v0, %v2289_v14  ;;  %v1725_v16 = vshll.u32 %v1673_v3, 16  ;;  %3242 = vmatpush3.bf16.msra.mxu0 %v3364_v10  ;;  %1905 = vrot.lane.b32.xlu1 %v1882_v37, %s3528_s29 }
 0x510   : > { %v2224_v50 = vld [vmem:[#allocation2 + $0x20] sm:$0xf]  ;;  %v3044_v47 = vrot.slane %v4614_v61, 9  ;;  %v2171_v38 = vrot.slane %v4616_v51, 5  ;;  %v2272_v31 = vld [vmem:[#allocation2 + $0x18] sm:$0xf]  ;;  %3243 = vmatprep.subr.bf16.mxu0 %v3365_v48 }
 0x511   : > { %v1718_v41 = vrot.slane %v1716_v27, 4  ;;  %v1721_v33 = vrot.slane %v1719_v42, 5  ;;  %v2385_v40 = vshrl.u32 %v4618_v2, 16  ;;  %v2438_v53 = vld [vmem:[#allocation2 + $0x30] sm:$0xe]  ;;  %v2294_v43 = vrot.slane %v2293_v30, 4 }
 0x512   : > { %v2439_v26 = vld [vmem:[#allocation2 + $0x34] sm:$0x1]  ;;  %v2298_v62 = vrot.slane %v2296_v19, 5  ;;  %v3053_v9 = vrot.slane %v2438_v53, 9  ;;  %2242 = vrot.lane.b32.xlu0 %v2224_v50, %s3528_s29  ;;  %v3356_v17 = vld [vmem:[#allocation3 + $0x20] ss:$12 sps:$4 sm:$0xff]   ;;  %v2172_v22 = vsel %vm4485_vm6, %v3044_v47, %v2171_v38 }
 0x513   : > { %v1722_v54 = vor.u32 %v1721_v33, %v1718_v41  ;;  %v2480_v56 = vrot.slane %v2439_v26, 5  ;;  %v1935_v55 = vld [vmem:[#allocation2 + $0x20] sm:$0xf]  ;;  %v1727_v46 = vrot.slane %v1725_v16, 5  ;;  %v2301_v58 = vshrl.u32 %v2272_v31, 16  ;;  %3332 = vmatmul.mubr.msk.bf16.vlgmr.msra.gmra.mxu1 %vm389_vm1, %v3356_v17  ;;  %v3367_v51 = vld [vmem:[%s5008_s6 + $0x58] sm:$0xff]  }
 0x514   : > { %v2304_v11 = vshll.u32 %v2272_v31, 16  ;;  %v1574_v12 = vshrl.u32 %v4633_v4, 16  ;;  %v2273_v1 = vld [vmem:[#allocation2 + $0x1c] sm:$0x1]  ;;  %v1674_v52 = vld [vmem:[#allocation2 + $0x18] sm:$0xf]  ;;  %1954 = vrot.lane.b32.xlu1 %v1935_v55, %s3530_s16  ;;  %v2299_v7 = vsel %vm4493_vm9, %v2294_v43, %v2298_v62 }
 0x515   : > { %v2441_v39 = vld [vmem:[#allocation2 + $0x3c] sm:$0x1]  ;;  %v2481_v49 = vsel %vm4485_vm6, %v3053_v9, %v2480_v56  ;;  %v1723_v5 = vrot.slane %v1722_v54, 4  ;;  %v2303_v6 = vrot.slane %v2301_v58, 4  ;;  %v4650_v18 = vld [vmem:[#allocation2 + $0x4c] sm:$0x1] }
 0x516   : > { %v2440_v8 = vld [vmem:[#allocation2 + $0x38] sm:$0xe]  ;;  %v2306_v15 = vrot.slane %v2304_v11, 5  ;;  %2506 = vst.msk [vmem:[#allocation3 + $0x38] sm:$0xf] %vm1229_vm2, %v2481_v49  ;;  %v3366_v21 = vld [vmem:[%s5008_s6 + $0x20] sm:$0xff]   ;;  %2398 = vrot.lane.b32.xlu0 %v2299_v7, %s3530_s16 }
 0x517   : > { %v1840_v24 = vld [vmem:[#allocation2 + $0x20] sm:$0xe]  ;;  %v1841_v25 = vld [vmem:[#allocation2 + $0x24] sm:$0x1]  ;;  %v1730_v36 = vshrl.u32 %v1674_v52, 16  ;;  %v1733_v45 = vshll.u32 %v1674_v52, 16  ;;  %3244 = vmatpush3.bf16.msra.mxu0 %v3366_v21  ;;  %v1728_v57 = vsel %vm4493_vm9, %v1723_v5, %v1727_v46 }
 0x518   : > { %v1649_v35 = vld [vmem:[#allocation2 + $0x44] sm:$0x1]  ;;  %v3054_v44 = vrot.slane %v2440_v8, 9  ;;  %v2484_v59 = vrot.slane %v2441_v39, 5  ;;  %v2310_v60 = vshll.u32 %v2273_v1, 16  ;;  %v1576_v61 = vrot.slane %v1574_v12, 7  ;;  %2195 = vrot.lane.b32.xlu1 %v2172_v22, %s3529_s13  ;;  %3245 = vmatprep.subr.bf16.mxu0 %v3367_v51 }
 0x519   : > { %v2307_v13 = vor.u32 %v2306_v15, %v2303_v6  ;;  %v1675_v28 = vld [vmem:[#allocation2 + $0x1c] sm:$0x1]  ;;  %v1732_v63 = vrot.slane %v1730_v36, 4  ;;  %v1735_v14 = vrot.slane %v1733_v45, 5  ;;  %v1577_v0 = vshll.u32 %v4633_v4, 16  ;;  %v3369_v46 = vld [vmem:[%s5008_s6 + $0x50] sm:$0xff]  }
 0x51a   : > { %v3037_v10 = vrot.slane %v1840_v24, 9  ;;  %v1885_v23 = vrot.slane %v1841_v25, 5  ;;  %v1580_v19 = vrot.slane %v1576_v61, 4  ;;  %v1646_v3 = vld [vmem:[#allocation2 + $0x40] sm:$0xf]  ;;  %1803 = vrot.lane.b32.xlu0 %v1728_v57, %s3529_s13  ;;  %v2388_v48 = vshll.u32 %v4618_v2, 16 }
 0x51b   : > { %v2225_v27 = vld [vmem:[#allocation2 + $0x28] sm:$0xf]  ;;  %v1579_v42 = vor.u32 %v1577_v0, %v1576_v61  ;;  %v2394_v30 = vshll.u32 %v4650_v18, 16  ;;  %v3368_v50 = vld [vmem:[%s5008_s6 + $0x18] sm:$0xff]   ;;  %v1739_v41 = vshll.u32 %v1675_v28, 16  ;;  %v2485_v37 = vsel %vm4485_vm6, %v3054_v44, %v2484_v59  ;;  %v3370_v1 = vld [vmem:[%s5008_s6 + $0x10] sm:$0xff]  }
 0x51c   : > { %v2133_v33 = vld [vmem:[#allocation2 + $0x28] sm:$0xe]  ;;  %v1650_v16 = vsel %vm4516_vm13, %v1580_v19, %v1649_v35  ;;  %v2274_v4 = vld [vmem:[#allocation2 + $0x20] sm:$0xf]  ;;  %v4677_v47 = vrot.slane %v2385_v40, 4  ;;  %v2308_v38 = vrot.slane %v2307_v13, 4  ;;  %v1736_v53 = vor.u32 %v1735_v14, %v1732_v63  ;;  %3246 = vmatpush3.bf16.msra.mxu0 %v3368_v50  ;;  %2244 = vrot.lane.b32.xlu1 %v2225_v27, %s3528_s29 }
 0x51d   : > { %v2312_v31 = vrot.slane %v2310_v60, 5  ;;  %v2134_v26 = vld [vmem:[#allocation2 + $0x2c] sm:$0x1]  ;;  %v1647_v43 = vsel %vm4511_vm12, %v1579_v42, %v1646_v3  ;;  %1651 = vst [vmem:[#allocation2 + $0x44] sm:$0x1] %v1650_v16  ;;  %v1886_v32 = vsel %vm4485_vm6, %v3037_v10, %v1885_v23  ;;  %v2315_v54 = vshrl.u32 %v2274_v4, 16  ;;  %3247 = vmatprep.subr.bf16.mxu0 %v3369_v46 }
 0x51e   : > { %v1676_v62 = vld [vmem:[#allocation2 + $0x20] sm:$0xf]  ;;  %2507 = vst.msk [vmem:[#allocation3 + $0x44] sm:$0xf] %vm1229_vm2, %v2485_v37  ;;  %1648 = vst [vmem:[#allocation2 + $0x40] sm:$0xf] %v1647_v43  ;;  %1907 = vrot.lane.b32.xlu0 %v1886_v32, %s3528_s29 }
 0x51f   : > { %v1842_v2 = vld [vmem:[#allocation2 + $0x28] sm:$0xe]  ;;  %v1843_v40 = vld [vmem:[#allocation2 + $0x2c] sm:$0x1]  ;;  %v2318_v9 = vshll.u32 %v2274_v4, 16  ;;  %v1744_v29 = vshrl.u32 %v1676_v62, 16  ;;  %v2313_v52 = vsel %vm4493_vm9, %v2308_v38, %v2312_v31 }
 0x520   : > { %v4686_v56 = vld [vmem:[#allocation2 + $0x24] sm:$0x1]  ;;  %v1747_v17 = vshll.u32 %v1676_v62, 16  ;;  %v4688_v55 = vrot.slane %v2388_v48, 5  ;;  %v1936_v58 = vld [vmem:[#allocation2 + $0x28] sm:$0xf]  ;;  %2400 = vrot.lane.b32.xlu1 %v2313_v52, %s3530_s16  ;;  %3248 = vmatpush3.bf16.msra.mxu0 %v3370_v1 }
 0x521   : > { %v1741_v11 = vrot.slane %v1739_v41, 5  ;;  %v3045_v12 = vrot.slane %v2133_v33, 9  ;;  %v2175_v39 = vrot.slane %v2134_v26, 5  ;;  %v1737_v49 = vrot.slane %v1736_v53, 4  ;;  %v1677_v5 = vld [vmem:[#allocation2 + $0x24] sm:$0x1] }
 0x522   : > { %v3038_v8 = vrot.slane %v1842_v2, 9  ;;  %v1889_v7 = vrot.slane %v1843_v40, 5  ;;  %v2317_v6 = vrot.slane %v2315_v54, 4  ;;  %v2320_v15 = vrot.slane %v2318_v9, 5  ;;  %v2276_v22 = vld [vmem:[#allocation2 + $0x28] sm:$0xf]  ;;  %1956 = vrot.lane.b32.xlu0 %v1936_v58, %s3530_s16 }
 0x523   : > { %v2324_v21 = vshll.u32 %v4686_v56, 16  ;;  %v3371_v24 = vld [vmem:[%s5008_s6 + $0x48] sm:$0xff]   ;;  %v4704_v25 = vld [vmem:[#allocation2 + $0x30] sm:$0xe]  ;;  %v2136_v36 = vld [vmem:[#allocation2 + $0x34] sm:$0x1]  ;;  %v2176_v60 = vsel %vm4485_vm6, %v3045_v12, %v2175_v39  ;;  %v1742_v13 = vsel %vm4493_vm9, %v1737_v49, %v1741_v11 }
 0x524   : > { %v1746_v45 = vrot.slane %v1744_v29, 4  ;;  %v1749_v35 = vrot.slane %v1747_v17, 5  ;;  %v2329_v44 = vshrl.u32 %v2276_v22, 16  ;;  %v2332_v59 = vshll.u32 %v2276_v22, 16  ;;  %v2443_v61 = vld [vmem:[#allocation2 + $0x44] sm:$0x1]  ;;  %3249 = vmatprep.subr.bf16.mxu0 %v3371_v24  ;;  %1805 = vrot.lane.b32.xlu1 %v1742_v13, %s3529_s13 }
 0x525   : > { %v2277_v51 = vld [vmem:[#allocation2 + $0x2c] sm:$0x1]  ;;  %v2442_v28 = vld [vmem:[#allocation2 + $0x40] sm:$0xe]  ;;  %v2488_v63 = vrot.slane %v2443_v61, 5  ;;  %v1890_v14 = vsel %vm4485_vm6, %v3038_v8, %v1889_v7  ;;  %v1753_v0 = vshll.u32 %v1677_v5, 16  ;;  %v2321_v27 = vor.u32 %v2320_v15, %v2317_v6 }
 0x526   : > { %v3357_v57 = vld [vmem:[#allocation3 + $0x38] ss:$12 sps:$4 sm:$0xff]   ;;  %v1844_v10 = vld [vmem:[#allocation2 + $0x30] sm:$0xe]  ;;  %v3055_v19 = vrot.slane %v2442_v28, 9  ;;  %v2331_v42 = vrot.slane %v2329_v44, 4  ;;  %2197 = vrot.lane.b32.xlu0 %v2176_v60, %s3529_s13  ;;  %v1750_v33 = vor.u32 %v1749_v35, %v1746_v45 }
 0x527   : > { %v1845_v23 = vld [vmem:[#allocation2 + $0x34] sm:$0x1]  ;;  %v2226_v3 = vld [vmem:[#allocation2 + $0x30] sm:$0xf]  ;;  %v2334_v48 = vrot.slane %v2332_v59, 5  ;;  %v3372_v41 = vld [vmem:[%s5008_s6 + $0x8] sm:$0xff]   ;;  %3335 = vmatprep.mubr.msk.bf16.mxu1 %vm389_vm1, %v3357_v57 }
 0x528   : > { %v1678_v50 = vld [vmem:[#allocation2 + $0x28] sm:$0xf]  ;;  %v2338_v16 = vshll.u32 %v2277_v51, 16  ;;  %v1679_v4 = vld [vmem:[#allocation2 + $0x2c] sm:$0x1]  ;;  %v3373_v31 = vld [vmem:[%s5008_s6 + $0x40] sm:$0xff]   ;;  %v2489_v32 = vsel %vm4485_vm6, %v3055_v19, %v2488_v63  ;;  %3250 = vmatpush3.bf16.msra.mxu0 %v3372_v41  ;;  %1909 = vrot.lane.b32.xlu1 %v1890_v14, %s3528_s29 }
 0x529   : > { %v1758_v37 = vshrl.u32 %v1678_v50, 16  ;;  %v1761_v38 = vshll.u32 %v1678_v50, 16  ;;  %v3046_v53 = vrot.slane %v4704_v25, 9  ;;  %v2179_v26 = vrot.slane %v2136_v36, 5  ;;  %v2137_v62 = vld [vmem:[#allocation2 + $0x38] sm:$0xe]  ;;  %3251 = vmatprep.subr.bf16.mxu0 %v3373_v31 }
 0x52a   : > { %v2335_v43 = vor.u32 %v2334_v48, %v2331_v42  ;;  %v3374_v2 = vld [vmem:[%s5008_s6] sm:$0xff]   ;;  %v2326_v40 = vrot.slane %v2324_v21, 5  ;;  %v1767_v56 = vshll.u32 %v1679_v4, 16  ;;  %v2138_v29 = vld [vmem:[#allocation2 + $0x3c] sm:$0x1]  ;;  %v2322_v17 = vrot.slane %v2321_v27, 4  ;;  %2246 = vrot.lane.b32.xlu0 %v2226_v3, %s3528_s29 }
 0x52b   : > { %v1760_v54 = vrot.slane %v1758_v37, 4  ;;  %v1763_v9 = vrot.slane %v1761_v38, 5  ;;  %2508 = vst.msk [vmem:[#allocation3 + $0x50] sm:$0xf] %vm1229_vm2, %v2489_v32  ;;  %v1755_v46 = vrot.slane %v1753_v0, 5  ;;  %v3039_v58 = vrot.slane %v1844_v10, 9 }
 0x52c   : > { %v1893_v11 = vrot.slane %v1845_v23, 5  ;;  %v4729_v12 = vld [vmem:[#allocation2 + $0x38] sm:$0xe]  ;;  %v1937_v39 = vld [vmem:[#allocation2 + $0x30] sm:$0xf]  ;;  %v1751_v1 = vrot.slane %v1750_v33, 4  ;;  %v2180_v5 = vsel %vm4485_vm6, %v3046_v53, %v2179_v26  ;;  %3252 = vmatpush3.bf16.msra.mxu0 %v3374_v2  ;;  %v2327_v44 = vsel %vm4493_vm9, %v2322_v17, %v2326_v40 }
 0x52d   : > { %v4732_v52 = vrot.slane %v2338_v16, 5  ;;  %v1764_v49 = vor.u32 %v1763_v9, %v1760_v54  ;;  %v3047_v8 = vrot.slane %v2137_v62, 9  ;;  %v4734_v7 = vld [vmem:[#allocation2 + $0x3c] sm:$0x1]  ;;  %v4738_v6 = vrot.slane %v2335_v43, 4  ;;  %1958 = vrot.lane.b32.xlu1 %v1937_v39, %s3530_s16 }
 0x52e   : > { %v2183_v15 = vrot.slane %v2138_v29, 5  ;;  %v2278_v21 = vld [vmem:[#allocation2 + $0x30] sm:$0xf]  ;;  %v2279_v22 = vld [vmem:[#allocation2 + $0x34] sm:$0x1]  ;;  %v4740_v24 = vrot.slane %v1767_v56, 5  ;;  %v1894_v59 = vsel %vm4485_vm6, %v3039_v58, %v1893_v11  ;;  %2402 = vrot.lane.b32.xlu0 %v2327_v44, %s3530_s16  ;;  %v1756_v10 = vsel %vm4493_vm9, %v1751_v1, %v1755_v46 }
 0x52f   : > { %v3040_v25 = vrot.slane %v4729_v12, 9  ;;  %v2343_v36 = vshrl.u32 %v2278_v21, 16  ;;  %v2346_v45 = vshll.u32 %v2278_v21, 16  ;;  %v2139_v35 = vld [vmem:[#allocation2 + $0x40] sm:$0xe]  ;;  %v4748_v60 = vrot.slane %v1764_v49, 4 }
 0x530   : > { %v1897_v61 = vrot.slane %v4734_v7, 5  ;;  %v2140_v51 = vld [vmem:[#allocation2 + $0x44] sm:$0x1]  ;;  %v1680_v13 = vld [vmem:[#allocation2 + $0x30] sm:$0xf]  ;;  %v2352_v14 = vshll.u32 %v2279_v22, 16  ;;  %v4756_v23 = vsel %vm4485_vm6, %v3047_v8, %v2183_v15  ;;  %v2341_v42 = vsel %vm4493_vm9, %v4738_v6, %v4732_v52 }
 0x531   : > { %v2345_v28 = vrot.slane %v2343_v36, 4  ;;  %v2348_v63 = vrot.slane %v2346_v45, 5  ;;  %v1681_v0 = vld [vmem:[#allocation2 + $0x34] sm:$0x1]  ;;  %v1772_v57 = vshrl.u32 %v1680_v13, 16  ;;  %v3048_v3 = vrot.slane %v2139_v35, 9  ;;  %2199 = vrot.lane.b32.xlu1 %v2180_v5, %s3529_s13 }
 0x532   : > { %v3358_v19 = vld [vmem:[#allocation3 + $0x50] ss:$12 sps:$4 sm:$0xff]   ;;  %v1775_v27 = vshll.u32 %v1680_v13, 16  ;;  %v1781_v41 = vshll.u32 %v1681_v0, 16  ;;  %v2280_v33 = vld [vmem:[#allocation2 + $0x38] sm:$0xf]  ;;  %1807 = vrot.lane.b32.xlu0 %v1756_v10, %s3529_s13  ;;  %v1770_v5 = vsel %vm4493_vm9, %v4748_v60, %v4740_v24  ;;  %v4783_v6 = vsel %vm4485_vm6, %v3040_v25, %v1897_v61  ;;  %v4809_v10 = vpop.f32.mrf.mxu1 }
 0x533   : > { %v2349_v48 = vor.u32 %v2348_v63, %v2345_v28  ;;  %v1774_v50 = vrot.slane %v1772_v57, 4  ;;  %v2281_v16 = vld [vmem:[#allocation2 + $0x3c] sm:$0x1]  ;;  %3336 = vmatmul.mubr.msk.bf16.gmra.mxu1 %vm389_vm1, %v3358_v19  ;;  %v2187_v4 = vrot.slane %v2140_v51, 5  ;;  %v2357_v38 = vshrl.u32 %v2280_v33, 16 }
 0x534   : > { %v1777_v37 = vrot.slane %v1775_v27, 5  ;;  %v2360_v31 = vshll.u32 %v2280_v33, 16  ;;  %v2282_v53 = vld [vmem:[#allocation2 + $0x40] sm:$0xf]  ;;  %v2227_v26 = vld [vmem:[#allocation2 + $0x38] sm:$0xf] }
 0x535   : > { %v4765_v43 = vrot.slane %v2352_v14, 5  ;;  %v2366_v62 = vshll.u32 %v2281_v16, 16  ;;  %v2283_v32 = vld [vmem:[#allocation2 + $0x44] sm:$0x1]  ;;  %v2371_v2 = vshrl.u32 %v2282_v53, 16  ;;  %v2374_v40 = vshll.u32 %v2282_v53, 16  ;;  %2248 = vrot.lane.b32.xlu1 %v2227_v26, %s3528_s29 }
 0x536   : > { %v4767_v54 = vrot.slane %v2349_v48, 4  ;;  %v1778_v9 = vor.u32 %v1777_v37, %v1774_v50  ;;  %v2359_v56 = vrot.slane %v2357_v38, 4  ;;  %v2362_v29 = vrot.slane %v2360_v31, 5  ;;  %v1682_v17 = vld [vmem:[#allocation2 + $0x38] sm:$0xf]  ;;  %1911 = vrot.lane.b32.xlu0 %v1894_v59, %s3528_s29  ;;  %v4815_v37 = vpop.f32.mrf.mxu1 }
 0x537   : > { %v4769_v46 = vrot.slane %v1781_v41, 5  ;;  %v2373_v58 = vrot.slane %v2371_v2, 4  ;;  %v2376_v11 = vrot.slane %v2374_v40, 5  ;;  %v2380_v12 = vshll.u32 %v2283_v32, 16  ;;  %v4771_v39 = vld [vmem:[#allocation2 + $0x3c] sm:$0x1] }
 0x538   : > { %v4774_v1 = vrot.slane %v1778_v9, 4  ;;  %v2363_v52 = vor.u32 %v2362_v29, %v2359_v56  ;;  %v1786_v49 = vshrl.u32 %v1682_v17, 16  ;;  %v1789_v8 = vshll.u32 %v1682_v17, 16  ;;  %v1982_v7 = vld [vmem:[#allocation2 + $0xc] sm:$0x1] }
 0x539   : > { %v4787_v15 = vsel %vm4485_vm6, %v3048_v3, %v2187_v4  ;;  %v2377_v21 = vor.u32 %v2376_v11, %v2373_v58  ;;  %v1981_v22 = vld [vmem:[#allocation2 + $0x8] sm:$0xf]  ;;  %v1938_v36 = vld [vmem:[#allocation2 + $0x38] sm:$0xf]  ;;  %v4789_v45 = vrot.slane %v2366_v62, 5  ;;  %v4791_v35 = vrot.slane %v2380_v12, 5  ;;  %2404 = vrot.lane.b32.xlu1 %v2341_v42, %s3530_s16 }
 0x53a   : > { %v1795_v44 = vshll.u32 %v4771_v39, 16  ;;  %v2007_v59 = vshll.u32 %v1982_v7, 16  ;;  %v1983_v51 = vld [vmem:[#allocation2 + $0x10] sm:$0xf]  ;;  %v4794_v24 = vrot.slane %v2363_v52, 4  ;;  %v4796_v60 = vrot.slane %v1786_v49, 4  ;;  %1960 = vrot.lane.b32.xlu0 %v1938_v36, %s3530_s16  ;;  %v4824_v36 = vpop.f32.mrf.mxu1 }
 0x53b   : > { %v4798_v25 = vrot.slane %v1789_v8, 5  ;;  %v1998_v20 = vshrl.u32 %v1981_v22, 16  ;;  %v1984_v61 = vld [vmem:[#allocation2 + $0x14] sm:$0x1]  ;;  %v2355_v13 = vsel %vm4493_vm9, %v4767_v54, %v4765_v43  ;;  %v1784_v28 = vsel %vm4493_vm9, %v4774_v1, %v4769_v46  ;;  %v1653_v0 = vld [vmem:[#allocation2 + $0x8] sm:$0xf] }
 0x53c   : > { %v2001_v63 = vshll.u32 %v1981_v22, 16  ;;  %v2012_v14 = vshrl.u32 %v1983_v51, 16  ;;  %v1985_v57 = vld [vmem:[#allocation2 + $0x18] sm:$0xf]  ;;  %v4812_v19 = vrot.slane %v2377_v21, 4  ;;  %v2015_v27 = vshll.u32 %v1983_v51, 16 }
 0x53d   : > { %v2000_v3 = vrot.slane %v1998_v20, 4  ;;  %v2021_v42 = vshll.u32 %v1984_v61, 16  ;;  %1661 = vst.msk [vmem:[#allocation3 + $0xc] sm:$0xf] %vm1229_vm2, %v1653_v0  ;;  %v1986_v48 = vld [vmem:[#allocation2 + $0x1c] sm:$0x1]  ;;  %1809 = vrot.lane.b32.xlu1 %v1770_v5, %s3529_s13  ;;  %v1792_v2 = vor.u32 %v4798_v25, %v4796_v60  ;;  %v3215_v43 = vadd.f32 %v4815_v37, %v4809_v10 }
 0x53e   : > { %v2009_v50 = vrot.slane %v2007_v59, 5  ;;  %v2003_v41 = vrot.slane %v2001_v63, 5  ;;  %v2014_v33 = vrot.slane %v2012_v14, 4  ;;  %v2026_v16 = vshrl.u32 %v1985_v57, 16  ;;  %v1987_v4 = vld [vmem:[#allocation2 + $0x20] sm:$0xf]  ;;  %2201 = vrot.lane.b32.xlu0 %v4756_v23, %s3529_s13 }
 0x53f   : > { %v2017_v38 = vrot.slane %v2015_v27, 5  ;;  %v2023_v31 = vrot.slane %v2021_v42, 5  ;;  %v2029_v53 = vshll.u32 %v1985_v57, 16  ;;  %v2035_v26 = vshll.u32 %v1986_v48, 16  ;;  %v1988_v62 = vld [vmem:[#allocation2 + $0x24] sm:$0x1]  ;;  %v3217_v27 = vpop.f32.mrf.mxu1 }
 0x540   : > { %v2228_v32 = vld [vmem:[#allocation2 + $0x40] sm:$0xf]  ;;  %v2004_v40 = vor.u32 %v2003_v41, %v2000_v3  ;;  %v2028_v9 = vrot.slane %v2026_v16, 4  ;;  %v2040_v56 = vshrl.u32 %v1987_v4, 16  ;;  %v1654_v29 = vld [vmem:[#allocation2 + $0x10] sm:$0xf]  ;;  %v2369_v46 = vsel %vm4493_vm9, %v4794_v24, %v4789_v45 }
 0x541   : > { %v1655_v17 = vld [vmem:[#allocation2 + $0x18] sm:$0xf]  ;;  %v2018_v58 = vor.u32 %v2017_v38, %v2014_v33  ;;  %v2031_v11 = vrot.slane %v2029_v53, 5  ;;  %v2037_v12 = vrot.slane %v2035_v26, 5  ;;  %v2043_v52 = vshll.u32 %v1987_v4, 16  ;;  %1913 = vrot.lane.b32.xlu1 %v4783_v6, %s3528_s29  ;;  %1477 = vst.msk [vmem:[%s4855_s19] sm:$0xff] %vm389_vm1, %v3215_v43 }
 0x542   : > { %1662 = vst.msk [vmem:[#allocation3 + $0x18] sm:$0xf] %vm1229_vm2, %v1654_v29  ;;  %1663 = vst.msk [vmem:[#allocation3 + $0x24] sm:$0xf] %vm1229_vm2, %v1655_v17  ;;  %v1989_v49 = vld [vmem:[#allocation2 + $0x28] sm:$0xf]  ;;  %2250 = vrot.lane.b32.xlu0 %v2228_v32, %s3528_s29  ;;  %v3219_v32 = vpop.f32.mrf.mxu1  ;;  %v2383_v1 = vsel %vm4493_vm9, %v4812_v19, %v4791_v35 }
 0x543   : > { %v2005_v8 = vrot.slane %v2004_v40, 4  ;;  %v2042_v7 = vrot.slane %v2040_v56, 4  ;;  %v2049_v5 = vshll.u32 %v1988_v62, 16  ;;  %v1990_v21 = vld [vmem:[#allocation2 + $0x2c] sm:$0x1]  ;;  %v2054_v22 = vshrl.u32 %v1989_v49, 16 }
 0x544   : > { %v2019_v59 = vrot.slane %v2018_v58, 4  ;;  %v2032_v51 = vor.u32 %v2031_v11, %v2028_v9  ;;  %v2045_v23 = vrot.slane %v2043_v52, 5  ;;  %v2057_v20 = vshll.u32 %v1989_v49, 16  ;;  %v1991_v61 = vld [vmem:[#allocation2 + $0x30] sm:$0xf] }
 0x545   : > { %v2010_v63 = vsel %vm4493_vm9, %v2005_v8, %v2009_v50  ;;  %v2051_v14 = vrot.slane %v2049_v5, 5  ;;  %v2056_v0 = vrot.slane %v2054_v22, 4  ;;  %v2063_v57 = vshll.u32 %v1990_v21, 16  ;;  %v1992_v3 = vld [vmem:[#allocation2 + $0x34] sm:$0x1] }
 0x546   : > { %v1939_v42 = vld [vmem:[#allocation2 + $0x40] sm:$0xf]  ;;  %2117 = vst.msk [vmem:[#allocation3 + $0x4] sm:$0xf] %vm1229_vm2, %v2010_v63  ;;  %v2024_v48 = vsel %vm4493_vm9, %v2019_v59, %v2023_v31  ;;  %v2033_v41 = vrot.slane %v2032_v51, 4  ;;  %v2046_v33 = vor.u32 %v2045_v23, %v2042_v7  ;;  %v2059_v6 = vrot.slane %v2057_v20, 5  ;;  %v3220_v7 = vpop.f32.mrf.mxu1  ;;  %2406 = vrot.lane.b32.xlu0 %v2355_v13, %s3530_s16 }
 0x547   : > { %v1656_v16 = vld [vmem:[#allocation2 + $0x20] sm:$0xf]  ;;  %v1657_v4 = vld [vmem:[#allocation2 + $0x28] sm:$0xf]  ;;  %2118 = vst.msk [vmem:[#allocation3 + $0x10] sm:$0xf] %vm1229_vm2, %v2024_v48  ;;  %1962 = vrot.lane.b32.xlu1 %v1939_v42, %s3530_s16 }
 0x548   : > { %v2065_v50 = vrot.slane %v2063_v57, 5  ;;  %v2068_v38 = vshrl.u32 %v1991_v61, 16  ;;  %v2071_v53 = vshll.u32 %v1991_v61, 16  ;;  %v2077_v26 = vshll.u32 %v1992_v3, 16  ;;  %1664 = vst.msk [vmem:[#allocation3 + $0x30] sm:$0xf] %vm1229_vm2, %v1656_v16  ;;  %v3222_v20 = vpop.f32.mrf.mxu1 }
 0x549   : > { %1665 = vst.msk [vmem:[#allocation3 + $0x3c] sm:$0xf] %vm1229_vm2, %v1657_v4  ;;  %v1993_v62 = vld [vmem:[#allocation2 + $0x38] sm:$0xf]  ;;  %v2038_v31 = vsel %vm4493_vm9, %v2033_v41, %v2037_v12  ;;  %v2047_v40 = vrot.slane %v2046_v33, 4  ;;  %v2060_v9 = vor.u32 %v2059_v6, %v2056_v0  ;;  %v3218_v3 = vadd.f32 %v3217_v27, %v4824_v36 }
 0x54a   : > { %v1994_v56 = vld [vmem:[#allocation2 + $0x3c] sm:$0x1]  ;;  %v2082_v29 = vshrl.u32 %v1993_v62, 16  ;;  %v1995_v17 = vld [vmem:[#allocation2 + $0x40] sm:$0xf]  ;;  %v2070_v58 = vrot.slane %v2068_v38, 4  ;;  %v3223_v42 = vpop.f32.mrf.mxu1  ;;  %1811 = vrot.lane.b32.xlu0 %v1784_v28, %s3529_s13  ;;  %v3221_v41 = vadd.f32 %v3220_v7, %v3219_v32 }
 0x54b   : > { %2119 = vst.msk [vmem:[#allocation3 + $0x1c] sm:$0xf] %vm1229_vm2, %v2038_v31  ;;  %v2073_v11 = vrot.slane %v2071_v53, 5  ;;  %v2079_v52 = vrot.slane %v2077_v26, 5  ;;  %v2085_v49 = vshll.u32 %v1993_v62, 16  ;;  %v2052_v12 = vsel %vm4493_vm9, %v2047_v40, %v2051_v14  ;;  %2203 = vrot.lane.b32.xlu1 %v4787_v15, %s3529_s13  ;;  %v4924_v31 = vpop.permute.xlu1 %2252 }
 0x54c   : > { %v1996_v8 = vld [vmem:[#allocation2 + $0x44] sm:$0x1]  ;;  %v2061_v5 = vrot.slane %v2060_v9, 4  ;;  %v2084_v21 = vrot.slane %v2082_v29, 4  ;;  %v2091_v22 = vshll.u32 %v1994_v56, 16  ;;  %v2096_v54 = vshrl.u32 %v1995_v17, 16  ;;  %v3225_v16 = vpop.f32.mrf.mxu1 }
 0x54d   : > { %v1658_v59 = vld [vmem:[#allocation2 + $0x30] sm:$0xf]  ;;  %2120 = vst.msk [vmem:[#allocation3 + $0x28] sm:$0xf] %vm1229_vm2, %v2052_v12  ;;  %v2074_v51 = vor.u32 %v2073_v11, %v2070_v58  ;;  %v2087_v23 = vrot.slane %v2085_v49, 5  ;;  %v2099_v14 = vshll.u32 %v1995_v17, 16  ;;  %v2391_v15 = vor.u32 %v4688_v55, %v4677_v47 }
 0x54e   : > { %1666 = vst.msk [vmem:[#allocation3 + $0x48] sm:$0xf] %vm1229_vm2, %v1658_v59  ;;  %v1659_v13 = vld [vmem:[#allocation2 + $0x38] sm:$0xf]  ;;  %v2066_v61 = vsel %vm4493_vm9, %v2061_v5, %v2065_v50  ;;  %v2093_v63 = vrot.slane %v2091_v22, 5  ;;  %v2105_v0 = vshll.u32 %v1996_v8, 16  ;;  %v3224_v33 = vadd.f32 %v3223_v42, %v3222_v20  ;;  %2410 = vrot.lane.b32.xlu0 %v2383_v1, %s3530_s16 }
 0x54f   : > { %1667 = vst.msk [vmem:[#allocation3 + $0x54] sm:$0xf] %vm1229_vm2, %v1659_v13  ;;  %2121 = vst.msk [vmem:[#allocation3 + $0x34] sm:$0xf] %vm1229_vm2, %v2066_v61  ;;  %v2075_v10 = vrot.slane %v2074_v51, 4  ;;  %v2088_v37 = vor.u32 %v2087_v23, %v2084_v21  ;;  %v2098_v57 = vrot.slane %v2096_v54, 4  ;;  %2408 = vrot.lane.b32.xlu1 %v2369_v46, %s3530_s16 }
 0x550   : > { %v2101_v48 = vrot.slane %v2099_v14, 5  ;;  %v1797_v6 = vrot.slane %v1795_v44, 5  ;;  %1478 = vst.msk [vmem:[%s4855_s19 + $0x8] sm:$0xff] %vm389_vm1, %v3218_v3  ;;  %v1793_v47 = vrot.slane %v1792_v2, 4  ;;  %v2107_v39 = vrot.slane %v2105_v0, 5  ;;  %1479 = vst.msk [vmem:[%s4855_s19 + $0x10] sm:$0xff] %vm389_vm1, %v3221_v41  ;;  %v3226_v44 = vpop.f32.mrf.mxu1 }
 0x551   : > { %v2080_v36 = vsel %vm4493_vm9, %v2075_v10, %v2079_v52  ;;  %v2089_v27 = vrot.slane %v2088_v37, 4  ;;  %1480 = vst.msk [vmem:[%s4855_s19 + $0x18] sm:$0xff] %vm389_vm1, %v3224_v33  ;;  %v2392_v24 = vrot.slane %v2391_v15, 4  ;;  %v2396_v60 = vrot.slane %v2394_v30, 5 }
 0x552   : > { %2122 = vst.msk [vmem:[#allocation3 + $0x40] sm:$0xf] %vm1229_vm2, %v2080_v36  ;;  %v2102_v55 = vor.u32 %v2101_v48, %v2098_v57  ;;  %v3227_v28 = vadd.f32 %v3226_v44, %v3225_v16  ;;  %v3228_v2 = vpop.f32.mrf.mxu1  ;;  %v1798_v35 = vsel %vm4493_vm9, %v1793_v47, %v1797_v6 }
 0x553   : > { %v2094_v45 = vsel %vm4493_vm9, %v2089_v27, %v2093_v63  ;;  %1813 = vrot.lane.b32.xlu1 %v1798_v35, %s3529_s13  ;;  %v2397_v30 = vsel %vm4493_vm9, %v2392_v24, %v2396_v60 }
 0x554   : > { %2123 = vst.msk [vmem:[#allocation3 + $0x4c] sm:$0xf] %vm1229_vm2, %v2094_v45  ;;  %v2103_v25 = vrot.slane %v2102_v55, 4  ;;  %v3229_v18 = vpop.f32.mrf.mxu1 }
 0x555   : > { %1481 = vst.msk [vmem:[%s4855_s19 + $0x20] sm:$0xff] %vm389_vm1, %v3227_v28  ;;  %v3230_v4 = vadd.f32 %v3229_v18, %v3228_v2 }
 0x556   : > { %v2108_v19 = vsel %vm4493_vm9, %v2103_v25, %v2107_v39  ;;  %v3231_v50 = vpop.f32.mrf.mxu1 }
 0x557   : > { %2124 = vst.msk [vmem:[#allocation3 + $0x58] sm:$0xf] %vm1229_vm2, %v2108_v19  ;;  %2412 = vrot.lane.b32.xlu1 %v2397_v30, %s3530_s16 }
 0x558   : > { %1482 = vst.msk [vmem:[%s4855_s19 + $0x28] sm:$0xff] %vm389_vm1, %v3230_v4  ;;  %v3232_v38 = vpop.f32.mrf.mxu1  ;;  %v3057_v4 = vld [vmem:[%s5009_s7] ss:$0 sm:$0xff] }
 0x559   : > { %v3233_v53 = vadd.f32 %v3232_v38, %v3231_v50 }
 0x55a   : > { %v3234_v26 = vpop.f32.mrf.mxu1 }
 0x55b   : > { %1483 = vst.msk [vmem:[%s4855_s19 + $0x30] sm:$0xff] %vm389_vm1, %v3233_v53 }
 0x55c   : > { %v3235_v62 = vpop.f32.mrf.mxu1 }
 0x55d   : > { %v3236_v32 = vadd.f32 %v3235_v62, %v3234_v26 }
 0x55f   : > { %1484 = vst.msk [vmem:[%s4855_s19 + $0x38] sm:$0xff] %vm389_vm1, %v3236_v32  ;;  %vm2879_vm1 = vcmask 523264  }
 0x567   : > { %v1949_v34 = vpop.permute.xlu0 %1948 }
 0x568   : > { %1973 = vst.msk [vmem:[#allocation3] sm:$0xf] %vm1972_vm0, %v1949_v34 }
 0x56b   : > { %v2190_v40 = vpop.permute.xlu1 %2189 }
 0x56c   : > { %2213 = vst.msk [vmem:[#allocation3 + $0x4] sm:$0xf] %vm1823_vm14, %v2190_v40 }
 0x56d   : > { %v2239_v9 = vpop.permute.xlu0 %2238 }
 0x56e   : > { %2262 = vst.msk [vmem:[#allocation3 + $0x4] sm:$0xf] %vm1923_vm15, %v2239_v9 }
 0x56f   : > { %v1902_v56 = vpop.permute.xlu1 %1901 }
 0x571   : > { %v1904_v29 = vpop.permute.xlu0 %1903 }
 0x575   : > { %v1951_v17 = vpop.permute.xlu1 %1950  ;;  %v1953_v58 = vpop.permute.xlu0 %1952 }
 0x579   : > { %v2192_v11 = vpop.permute.xlu1 %2191 }
 0x57a   : > { %2214 = vst.msk [vmem:[#allocation3 + $0x10] sm:$0xf] %vm1823_vm14, %v2192_v11 }
 0x57c   : > { %v1802_v52 = vpop.permute.xlu0 %1801 }
 0x57d   : > { %1825 = vst.msk [vmem:[#allocation3 + $0xc] sm:$0xf] %vm1823_vm14, %v1802_v52  ;;  %v2241_v49 = vpop.permute.xlu1 %2240 }
 0x57e   : > { %1925 = vst.msk [vmem:[#allocation3 + $0xc] sm:$0xf] %vm1923_vm15, %v1902_v56  ;;  %2263 = vst.msk [vmem:[#allocation3 + $0x10] sm:$0xf] %vm1923_vm15, %v2241_v49 }
 0x57f   : > { %1974 = vst.msk [vmem:[#allocation3 + $0xc] sm:$0xf] %vm1972_vm0, %v1951_v17 }
 0x580   : > { %v2194_v8 = vpop.permute.xlu0 %2193 }
 0x581   : > { %2215 = vst.msk [vmem:[#allocation3 + $0x1c] sm:$0xf] %vm1823_vm14, %v2194_v8  ;;  %v1906_v7 = vpop.permute.xlu1 %1905 }
 0x584   : > { %v2243_v12 = vpop.permute.xlu0 %2242 }
 0x585   : > { %2264 = vst.msk [vmem:[#allocation3 + $0x1c] sm:$0xf] %vm1923_vm15, %v2243_v12 }
 0x586   : > { %v1955_v5 = vpop.permute.xlu1 %1954  ;;  %v3375_v63 = vld [vmem:[#allocation3] ss:$12 sps:$4 sm:$0xff]  }
 0x588   : > { %v2399_v21 = vpop.permute.xlu0 %2398 }
 0x589   : > { %2422 = vst.msk [vmem:[#allocation3 + $0x4] sm:$0xf] %vm1972_vm0, %v2399_v21 }
 0x58a   : > { %v2196_v22 = vpop.permute.xlu1 %2195 }
 0x58b   : > { %2216 = vst.msk [vmem:[#allocation3 + $0x28] sm:$0xf] %vm1823_vm14, %v2196_v22 }
 0x58c   : > { %v1804_v59 = vpop.permute.xlu0 %1803 }
 0x58d   : > { %1826 = vst.msk [vmem:[#allocation3 + $0x18] sm:$0xf] %vm1823_vm14, %v1804_v59 }
 0x58e   : > { %1926 = vst.msk [vmem:[#allocation3 + $0x18] sm:$0xf] %vm1923_vm15, %v1904_v29  ;;  %v2245_v51 = vpop.permute.xlu1 %2244 }
 0x58f   : > { %1975 = vst.msk [vmem:[#allocation3 + $0x18] sm:$0xf] %vm1972_vm0, %v1953_v58 }
 0x590   : > { %2265 = vst.msk [vmem:[#allocation3 + $0x28] sm:$0xf] %vm1923_vm15, %v2245_v51  ;;  %v1908_v23 = vpop.permute.xlu0 %1907 }
 0x592   : > { %v2401_v43 = vpop.permute.xlu1 %2400 }
 0x593   : > { %2423 = vst.msk [vmem:[#allocation3 + $0x10] sm:$0xf] %vm1972_vm0, %v2401_v43 }
 0x594   : > { %v1957_v54 = vpop.permute.xlu0 %1956 }
 0x596   : > { %v1806_v13 = vpop.permute.xlu1 %1805 }
 0x597   : > { %1827 = vst.msk [vmem:[#allocation3 + $0x24] sm:$0xf] %vm1823_vm14, %v1806_v13 }
 0x598   : > { %v2198_v20 = vpop.permute.xlu0 %2197  ;;  %1927 = vst.msk [vmem:[#allocation3 + $0x24] sm:$0xf] %vm1923_vm15, %v1906_v7 }
 0x599   : > { %2217 = vst.msk [vmem:[#allocation3 + $0x34] sm:$0xf] %vm1823_vm14, %v2198_v20 }
 0x59a   : > { %1976 = vst.msk [vmem:[#allocation3 + $0x24] sm:$0xf] %vm1972_vm0, %v1955_v5  ;;  %v1910_v61 = vpop.permute.xlu1 %1909  ;;  %v3377_v14 = vld [vmem:[#allocation3 + $0x4] ss:$12 sps:$4 sm:$0xff]  }
 0x59b   : > { %2781 = vmatprep.mubr.bf16.mxu0 %v3377_v14 }
 0x59c   : > { %v2247_v0 = vpop.permute.xlu0 %2246  ;;  %2782 = vmatmul.mubr.bf16.vlgmr.msra.gmra.mxu0 %v3375_v63 }
 0x59d   : > { %2266 = vst.msk [vmem:[#allocation3 + $0x34] sm:$0xf] %vm1923_vm15, %v2247_v0 }
 0x59f   : > { %v1959_v10 = vpop.permute.xlu1 %1958 }
 0x5a0   : > { %v2403_v37 = vpop.permute.xlu0 %2402 }
 0x5a1   : > { %2424 = vst.msk [vmem:[#allocation3 + $0x1c] sm:$0xf] %vm1972_vm0, %v2403_v37  ;;  %v3380_v16 = vld [vmem:[#allocation3 + $0x18] ss:$12 sps:$4 sm:$0xff]  }
 0x5a3   : > { %v2200_v57 = vpop.permute.xlu1 %2199 }
 0x5a4   : > { %2218 = vst.msk [vmem:[#allocation3 + $0x40] sm:$0xf] %vm1823_vm14, %v2200_v57  ;;  %v1808_v3 = vpop.permute.xlu0 %1807 }
 0x5a5   : > { %1828 = vst.msk [vmem:[#allocation3 + $0x30] sm:$0xf] %vm1823_vm14, %v1808_v3 }
 0x5a6   : > { %1928 = vst.msk [vmem:[#allocation3 + $0x30] sm:$0xf] %vm1923_vm15, %v1908_v23 }
 0x5a7   : > { %1977 = vst.msk [vmem:[#allocation3 + $0x30] sm:$0xf] %vm1972_vm0, %v1957_v54  ;;  %v2249_v42 = vpop.permute.xlu1 %2248 }
 0x5a8   : > { %2267 = vst.msk [vmem:[#allocation3 + $0x40] sm:$0xf] %vm1923_vm15, %v2249_v42  ;;  %v1912_v15 = vpop.permute.xlu0 %1911 }
 0x5ab   : > { %v2405_v48 = vpop.permute.xlu1 %2404 }
 0x5ac   : > { %2425 = vst.msk [vmem:[#allocation3 + $0x28] sm:$0xf] %vm1972_vm0, %v2405_v48  ;;  %v1961_v41 = vpop.permute.xlu0 %1960 }
 0x5af   : > { %v1810_v33 = vpop.permute.xlu1 %1809 }
 0x5b0   : > { %1829 = vst.msk [vmem:[#allocation3 + $0x3c] sm:$0xf] %vm1823_vm14, %v1810_v33  ;;  %v2202_v6 = vpop.permute.xlu0 %2201 }
 0x5b1   : > { %1929 = vst.msk [vmem:[#allocation3 + $0x3c] sm:$0xf] %vm1923_vm15, %v1910_v61 }
 0x5b2   : > { %2219 = vst.msk [vmem:[#allocation3 + $0x4c] sm:$0xf] %vm1823_vm14, %v2202_v6 }
 0x5b3   : > { %1978 = vst.msk [vmem:[#allocation3 + $0x3c] sm:$0xf] %vm1972_vm0, %v1959_v10  ;;  %v1914_v36 = vpop.permute.xlu1 %1913  ;;  %v3378_v27 = vld [vmem:[#allocation3 + $0x1c] ss:$12 sps:$4 sm:$0xff]  }
 0x5b4   : > { %v2251_v46 = vpop.permute.xlu0 %2250  ;;  %2789 = vmatprep.mubr.bf16.mxu0 %v3378_v27 }
 0x5b5   : > { %2268 = vst.msk [vmem:[#allocation3 + $0x4c] sm:$0xf] %vm1923_vm15, %v2251_v46  ;;  %2790 = vmatmul.mubr.bf16.gmra.mxu0 %v3380_v16 }
 0x5b8   : > { %v2407_v55 = vpop.permute.xlu0 %2406 }
 0x5b9   : > { %v1963_v47 = vpop.permute.xlu1 %1962  ;;  %2426 = vst.msk [vmem:[#allocation3 + $0x34] sm:$0xf] %vm1972_vm0, %v2407_v55 }
 0x5ba   : > { %v3383_v28 = vld [vmem:[#allocation3 + $0x30] ss:$12 sps:$4 sm:$0xff]  }
 0x5bc   : > { %v1812_v1 = vpop.permute.xlu0 %1811 }
 0x5bd   : > { %v2204_v39 = vpop.permute.xlu1 %2203  ;;  %1830 = vst.msk [vmem:[#allocation3 + $0x48] sm:$0xf] %vm1823_vm14, %v1812_v1 }
 0x5be   : > { %2220 = vst.msk [vmem:[#allocation3 + $0x58] sm:$0xf] %vm1823_vm14, %v2204_v39 }
 0x5bf   : > { %2269 = vst.msk [vmem:[#allocation3 + $0x58] sm:$0xf] %vm1923_vm15, %v4924_v31  ;;  %1930 = vst.msk [vmem:[#allocation3 + $0x48] sm:$0xf] %vm1923_vm15, %v1912_v15 }
 0x5c0   : > { %1979 = vst.msk [vmem:[#allocation3 + $0x48] sm:$0xf] %vm1972_vm0, %v1961_v41  ;;  %v2411_v44 = vpop.permute.xlu0 %2410 }
 0x5c1   : > { %v2409_v45 = vpop.permute.xlu1 %2408  ;;  %2428 = vst.msk [vmem:[#allocation3 + $0x4c] sm:$0xf] %vm1972_vm0, %v2411_v44 }
 0x5c2   : > { %2427 = vst.msk [vmem:[#allocation3 + $0x40] sm:$0xf] %vm1972_vm0, %v2409_v45 }
 0x5c5   : > { %v1814_v24 = vpop.permute.xlu1 %1813 }
 0x5c6   : > { %1831 = vst.msk [vmem:[#allocation3 + $0x54] sm:$0xf] %vm1823_vm14, %v1814_v24 }
 0x5c7   : > { %1931 = vst.msk [vmem:[#allocation3 + $0x54] sm:$0xf] %vm1923_vm15, %v1914_v36 }
 0x5c8   : > { %1980 = vst.msk [vmem:[#allocation3 + $0x54] sm:$0xf] %vm1972_vm0, %v1963_v47 }
 0x5c9   : > { %v2413_v60 = vpop.permute.xlu1 %2412  ;;  %v3381_v25 = vld [vmem:[#allocation3 + $0x34] ss:$12 sps:$4 sm:$0xff]  }
 0x5ca   : > { %2429 = vst.msk [vmem:[#allocation3 + $0x58] sm:$0xf] %vm1972_vm0, %v2413_v60  ;;  %2797 = vmatprep.mubr.bf16.mxu0 %v3381_v25 }
 0x5cb   : > { %2798 = vmatmul.mubr.bf16.gmra.mxu0 %v3383_v28 }
 0x5cf   : > { %v3386_v35 = vld [vmem:[#allocation3 + $0x48] ss:$12 sps:$4 sm:$0xff]  }
 0x5d1   : > { %v3384_v2 = vld [vmem:[#allocation3 + $0x4c] ss:$12 sps:$4 sm:$0xff]  }
 0x5d2   : > { %2805 = vmatprep.mubr.bf16.mxu0 %v3384_v2 }
 0x5d3   : > { %2806 = vmatmul.mubr.bf16.gmra.mxu0 %v3386_v35  ;;  %v3333_v19 = vpop.f32.mrf.mxu1 }
 0x5d5   : > { %v2848_v30 = vpop.f32.mrf.mxu1 }
 0x5d7   : > { %v3334_v62 = vpop.f32.mrf.mxu1 }
 0x5d9   : > { %v2851_v9 = vpop.f32.mrf.mxu1 }
 0x5f3   : > { %v3337_v21 = vpop.f32.mrf.mxu1 }
 0x5f5   : > { %v2864_v59 = vpop.f32.mrf.mxu1 }
 0x5f7   : > { %v3338_v13 = vpop.f32.mrf.mxu1 }
 0x5f9   : > { %v2867_v10 = vpop.f32.mrf.mxu1 }
 0x65c   : > { %v3253_v18 = vpop.f32.mrf.mxu0 }
 0x65e   : > { %v3254_v50 = vpop.f32.mrf.mxu0 }
 0x65f   : > { %v3255_v38 = vadd.f32 %v3254_v50, %v3253_v18 }
 0x660   : > { %v3256_v53 = vpop.f32.mrf.mxu0 }
 0x661   : > { %v2784_v26 = vadd.f32 %v3255_v38, %v3057_v4 }
 0x662   : > { %v3257_v32 = vpop.f32.mrf.mxu0 }
 0x663   : > { %v2849_v31 = vadd.f32 %v2848_v30, %v2784_v26  ;;  %v3258_v34 = vadd.f32 %v3257_v32, %v3256_v53 }
 0x665   : > { %2880 = vst.msk [vmem:[%s4981_s22] sm:$0xff] %vm2879_vm1, %v2849_v31  ;;  %v2787_v40 = vadd.f32 %v3258_v34, %v3057_v4 }
 0x667   : > { %v2852_v56 = vadd.f32 %v2851_v9, %v2787_v40 }
 0x669   : > { %2881 = vst.msk [vmem:[%s4981_s22 + $0x8] sm:$0xff] %vm2879_vm1, %v2852_v56 }
 0x675   : > { %v3259_v29 = vpop.f32.mrf.mxu0 }
 0x677   : > { %v3260_v17 = vpop.f32.mrf.mxu0 }
 0x678   : > { %v3261_v58 = vadd.f32 %v3260_v17, %v3259_v29 }
 0x679   : > { %v3262_v11 = vpop.f32.mrf.mxu0 }
 0x67a   : > { %v2792_v52 = vadd.f32 %v3261_v58, %v3057_v4 }
 0x67b   : > { %v3263_v49 = vpop.f32.mrf.mxu0 }
 0x67c   : > { %v2857_v8 = vadd.f32 %v3333_v19, %v2792_v52  ;;  %v3264_v7 = vadd.f32 %v3263_v49, %v3262_v11 }
 0x67e   : > { %2882 = vst.msk [vmem:[%s4981_s22 + $0x10] sm:$0xff] %vm2879_vm1, %v2857_v8  ;;  %v2795_v12 = vadd.f32 %v3264_v7, %v3057_v4 }
 0x680   : > { %v2860_v5 = vadd.f32 %v3334_v62, %v2795_v12 }
 0x682   : > { %2883 = vst.msk [vmem:[%s4981_s22 + $0x18] sm:$0xff] %vm2879_vm1, %v2860_v5 }
 0x68b   : > { %v3265_v22 = vpop.f32.mrf.mxu0 }
 0x68d   : > { %v3266_v51 = vpop.f32.mrf.mxu0 }
 0x68e   : > { %v3267_v23 = vadd.f32 %v3266_v51, %v3265_v22 }
 0x68f   : > { %v3268_v43 = vpop.f32.mrf.mxu0 }
 0x690   : > { %v2800_v54 = vadd.f32 %v3267_v23, %v3057_v4 }
 0x691   : > { %v3269_v20 = vpop.f32.mrf.mxu0 }
 0x692   : > { %v2865_v61 = vadd.f32 %v2864_v59, %v2800_v54  ;;  %v3270_v63 = vadd.f32 %v3269_v20, %v3268_v43 }
 0x693   : > { %v3271_v14 = vpop.f32.mrf.mxu0 }
 0x694   : > { %2884 = vst.msk [vmem:[%s4981_s22 + $0x20] sm:$0xff] %vm2879_vm1, %v2865_v61  ;;  %v2803_v0 = vadd.f32 %v3270_v63, %v3057_v4 }
 0x695   : > { %v3272_v37 = vpop.f32.mrf.mxu0 }
 0x696   : > { %v2868_v57 = vadd.f32 %v2867_v10, %v2803_v0  ;;  %v3273_v3 = vadd.f32 %v3272_v37, %v3271_v14 }
 0x697   : > { %v3274_v42 = vpop.f32.mrf.mxu0 }
 0x698   : > { %2885 = vst.msk [vmem:[%s4981_s22 + $0x28] sm:$0xff] %vm2879_vm1, %v2868_v57  ;;  %v2808_v15 = vadd.f32 %v3273_v3, %v3057_v4 }
 0x699   : > { %v3275_v48 = vpop.f32.mrf.mxu0 }
 0x69a   : > { %v2873_v41 = vadd.f32 %v3337_v21, %v2808_v15  ;;  %v3276_v33 = vadd.f32 %v3275_v48, %v3274_v42 }
 0x69c   : > { %2886 = vst.msk [vmem:[%s4981_s22 + $0x30] sm:$0xff] %vm2879_vm1, %v2873_v41  ;;  %v2811_v6 = vadd.f32 %v3276_v33, %v3057_v4 }
 0x69e   : > { %v2876_v36 = vadd.f32 %v3338_v13, %v2811_v6 }
 0x6a0   : > { %2887 = vst.msk [vmem:[%s4981_s22 + $0x38] sm:$0xff] %vm2879_vm1, %v2876_v36 }
 0x6a1 PF: > { %s20_s30 = sadd.s32 1, %s3523_s30  }
 0x6a2   : > { %p17_p4 = scmp.ge.s32.totalorder %s20_s30, 4  }
 0x6a4   :  { %19 = sbr.rel (!%p17_p4) target bundleno = 1 (0x1), region = 96 }

// kernel: encoder_res_block.3
= control target key start
LH: loop header
LB: loop body
LE: loop exit
PB: predicated region body
PF: predicated region fallthrough
CT: control target
= control target key end

     0   :  { %15 = vsyncpa [#allocation5], 0  ;;  %s4315_s0 = inlined_call_operand.vmem [shape: f32[2,8,8,64], index: 0, kind: input, shape index: {}]   ;;  %s4316_s1 = inlined_call_operand.vmem [shape: f32[2,8,8,32], index: 1, kind: input, shape index: {}]   ;;  %s4317_s2 = inlined_call_operand.vmem [shape: f32[1,64], index: 2, kind: input, shape index: {}]   ;;  %s4318_s3 = inlined_call_operand.vmem [shape: f32[1,64], index: 3, kind: input, shape index: {}]   ;;  %s4319_s4 = inlined_call_operand.vmem [shape: f32[64,32], index: 4, kind: input, shape index: {}]   ;;  %s4320_s5 = inlined_call_operand.vmem [shape: f32[32,64], index: 5, kind: input, shape index: {}]   ;;  %s4321_s6 = inlined_call_operand.vmem [shape: bf16[576,64], index: 6, kind: input, shape index: {}]   ;;  %s4322_s7 = inlined_call_operand.vmem [shape: f32[1,64], index: 7, kind: input, shape index: {}]   ;;  %s4323_s8 = inlined_call_operand.vmem [shape: bf16[32,64], index: 8, kind: input, shape index: {}]   ;;  %s4324_s9 = inlined_call_operand.vmem [shape: f32[1,64], index: 9, kind: input, shape index: {}]   ;;  %s4325_s10 = inlined_call_operand.hbm [shape: f32[2,8,8,64], index: 10, kind: output, shape index: {}]  }
   0x1   :  { %17 = vsyncpa [#allocation5 + $0x1], 0  ;;  %s3312_s13 = smov 0   ;;  %s3314_s14 = smov 0  }
   0x2   :  { %s3316_s15 = smov 0   ;;  %s3318_s16 = smov 0  }
   0x3 LB: > { %s3333_s17 = sadd.s32 4294967295, %s3248_s16   ;;  %s2697_s18 = sadd.s32 4294967294, %s3248_s16   ;;  %s3248_s16 = sphi %s3318_s16, %s4339_s16   ;;  %s3244_s15 = sphi %s3316_s15, %s4338_s15   ;;  %s3240_s14 = sphi %s3314_s14, %s4337_s14   ;;  %s3236_s13 = sphi %s3312_s13, %s4336_s13  }
   0x4   : > { %s3337_s19 = sadd.s32 1, %s3248_s16   ;;  %s250_s20 = sadd.s32 1, %s3244_s15 }
   0x5   : > { %s247_s21 = ssub.s32 %s3248_s16, %s3337_s19  ;;  %p260_p0 = scmp.ne.s32.totalorder %s3244_s15, %s3240_s14 }
   0x6   : > { %p248_p1 = scmp.eq.s32.totalorder %s247_s21, 0  ;;  %p261_p2 = scmp.eq.s32.totalorder %s3333_s17, 1 }
   0x7   : > { %p266_p3 = scmp.ne.s32.totalorder %s3240_s14, %s3236_s13  ;;  %p267_p4 = scmp.eq.s32.totalorder %s2697_s18, 1 }
   0x8   : > { %s3348_s22 = scalar_select %p248_p1, %s3244_s15, %s250_s20  }
   0x9   : > { %p3350_p5 = por %p261_p2, %p260_p0  ;;  %p3354_p6 = por %p267_p4, %p266_p3 }
   0xa   : > { %p2700_p7 = scmp.ge.s32.totalorder %s3248_s16, 1  ;;  %p325_p8 = scmp.lt.s32.totalorder %s3248_s16, 3 }
   0xc   : > { %p326_p9 = pnand %p2700_p7, %p325_p8 }
   0xd   : > { %p368_p10 = scmp.lt.s32.totalorder (!%p326_p9), %s3333_s17, 1  ;;  %s3253_s21 = smov (!%p326_p9), 64  }
   0xe   : > { %329 = sbr.rel (%p326_p9) target bundleno = 1360 (0x550), region = 60  ;;  %s365_s26 = sand.u32 (!%p326_p9), 1, %s3240_s14  }
   0xf   : > { %s2701_s30 = sshll.u32 (!%p326_p9), %s365_s26, 6  ;;  %s3254_s28 = smov (!%p326_p9), [#allocation4]  }
  0x10   : > { %s4239_s12 = scalar_lea.vmem (!%p326_p9), [#allocation4], %s2701_s30  ;;  %s3192_s29 = sshll.u32 (!%p326_p9), %s3254_s28, 4  ;;  %s3193_s29 = int_to_ptr.vmem [resolvable:$false] %s3192_s29 }
  0x11   : > { %s3194_s30 = scalar_lea.vmem (!%p326_p9), %s3193_s29, 2048 }
  0x13   : > { %v3363_v0 = vld [vmem:[%s4319_s4 + $0x38] sm:$0xff]  ;;  %v3250_v1 = vmov 0.0   ;;  %v3370_v2 = vld [vmem:[%s4319_s4 + $0x30] sm:$0xff]  ;;  %vm3251_vm0 = vmmov 0   ;;  %v3378_v3 = vld [vmem:[%s4319_s4 + $0x28] sm:$0xff]  ;;  %s3381_s11 = scalar_select %p368_p10, %s3333_s17, 1  ;;  %v572_v45 = vlaneseq }
  0x14   : > { %2958 = vmatprep.subr.mxu0 %v3250_v1  ;;  %2974 = vmatprep.mubr.msk.f32.mxu0 %vm3251_vm0, %v3250_v1  ;;  %v400_v4 = vld [vmem:[%s4320_s5 + $0x18] sm:$0xff]  ;;  %v3391_v5 = vld [vmem:[%s4319_s4 + $0x20] sm:$0xff]  ;;  %v399_v6 = vld [vmem:[%s4320_s5 + $0x10] sm:$0xff]  ;;  %vm401_vm1 = vcmask 523264   ;;  %vm498_vm2 = vcmask 261120   ;;  %vm858_vm3 = vcmask 519168  }
  0x15   : > { %2959 = vmatpush3.msra.mxu0 %v3363_v0  ;;  %2977 = vmatprep.subr.mxu1 %v3250_v1  ;;  %s2825_s27 = sshll.u32 %s3381_s11, 6  ;;  %v3403_v7 = vld [vmem:[%s4319_s4 + $0x18] sm:$0xff]  ;;  %v391_v17 = vld [vmem:[%s4319_s4 + $0x10] sm:$0xff]  ;;  %v390_v24 = vld [vmem:[%s4319_s4 + $0x8] sm:$0xff]  ;;  %v3492_v46 = vshrl.u32 %v572_v45, 7  ;;  %vm860_vm4 = vcmask 516096  }
  0x16   : > { %2960 = vmatprep.subr.mxu0 %v3250_v1  ;;  %2978 = vmatpush3.msra.mxu1 %v400_v4  ;;  %s372_s18 = scalar_lea.vmem %s4315_s0, %s2825_s27  ;;  %v389_v28 = vld [vmem:[%s4319_s4] sm:$0xff]  ;;  %v398_v40 = vld [vmem:[%s4320_s5 + $0x8] sm:$0xff]  ;;  %vm1079_vm5 = vsmask.f32 3328  ;;  %vm1080_vm6 = vsmask.f32 7440  ;;  %s377_s25 = scalar_lea.vmem %s4316_s1, %s2825_s27 }
  0x17   : > { %2961 = vmatpush3.msra.mxu0 %v3370_v2  ;;  %2979 = vmatprep.subr.mxu1 %v3250_v1  ;;  %v3411_v8 = vld [vmem:[%s372_s18] sm:$0xff]  ;;  %v3413_v9 = vld [vmem:[%s372_s18 + $0x8] sm:$0xff]  ;;  %v3415_v10 = vld [vmem:[%s372_s18 + $0x10] sm:$0xff]  ;;  %v574_v47 = vsub.s32 0, %v3492_v46  ;;  %vm1259_vm8 = vcmask 1042432   ;;  %vm1260_vm9 = vcmask 1046532  }
  0x18   : > { %2962 = vmatprep.subr.mxu0 %v3250_v1  ;;  %2980 = vmatpush3.msra.mxu1 %v399_v6  ;;  %v3419_v11 = vld [vmem:[%s372_s18 + $0x18] sm:$0xff]  ;;  %v3421_v12 = vld [vmem:[%s372_s18 + $0x20] sm:$0xff]  ;;  %v3423_v13 = vld [vmem:[%s372_s18 + $0x28] sm:$0xff]  ;;  %v402_v14 = vsel %vm401_vm1, %v3411_v8, 0.0  ;;  %v403_v15 = vsel %vm401_vm1, %v3413_v9, 0.0  ;;  %v405_v16 = vsel %vm401_vm1, %v3415_v10, 0.0 }
  0x19   : > { %2963 = vmatpush3.msra.mxu0 %v3378_v3  ;;  %2981 = vmatprep.subr.mxu1 %v3250_v1  ;;  %v3437_v18 = vld [vmem:[%s372_s18 + $0x30] sm:$0xff]  ;;  %v3439_v19 = vld [vmem:[%s372_s18 + $0x38] sm:$0xff]  ;;  %v404_v20 = vadd.f32 %v403_v15, %v402_v14  ;;  %v407_v21 = vsel %vm401_vm1, %v3419_v11, 0.0  ;;  %v409_v22 = vsel %vm401_vm1, %v3421_v12, 0.0  ;;  %v411_v23 = vsel %vm401_vm1, %v3423_v13, 0.0  ;;  %v397_v41 = vld [vmem:[%s4320_s5] sm:$0xff] }
  0x1a   : > { %2964 = vmatprep.subr.mxu0 %v3250_v1  ;;  %2985 = vmatprep.mubr.msk.f32.mxu1 %vm3251_vm0, %v3250_v1  ;;  %v413_v25 = vsel %vm401_vm1, %v3437_v18, 0.0  ;;  %v415_v26 = vsel %vm401_vm1, %v3439_v19, 0.0  ;;  %vm3567_vm7 = vmor %vm1079_vm5, %vm1080_vm6  ;;  %v2710_v45 = vld [vmem:[%s4317_s2] ss:$0 sm:$0xff]  ;;  %vm994_vm11 = vsmask.f32 7938 }
  0x1b   : > { %2965 = vmatpush3.msra.mxu0 %v3391_v5  ;;  %v406_v27 = vadd.f32 %v405_v16, %v404_v20  ;;  %2982 = vmatpush3.msra.mxu1 %v398_v40  ;;  %vm3613_vm10 = vmor %vm1259_vm8, %vm1260_vm9  ;;  %vm1000_vm12 = vsmask.f32 256  ;;  %vm1218_vm13 = vcmask 1043968   ;;  %s2623_s18 = sshll.u32 %s4239_s12, 4  ;;  %s4267_s18 = int_to_ptr.vmem [resolvable:$true] %s2623_s18 }
  0x1c   : > { %2966 = vmatprep.subr.mxu0 %v3250_v1  ;;  %2983 = vmatprep.subr.mxu1 %v3250_v1  ;;  %vm3664_vm14 = vmand %vm858_vm3, %vm994_vm11  ;;  %s3188_s27 = scalar_lea.vmem %s4267_s18, 1024  ;;  %p3195_p0 = scmp.lt.s32.totalorder %s4267_s18, %s3193_s29 }
  0x1d   : > { %2967 = vmatpush3.msra.mxu0 %v3403_v7  ;;  %v408_v29 = vadd.f32 %v407_v21, %v406_v27  ;;  %2984 = vmatpush3.msra.mxu1 %v397_v41  ;;  %vm3678_vm15 = vmand %vm860_vm4, %vm1000_vm12  ;;  %p3189_p11 = scmp.ne.s32.totalorder %s4267_s18, %s3188_s27  ;;  %p3196_p1 = scmp.lt.s32.totalorder %s3194_s30, %s3188_s27 }
  0x1e   : > { %2968 = vmatprep.subr.mxu0 %v3250_v1  ;;  %2988 = vmatprep.subr.mxu1 %v3250_v1 }
  0x1f   : > { %2969 = vmatpush3.msra.mxu0 %v391_v17  ;;  %v410_v30 = vadd.f32 %v409_v22, %v408_v29  ;;  %v3252_v29 = vmov 0   ;;  %p3190_p12 = pnand %p3189_p11, %p3350_p5  ;;  %p3197_p2 = por %p3196_p1, %p3195_p0 }
  0x20   : > { %2970 = vmatprep.subr.mxu0 %v3250_v1  ;;  %859 = vst.msk [vmem:[#allocation2] sm:$0xf] %vm858_vm3, %v3252_v29  ;;  %862 = vst.msk [vmem:[#allocation2 + $0x8] sm:$0xf] %vm858_vm3, %v3252_v29 }
  0x21   : > { %2971 = vmatpush3.msra.mxu0 %v390_v24  ;;  %v412_v31 = vadd.f32 %v411_v23, %v410_v30  ;;  %864 = vst.msk [vmem:[#allocation2 + $0x10] sm:$0xf] %vm858_vm3, %v3252_v29  ;;  %866 = vst.msk [vmem:[#allocation2 + $0x18] sm:$0xf] %vm858_vm3, %v3252_v29  ;;  %p3191_p13 = pneg %p3190_p12 }
  0x22   : > { %2972 = vmatprep.subr.mxu0 %v3250_v1  ;;  %868 = vst.msk [vmem:[#allocation2 + $0x20] sm:$0xf] %vm858_vm3, %v3252_v29  ;;  %870 = vst.msk [vmem:[#allocation2 + $0x28] sm:$0xf] %vm858_vm3, %v3252_v29 }
  0x23   : > { %2973 = vmatpush3.msra.mxu0 %v389_v28  ;;  %v414_v32 = vadd.f32 %v413_v25, %v412_v31  ;;  %872 = vst.msk [vmem:[#allocation2 + $0x30] sm:$0xf] %vm858_vm3, %v3252_v29  ;;  %874 = vst.msk [vmem:[#allocation2 + $0x38] sm:$0xf] %vm858_vm3, %v3252_v29  ;;  %p3198_p3 = pnand %p3197_p2, %p3191_p13 }
  0x24   : > { %3007 = vmatprep.subr.mxu0 %v3250_v1  ;;  %876 = vst.msk [vmem:[#allocation2 + $0x40] sm:$0xf] %vm858_vm3, %v3252_v29  ;;  %878 = vst.msk [vmem:[#allocation2 + $0x48] sm:$0xf] %vm858_vm3, %v3252_v29 }
  0x25   : > { %v416_v33 = vadd.f32 %v415_v26, %v414_v32  ;;  %861 = vst.msk [vmem:[#allocation2 + $0x4] sm:$0x1] %vm860_vm4, %v3252_v29  ;;  %863 = vst.msk [vmem:[#allocation2 + $0xc] sm:$0x1] %vm860_vm4, %v3252_v29 }
  0x26   : > { %865 = vst.msk [vmem:[#allocation2 + $0x14] sm:$0x1] %vm860_vm4, %v3252_v29  ;;  %867 = vst.msk [vmem:[#allocation2 + $0x1c] sm:$0x1] %vm860_vm4, %v3252_v29 }
  0x27   : > { %v417_v34 = vrot.slane %v416_v33, 4  ;;  %869 = vst.msk [vmem:[#allocation2 + $0x24] sm:$0x1] %vm860_vm4, %v3252_v29  ;;  %871 = vst.msk [vmem:[#allocation2 + $0x2c] sm:$0x1] %vm860_vm4, %v3252_v29 }
  0x28   : > { %873 = vst.msk [vmem:[#allocation2 + $0x34] sm:$0x1] %vm860_vm4, %v3252_v29  ;;  %875 = vst.msk [vmem:[#allocation2 + $0x3c] sm:$0x1] %vm860_vm4, %v3252_v29  ;;  %v1063_v30 = vld [vmem:[#allocation2] sm:$0xf] }
  0x29   : > { %v418_v35 = vadd.f32 %v417_v34, %v416_v33  ;;  %877 = vst.msk [vmem:[#allocation2 + $0x44] sm:$0x1] %vm860_vm4, %v3252_v29  ;;  %879 = vst.msk [vmem:[#allocation2 + $0x4c] sm:$0x1] %vm860_vm4, %v3252_v29  ;;  %v1083_v31 = vshrl.u32 %v1063_v30, 16  ;;  %v1086_v32 = vshll.u32 %v1063_v30, 16 }
  0x2b   : > { %v419_v36 = vrot.slane %v418_v35, 2  ;;  %v1085_v33 = vrot.slane %v1083_v31, 4  ;;  %v1088_v34 = vrot.slane %v1086_v32, 5 }
  0x2d   : > { %v420_v37 = vadd.f32 %v419_v36, %v418_v35  ;;  %v1064_v35 = vld [vmem:[#allocation2 + $0x4] sm:$0x1]  ;;  %v1089_v36 = vor.u32 %v1088_v34, %v1085_v33 }
  0x2f   : > { %v421_v38 = vrot.slane %v420_v37, 1 }
  0x31   : > { %v422_v39 = vadd.f32 %v421_v38, %v420_v37  ;;  %v1092_v37 = vshll.u32 %v1064_v35, 16 }
  0x33   : > { %2975 = vmatmul.mubr.msk.f32.vlgmr.msra.gmra.mxu0 %vm401_vm1, %v422_v39  ;;  %v1090_v39 = vrot.slane %v1089_v36, 4 }
  0x34   : > { %3008 = vmatpush3.msra.mxu0 %v400_v4  ;;  %3015 = vmatprep.mubr.msk.f32.mxu0 %vm3251_vm0, %v3250_v1 }
  0x35   : > { %3009 = vmatprep.subr.mxu0 %v3250_v1 }
  0x36   : > { %3010 = vmatpush3.msra.mxu0 %v399_v6 }
  0x37   : > { %3011 = vmatprep.subr.mxu0 %v3250_v1 }
  0x38   : > { %3012 = vmatpush3.msra.mxu0 %v398_v40  ;;  %v1094_v40 = vrot.slane %v1092_v37, 5 }
  0x39   : > { %3013 = vmatprep.subr.mxu0 %v3250_v1 }
  0x3a   : > { %3014 = vmatpush3.msra.mxu0 %v397_v41  ;;  %v1095_v41 = vsel %vm3567_vm7, %v1090_v39, %v1094_v40  ;;  %v1629_v39 = vld [vmem:[#allocation2 + $0x48] sm:$0xf] }
  0x3b   : > { %1194 = vrot.lane.b32.xlu0 %v1095_v41, %s3253_s21  ;;  %v1730_v40 = vshrl.u32 %v1629_v39, 16  ;;  %v1733_v41 = vshll.u32 %v1629_v39, 16 }
  0xf3   : > { %v492_v42 = vpop.f32.mrf.mxu0 }
  0xf4   : > { %v497_v43 = vmul.f32 0.0078125, %v492_v42  ;;  %v1047_v42 = vld [vmem:[#allocation2] sm:$0xf] }
  0xf5   : > { %v2976_v44 = vpop.f32.mrf.mxu0  ;;  %1055 = vst.msk [vmem:[#allocation3] sm:$0xf] %vm858_vm3, %v1047_v42 }
  0xf6   : > { %2986 = vmatmul.mubr.msk.f32.vlgmr.msra.gmra.mxu1 %vm498_vm2, %v497_v43 }
  0xf7   : > { %2989 = vmatpush3.msra.mxu1 %v3363_v0  ;;  %3004 = vmatprep.mubr.msk.f32.mxu1 %vm3251_vm0, %v3250_v1 }
  0xf8   : > { %2990 = vmatprep.subr.mxu1 %v3250_v1 }
  0xf9   : > { %2991 = vmatpush3.msra.mxu1 %v3370_v2 }
  0xfa   : > { %2992 = vmatprep.subr.mxu1 %v3250_v1 }
  0xfb   : > { %2993 = vmatpush3.msra.mxu1 %v3378_v3 }
  0xfc   : > { %2994 = vmatprep.subr.mxu1 %v3250_v1 }
  0xfd   : > { %2995 = vmatpush3.msra.mxu1 %v3391_v5 }
  0xfe   : > { %2996 = vmatprep.subr.mxu1 %v3250_v1 }
  0xff   : > { %2997 = vmatpush3.msra.mxu1 %v3403_v7 }
 0x100   : > { %2998 = vmatprep.subr.mxu1 %v3250_v1 }
 0x101   : > { %2999 = vmatpush3.msra.mxu1 %v391_v17 }
 0x102   : > { %3000 = vmatprep.subr.mxu1 %v3250_v1 }
 0x103   : > { %3001 = vmatpush3.msra.mxu1 %v390_v24 }
 0x104   : > { %3002 = vmatprep.subr.mxu1 %v3250_v1 }
 0x105   : > { %3003 = vmatpush3.msra.mxu1 %v389_v28 }
 0x1b6   : > { %v568_v48 = vpop.f32.mrf.mxu1 }
 0x1b7   : > { %v575_v49 = vrot.slane %v568_v48, %v574_v47 }
 0x1b8   : > { %v2987_v50 = vpop.f32.mrf.mxu1 }
 0x1b9   : > { %v3498_v51 = vsub.f32 %v3411_v8, %v575_v49  ;;  %v3501_v52 = vsub.f32 %v3413_v9, %v575_v49  ;;  %v3504_v53 = vsub.f32 %v3415_v10, %v575_v49  ;;  %v3507_v54 = vsub.f32 %v3419_v11, %v575_v49 }
 0x1ba   : > { %v3510_v55 = vsub.f32 %v3421_v12, %v575_v49  ;;  %v3519_v59 = vsub.f32 %v3423_v13, %v575_v49  ;;  %v3526_v0 = vsub.f32 %v3437_v18, %v575_v49  ;;  %v3532_v4 = vsub.f32 %v3439_v19, %v575_v49 }
 0x1bb   : > { %v584_v56 = vmul.f32 %v3498_v51, %v3498_v51  ;;  %v585_v57 = vmul.f32 %v3501_v52, %v3501_v52  ;;  %v586_v58 = vmul.f32 %v3504_v53, %v3504_v53  ;;  %v587_v60 = vmul.f32 %v3507_v54, %v3507_v54 }
 0x1bc   : > { %v588_v1 = vmul.f32 %v3510_v55, %v3510_v55  ;;  %v589_v5 = vmul.f32 %v3519_v59, %v3519_v59  ;;  %v590_v8 = vmul.f32 %v3526_v0, %v3526_v0  ;;  %v591_v11 = vmul.f32 %v3532_v4, %v3532_v4 }
 0x1bd   : > { %v592_v61 = vsel %vm401_vm1, %v584_v56, 0.0  ;;  %v593_v62 = vsel %vm401_vm1, %v585_v57, 0.0  ;;  %v595_v2 = vsel %vm401_vm1, %v586_v58, 0.0  ;;  %v597_v6 = vsel %vm401_vm1, %v587_v60, 0.0  ;;  %v2711_v58 = vld [vmem:[%s4318_s3] ss:$0 sm:$0xff] }
 0x1be   : > { %v594_v63 = vadd.f32 %v593_v62, %v592_v61  ;;  %v599_v9 = vsel %vm401_vm1, %v588_v1, 0.0  ;;  %v601_v12 = vsel %vm401_vm1, %v589_v5, 0.0  ;;  %v603_v14 = vsel %vm401_vm1, %v590_v8, 0.0 }
 0x1bf   : > { %v605_v16 = vsel %vm401_vm1, %v591_v11, 0.0 }
 0x1c0   : > { %v596_v3 = vadd.f32 %v595_v2, %v594_v63 }
 0x1c2   : > { %v598_v7 = vadd.f32 %v597_v6, %v596_v3 }
 0x1c4   : > { %v600_v10 = vadd.f32 %v599_v9, %v598_v7 }
 0x1c6   : > { %v602_v13 = vadd.f32 %v601_v12, %v600_v10 }
 0x1c8   : > { %v604_v15 = vadd.f32 %v603_v14, %v602_v13  ;;  %v1789_v13 = vld [vmem:[#allocation2 + $0x48] sm:$0xe] }
 0x1ca   : > { %v606_v17 = vadd.f32 %v605_v16, %v604_v15  ;;  %v1790_v16 = vld [vmem:[#allocation2 + $0x4c] sm:$0x1] }
 0x1cc   : > { %v607_v18 = vrot.slane %v606_v17, 4 }
 0x1ce   : > { %v608_v19 = vadd.f32 %v607_v18, %v606_v17  ;;  %v2751_v17 = vrot.slane %v1789_v13, 9 }
 0x1d0   : > { %v609_v20 = vrot.slane %v608_v19, 2 }
 0x1d2   : > { %v610_v21 = vadd.f32 %v609_v20, %v608_v19  ;;  %v1837_v19 = vrot.slane %v1790_v16, 5 }
 0x1d4   : > { %v611_v22 = vrot.slane %v610_v21, 1 }
 0x1d6   : > { %v612_v23 = vadd.f32 %v611_v22, %v610_v21  ;;  %v1838_v21 = vsel %vm3613_vm10, %v2751_v17, %v1837_v19 }
 0x1d7   : > { %1854 = vst.msk [vmem:[#allocation3 + $0x9c] sm:$0xf] %vm858_vm3, %v1838_v21 }
 0x1d8   : > { %3005 = vmatmul.mubr.msk.f32.vlgmr.msra.gmra.mxu1 %vm401_vm1, %v612_v23 }
 0x298   : > { %v682_v24 = vpop.f32.mrf.mxu1 }
 0x299   : > { %v686_v25 = vmul.f32 0.0078125, %v682_v24 }
 0x29a   : > { %v3006_v26 = vpop.f32.mrf.mxu1 }
 0x29b   : > { %v687_v27 = vadd.f32 1e-05, %v686_v25 }
 0x29d   : > { %3154 = vrsqrt.f32 %v687_v27 }
 0x2aa   : > { %v3155_v28 = vpop.eup %3154 }
 0x2ab   : > { %3016 = vmatmul.mubr.msk.f32.vlgmr.msra.gmra.mxu0 %vm498_vm2, %v3155_v28 }
 0x36b   : > { %v758_v43 = vpop.f32.mrf.mxu0 }
 0x36c   : > { %v765_v44 = vrot.slane %v758_v43, %v574_v47  ;;  %v3622_v43 = vld [vmem:[#allocation2 + $0x4c] sm:$0x1] }
 0x36d   : > { %v3017_v48 = vpop.f32.mrf.mxu0 }
 0x36e   : > { %v766_v49 = vmul.f32 %v765_v44, %v3498_v51  ;;  %v767_v50 = vmul.f32 %v765_v44, %v3501_v52  ;;  %v768_v56 = vmul.f32 %v765_v44, %v3504_v53  ;;  %v769_v57 = vmul.f32 %v765_v44, %v3507_v54 }
 0x36f   : > { %v770_v46 = vmul.f32 %v765_v44, %v3510_v55  ;;  %v771_v47 = vmul.f32 %v765_v44, %v3519_v59  ;;  %v772_v60 = vmul.f32 %v765_v44, %v3526_v0  ;;  %v773_v61 = vmul.f32 %v765_v44, %v3532_v4 }
 0x370   : > { %v780_v62 = vmul.f32 %v2710_v45, %v766_v49  ;;  %v781_v51 = vmul.f32 %v2710_v45, %v767_v50  ;;  %v782_v63 = vmul.f32 %v2710_v45, %v768_v56  ;;  %v783_v52 = vmul.f32 %v2710_v45, %v769_v57 }
 0x371   : > { %v784_v1 = vmul.f32 %v2710_v45, %v770_v46  ;;  %v785_v53 = vmul.f32 %v2710_v45, %v771_v47  ;;  %v786_v2 = vmul.f32 %v2710_v45, %v772_v60  ;;  %v787_v54 = vmul.f32 %v2710_v45, %v773_v61 }
 0x372   : > { %v3591_v3 = vadd.f32 %v2711_v58, %v780_v62  ;;  %v3593_v5 = vadd.f32 %v2711_v58, %v781_v51  ;;  %v3595_v6 = vadd.f32 %v2711_v58, %v782_v63  ;;  %v3597_v55 = vadd.f32 %v2711_v58, %v783_v52 }
 0x373   : > { %v3599_v59 = vadd.f32 %v2711_v58, %v784_v1  ;;  %v3601_v0 = vadd.f32 %v2711_v58, %v785_v53  ;;  %v3603_v4 = vadd.f32 %v2711_v58, %v786_v2  ;;  %v3608_v10 = vadd.f32 %v2711_v58, %v787_v54 }
 0x374   : > { %v2712_v7 = vmul.f32 -1.442695, %v3591_v3  ;;  %v2713_v8 = vmul.f32 -1.442695, %v3593_v5  ;;  %v2714_v9 = vmul.f32 -1.442695, %v3595_v6 }
 0x375   : > { %v2715_v11 = vmul.f32 -1.442695, %v3597_v55  ;;  %v2716_v12 = vmul.f32 -1.442695, %v3599_v59  ;;  %v2717_v14 = vmul.f32 -1.442695, %v3601_v0 }
 0x376   : > { %3156 = vpow2.f32 %v2712_v7  ;;  %v2718_v18 = vmul.f32 -1.442695, %v3603_v4  ;;  %v2719_v20 = vmul.f32 -1.442695, %v3608_v10  ;;  %v3624_v44 = vrot.slane %v1730_v40, 4 }
 0x377   : > { %3158 = vpow2.f32 %v2713_v8  ;;  %v3626_v45 = vrot.slane %v1733_v41, 5  ;;  %v1739_v47 = vshll.u32 %v3622_v43, 16  ;;  %v996_v41 = vld [vmem:[#allocation2 + $0x8] sm:$0xf] }
 0x378   : > { %3160 = vpow2.f32 %v2714_v9 }
 0x379   : > { %3162 = vpow2.f32 %v2715_v11  ;;  %v1736_v51 = vor.u32 %v3626_v45, %v3624_v44 }
 0x37a   : > { %3164 = vpow2.f32 %v2716_v12 }
 0x37b   : > { %3166 = vpow2.f32 %v2717_v14 }
 0x37c   : > { %3168 = vpow2.f32 %v2718_v18 }
 0x37d   : > { %3170 = vpow2.f32 %v2719_v20 }
 0x383   : > { %v3157_v22 = vpop.eup %3156 }
 0x384   : > { %v3159_v23 = vpop.eup %3158  ;;  %v826_v24 = vadd.f32 1.0, %v3157_v22 }
 0x385   : > { %v3161_v25 = vpop.eup %3160  ;;  %v827_v26 = vadd.f32 1.0, %v3159_v23  ;;  %v1195_v23 = vpop.permute.xlu0 %1194 }
 0x386   : > { %v3163_v27 = vpop.eup %3162  ;;  %v828_v28 = vadd.f32 1.0, %v3161_v25  ;;  %3172 = vrcp.f32 %v826_v24  ;;  %1219 = vst.msk [vmem:[#allocation3] sm:$0xf] %vm1218_vm13, %v1195_v23 }
 0x387   : > { %v3165_v29 = vpop.eup %3164  ;;  %v829_v30 = vadd.f32 1.0, %v3163_v27  ;;  %3174 = vrcp.f32 %v827_v26  ;;  %v1011_v27 = vld [vmem:[#allocation2 + $0x18] sm:$0xf] }
 0x388   : > { %v3167_v31 = vpop.eup %3166  ;;  %v830_v32 = vadd.f32 1.0, %v3165_v29  ;;  %3176 = vrcp.f32 %v828_v28 }
 0x389   : > { %v3169_v33 = vpop.eup %3168  ;;  %v831_v34 = vadd.f32 1.0, %v3167_v31  ;;  %3178 = vrcp.f32 %v829_v30 }
 0x38a   : > { %v3171_v35 = vpop.eup %3170  ;;  %v832_v36 = vadd.f32 1.0, %v3169_v33  ;;  %3180 = vrcp.f32 %v830_v32  ;;  %v1023_v33 = vld [vmem:[#allocation2 + $0x28] sm:$0xf] }
 0x38b   : > { %v833_v37 = vadd.f32 1.0, %v3171_v35  ;;  %3182 = vrcp.f32 %v831_v34  ;;  %v1005_v34 = vld [vmem:[#allocation2 + $0x10] sm:$0xf]  ;;  %v1017_v35 = vld [vmem:[#allocation2 + $0x20] sm:$0xf] }
 0x38c   : > { %3184 = vrcp.f32 %v832_v36 }
 0x38d   : > { %3186 = vrcp.f32 %v833_v37 }
 0x393   : > { %v3173_v42 = vpop.eup %3172 }
 0x394   : > { %v3175_v48 = vpop.eup %3174  ;;  %v850_v49 = vmul.f32 %v3173_v42, %v3591_v3  ;;  %v1002_v42 = vld [vmem:[#allocation2 + $0xc] sm:$0x1] }
 0x395   : > { %v3177_v50 = vpop.eup %3176  ;;  %v851_v56 = vmul.f32 %v3175_v48, %v3593_v5 }
 0x396   : > { %v3179_v57 = vpop.eup %3178  ;;  %v852_v58 = vmul.f32 %v3177_v50, %v3595_v6  ;;  %v3631_v46 = vpack.c.bf16 %v850_v49, %v850_v49 }
 0x397   : > { %v3181_v60 = vpop.eup %3180  ;;  %v853_v61 = vmul.f32 %v3179_v57, %v3597_v55  ;;  %v2828_v62 = vpack.c.bf16 %v851_v56, %v851_v56  ;;  %v1035_v57 = vld [vmem:[#allocation2 + $0x38] sm:$0xf] }
 0x398   : > { %v3183_v63 = vpop.eup %3182  ;;  %v854_v52 = vmul.f32 %v3181_v60, %v3599_v59  ;;  %v2829_v1 = vpack.c.bf16 %v852_v58, %v852_v58  ;;  %v913_v53 = vshrl.u32 %v3631_v46, 16  ;;  %v916_v2 = vshll.u32 %v3631_v46, 16  ;;  %v1014_v58 = vld [vmem:[#allocation2 + $0x1c] sm:$0x1] }
 0x399   : > { %v3185_v54 = vpop.eup %3184  ;;  %v855_v3 = vmul.f32 %v3183_v63, %v3601_v0  ;;  %v2830_v5 = vpack.c.bf16 %v853_v61, %v853_v61  ;;  %v921_v6 = vshrl.u32 %v2828_v62, 16  ;;  %v924_v55 = vshll.u32 %v2828_v62, 16 }
 0x39a   : > { %v3187_v7 = vpop.eup %3186  ;;  %v856_v8 = vmul.f32 %v3185_v54, %v3603_v4  ;;  %v2831_v9 = vpack.c.bf16 %v854_v52, %v854_v52  ;;  %v929_v11 = vshrl.u32 %v2829_v1, 16  ;;  %v932_v12 = vshll.u32 %v2829_v1, 16  ;;  %v1029_v52 = vld [vmem:[#allocation2 + $0x30] sm:$0xf]  ;;  %v1026_v1 = vld [vmem:[#allocation2 + $0x2c] sm:$0x1] }
 0x39b   : > { %v857_v13 = vmul.f32 %v3187_v7, %v3608_v10  ;;  %v3643_v59 = vpack.c.bf16 %v855_v3, %v855_v3  ;;  %v3645_v14 = vrot.slane %v921_v6, 7  ;;  %v937_v16 = vshrl.u32 %v2830_v5, 16  ;;  %v1041_v7 = vld [vmem:[#allocation2 + $0x40] sm:$0xf] }
 0x39c   : > { %v2833_v17 = vpack.c.bf16 %v856_v8, %v856_v8  ;;  %v3647_v18 = vrot.slane %v929_v11, 7  ;;  %v940_v0 = vshll.u32 %v2830_v5, 16  ;;  %v945_v19 = vshrl.u32 %v2831_v9, 16  ;;  %v1038_v8 = vld [vmem:[#allocation2 + $0x3c] sm:$0x1] }
 0x39d   : > { %v3649_v20 = vpack.c.bf16 %v857_v13, %v857_v13  ;;  %v927_v21 = vrot.slane %v3645_v14, 4  ;;  %v3652_v4 = vrot.slane %v937_v16, 7  ;;  %v948_v22 = vshll.u32 %v2831_v9, 16  ;;  %v1020_v13 = vld [vmem:[#allocation2 + $0x24] sm:$0x1] }
 0x39e   : > { %v935_v10 = vrot.slane %v3647_v18, 4  ;;  %v3655_v24 = vrot.slane %v945_v19, 7  ;;  %v953_v25 = vshrl.u32 %v3643_v59, 16  ;;  %v956_v26 = vshll.u32 %v3643_v59, 16  ;;  %v1032_v59 = vld [vmem:[#allocation2 + $0x34] sm:$0x1] }
 0x39f   : > { %v943_v28 = vrot.slane %v3652_v4, 4  ;;  %v961_v29 = vshrl.u32 %v2833_v17, 16  ;;  %v964_v30 = vshll.u32 %v2833_v17, 16  ;;  %v969_v31 = vshrl.u32 %v3649_v20, 16  ;;  %v1044_v16 = vld [vmem:[#allocation2 + $0x44] sm:$0x1] }
 0x3a0   : > { %v951_v36 = vrot.slane %v3655_v24, 4  ;;  %v955_v37 = vrot.slane %v953_v25, 7  ;;  %v972_v39 = vshll.u32 %v3649_v20, 16  ;;  %v934_v40 = vor.u32 %v932_v12, %v3647_v18  ;;  %v1227_v19 = vld [vmem:[#allocation2] sm:$0xe] }
 0x3a1   : > { %v963_v48 = vrot.slane %v961_v29, 7  ;;  %v971_v49 = vrot.slane %v969_v31, 7  ;;  %v915_v50 = vrot.slane %v913_v53, 7  ;;  %v950_v56 = vor.u32 %v948_v22, %v3655_v24  ;;  %v1008_v53 = vld [vmem:[#allocation2 + $0x14] sm:$0x1]  ;;  %v3091_v22 = vld [vmem:[%s4321_s6 + $0x78] sm:$0xff]  }
 0x3a2   : > { %v959_v46 = vrot.slane %v955_v37, 4  ;;  %v1012_v60 = vsel %vm3664_vm14, %v934_v40, %v1011_v27  ;;  %v926_v61 = vor.u32 %v924_v55, %v3645_v14  ;;  %v942_v62 = vor.u32 %v940_v0, %v3652_v4  ;;  %v1228_v20 = vld [vmem:[#allocation2 + $0x4] sm:$0x1]  ;;  %2864 = vmatprep.subr.bf16.mxu0 %v3091_v22  ;;  %v3092_v4 = vld [vmem:[%s4321_s6 + $0x38] sm:$0xff]  }
 0x3a3   : > { %v967_v54 = vrot.slane %v963_v48, 4  ;;  %v975_v3 = vrot.slane %v971_v49, 4  ;;  %1013 = vst [vmem:[#allocation2 + $0x18] sm:$0xf] %v1012_v60  ;;  %v918_v5 = vor.u32 %v916_v2, %v915_v50  ;;  %v919_v6 = vrot.slane %v915_v50, 4  ;;  %2865 = vmatpush3.bf16.msra.mxu0 %v3092_v4 }
 0x3a4   : > { %v1024_v55 = vsel %vm3664_vm14, %v950_v56, %v1023_v33  ;;  %v1006_v9 = vsel %vm3664_vm14, %v926_v61, %v1005_v34  ;;  %v966_v11 = vor.u32 %v964_v30, %v963_v48  ;;  %v1018_v12 = vsel %vm3664_vm14, %v942_v62, %v1017_v35 }
 0x3a5   : > { %v997_v17 = vsel %vm3664_vm14, %v918_v5, %v996_v41  ;;  %1025 = vst [vmem:[#allocation2 + $0x28] sm:$0xf] %v1024_v55  ;;  %1007 = vst [vmem:[#allocation2 + $0x10] sm:$0xf] %v1006_v9  ;;  %v1003_v2 = vsel %vm3678_vm15, %v919_v6, %v1002_v42  ;;  %v958_v18 = vor.u32 %v956_v26, %v955_v37  ;;  %v2728_v31 = vrot.slane %v1227_v19, 9 }
 0x3a6   : > { %1019 = vst [vmem:[#allocation2 + $0x20] sm:$0xf] %v1018_v12  ;;  %v1015_v0 = vsel %vm3678_vm15, %v935_v10, %v1014_v58  ;;  %998 = vst [vmem:[#allocation2 + $0x8] sm:$0xf] %v997_v17  ;;  %v1036_v23 = vsel %vm3664_vm14, %v966_v11, %v1035_v57  ;;  %v974_v24 = vor.u32 %v972_v39, %v971_v49  ;;  %v1264_v33 = vrot.slane %v1228_v20, 5 }
 0x3a7   : > { %1004 = vst [vmem:[#allocation2 + $0xc] sm:$0x1] %v1003_v2  ;;  %1016 = vst [vmem:[#allocation2 + $0x1c] sm:$0x1] %v1015_v0  ;;  %v1027_v25 = vsel %vm3678_vm15, %v951_v36, %v1026_v1  ;;  %v1009_v10 = vsel %vm3678_vm15, %v927_v21, %v1008_v53  ;;  %v1030_v26 = vsel %vm3664_vm14, %v958_v18, %v1029_v52  ;;  %v3732_v41 = vrot.slane %v1736_v51, 4 }
 0x3a8   : > { %1037 = vst [vmem:[#allocation2 + $0x38] sm:$0xf] %v1036_v23  ;;  %1028 = vst [vmem:[#allocation2 + $0x2c] sm:$0x1] %v1027_v25  ;;  %v1039_v27 = vsel %vm3678_vm15, %v967_v54, %v1038_v8  ;;  %v1021_v29 = vsel %vm3678_vm15, %v943_v28, %v1020_v13  ;;  %v1033_v14 = vsel %vm3678_vm15, %v959_v46, %v1032_v59  ;;  %v3093_v28 = vld [vmem:[%s4321_s6 + $0x70] sm:$0xff]   ;;  %v3736_v42 = vrot.slane %v1739_v47, 5 }
 0x3a9   : > { %1010 = vst [vmem:[#allocation2 + $0x14] sm:$0x1] %v1009_v10  ;;  %1031 = vst [vmem:[#allocation2 + $0x30] sm:$0xf] %v1030_v26  ;;  %v1042_v21 = vsel %vm3664_vm14, %v974_v24, %v1041_v7  ;;  %v1045_v30 = vsel %vm3678_vm15, %v975_v3, %v1044_v16  ;;  %v1265_v36 = vsel %vm3613_vm10, %v2728_v31, %v1264_v33  ;;  %2866 = vmatprep.subr.bf16.mxu0 %v3093_v28 }
 0x3aa   : > { %1040 = vst [vmem:[#allocation2 + $0x3c] sm:$0x1] %v1039_v27  ;;  %1022 = vst [vmem:[#allocation2 + $0x24] sm:$0x1] %v1021_v29  ;;  %v1312_v32 = vld [vmem:[#allocation2 + $0x18] sm:$0xf]  ;;  %v1742_v0 = vsel %vm3567_vm7, %v3732_v41, %v3736_v42 }
 0x3ab   : > { %1034 = vst [vmem:[#allocation2 + $0x34] sm:$0x1] %v1033_v14  ;;  %1043 = vst [vmem:[#allocation2 + $0x40] sm:$0xf] %v1042_v21  ;;  %v1506_v34 = vld [vmem:[#allocation2 + $0x18] sm:$0xe]  ;;  %1330 = vrot.lane.b32.xlu0 %v1312_v32, %s3253_s21 }
 0x3ac   : > { %1046 = vst [vmem:[#allocation2 + $0x44] sm:$0x1] %v1045_v30  ;;  %v1617_v35 = vld [vmem:[#allocation2 + $0x18] sm:$0xf]  ;;  %1302 = vst.msk [vmem:[#allocation3 + $0x4] sm:$0xf] %vm858_vm3, %v1265_v36 }
 0x3ad   : > { %v1646_v37 = vshrl.u32 %v1617_v35, 16  ;;  %v2738_v39 = vrot.slane %v1506_v34, 9  ;;  %v1649_v40 = vshll.u32 %v1617_v35, 16  ;;  %v1310_v48 = vld [vmem:[#allocation2 + $0x8] sm:$0xf]  ;;  %v3094_v21 = vld [vmem:[%s4321_s6 + $0x30] sm:$0xff]  }
 0x3ae   : > { %v1502_v49 = vld [vmem:[#allocation2 + $0x8] sm:$0xe]  ;;  %v1503_v50 = vld [vmem:[#allocation2 + $0xc] sm:$0x1]  ;;  %1326 = vrot.lane.b32.xlu1 %v1310_v48, %s3253_s21  ;;  %v1507_v57 = vld [vmem:[#allocation2 + $0x1c] sm:$0x1]  ;;  %2867 = vmatpush3.bf16.msra.mxu0 %v3094_v21 }
 0x3af   : > { %v1314_v56 = vld [vmem:[#allocation2 + $0x28] sm:$0xf]  ;;  %v3739_v58 = vld [vmem:[#allocation2 + $0x18] sm:$0xf]  ;;  %v1311_v46 = vld [vmem:[#allocation2 + $0x10] sm:$0xf] }
 0x3b0   : > { %1334 = vrot.lane.b32.xlu0 %v1314_v56, %s3253_s21  ;;  %v2736_v44 = vrot.slane %v1502_v49, 9  ;;  %v1510_v45 = vld [vmem:[#allocation2 + $0x28] sm:$0xe]  ;;  %v1648_v51 = vrot.slane %v1646_v37, 4  ;;  %v1316_v60 = vld [vmem:[#allocation2 + $0x38] sm:$0xf] }
 0x3b1   : > { %v1536_v43 = vrot.slane %v1503_v50, 5  ;;  %v1544_v47 = vrot.slane %v1507_v57, 5  ;;  %v1511_v61 = vld [vmem:[#allocation2 + $0x2c] sm:$0x1]  ;;  %v2740_v62 = vrot.slane %v1510_v45, 9  ;;  %v1651_v63 = vrot.slane %v1649_v40, 5 }
 0x3b2   : > { %v1552_v52 = vrot.slane %v1511_v61, 5  ;;  %v1504_v1 = vld [vmem:[#allocation2 + $0x10] sm:$0xe]  ;;  %v1505_v53 = vld [vmem:[#allocation2 + $0x14] sm:$0x1]  ;;  %v1125_v54 = vshrl.u32 %v3739_v58, 16  ;;  %1328 = vrot.lane.b32.xlu1 %v1311_v46, %s3253_s21 }
 0x3b3   : > { %v2737_v3 = vrot.slane %v1504_v1, 9  ;;  %v1540_v5 = vrot.slane %v1505_v53, 5  ;;  %v1514_v6 = vld [vmem:[#allocation2 + $0x38] sm:$0xe]  ;;  %v1515_v7 = vld [vmem:[#allocation2 + $0x3c] sm:$0x1]  ;;  %v1652_v13 = vor.u32 %v1651_v63, %v1648_v51  ;;  %v1537_v59 = vsel %vm3613_vm10, %v2736_v44, %v1536_v43 }
 0x3b4   : > { %1338 = vrot.lane.b32.xlu0 %v1316_v60, %s3253_s21  ;;  %v1313_v8 = vld [vmem:[#allocation2 + $0x20] sm:$0xf]  ;;  %v2742_v55 = vrot.slane %v1514_v6, 9  ;;  %v1560_v9 = vrot.slane %v1515_v7, 5  ;;  %v1509_v12 = vld [vmem:[#allocation2 + $0x24] sm:$0x1]  ;;  %v1545_v19 = vsel %vm3613_vm10, %v2738_v39, %v1544_v47  ;;  %v1553_v20 = vsel %vm3613_vm10, %v2740_v62, %v1552_v52 }
 0x3b5   : > { %v1508_v11 = vld [vmem:[#allocation2 + $0x20] sm:$0xe]  ;;  %v1548_v17 = vrot.slane %v1509_v12, 5  ;;  %v1512_v2 = vld [vmem:[#allocation2 + $0x30] sm:$0xe]  ;;  %v3758_v10 = vsel %vm3613_vm10, %v2737_v3, %v1540_v5  ;;  %v3772_v34 = vrot.slane %v1652_v13, 4 }
 0x3b6   : > { %v2739_v16 = vrot.slane %v1508_v11, 9  ;;  %v1513_v18 = vld [vmem:[#allocation2 + $0x34] sm:$0x1]  ;;  %v2741_v22 = vrot.slane %v1512_v2, 9  ;;  %v1065_v24 = vld [vmem:[#allocation2 + $0x8] sm:$0xf]  ;;  %1332 = vrot.lane.b32.xlu1 %v1313_v8, %s3253_s21  ;;  %v3766_v31 = vsel %vm3613_vm10, %v2742_v55, %v1560_v9 }
 0x3b7   : > { %v1556_v23 = vrot.slane %v1513_v18, 5  ;;  %v1066_v25 = vld [vmem:[#allocation2 + $0xc] sm:$0x1]  ;;  %v1097_v26 = vshrl.u32 %v1065_v24, 16  ;;  %v1100_v27 = vshll.u32 %v1065_v24, 16  ;;  %v1127_v57 = vrot.slane %v1125_v54, 4 }
 0x3b8   : > { %v1106_v29 = vshll.u32 %v1066_v25, 16  ;;  %v1516_v14 = vld [vmem:[#allocation2 + $0x40] sm:$0xe]  ;;  %1566 = vrot.lane.b32.xlu0 %v1537_v59, %s3253_s21  ;;  %v1315_v30 = vld [vmem:[#allocation2 + $0x30] sm:$0xf]  ;;  %v3770_v33 = vsel %vm3613_vm10, %v2739_v16, %v1548_v17  ;;  %v1128_v43 = vshll.u32 %v3739_v58, 16 }
 0x3b9   : > { %v1517_v4 = vld [vmem:[#allocation2 + $0x44] sm:$0x1]  ;;  %v2743_v28 = vrot.slane %v1516_v14, 9  ;;  %v1615_v32 = vld [vmem:[#allocation2 + $0x10] sm:$0xf]  ;;  %v1099_v35 = vrot.slane %v1097_v26, 4  ;;  %v3779_v46 = vsel %vm3613_vm10, %v2741_v22, %v1556_v23 }
 0x3ba   : > { %v1102_v36 = vrot.slane %v1100_v27, 5  ;;  %v3774_v37 = vrot.slane %v1106_v29, 5  ;;  %v1564_v39 = vrot.slane %v1517_v4, 5  ;;  %v1616_v40 = vld [vmem:[#allocation2 + $0x14] sm:$0x1]  ;;  %v1632_v48 = vshrl.u32 %v1615_v32, 16  ;;  %1336 = vrot.lane.b32.xlu1 %v1315_v30, %s3253_s21 }
 0x3bb   : > { %v1635_v49 = vshll.u32 %v1615_v32, 16  ;;  %v1641_v50 = vshll.u32 %v1616_v40, 16  ;;  %v1618_v56 = vld [vmem:[#allocation2 + $0x1c] sm:$0x1]  ;;  %v1067_v51 = vld [vmem:[#allocation2 + $0x10] sm:$0xf] }
 0x3bc   : > { %v1103_v44 = vor.u32 %v1102_v36, %v1099_v35  ;;  %v1655_v45 = vshll.u32 %v1618_v56, 16  ;;  %v1068_v60 = vld [vmem:[#allocation2 + $0x14] sm:$0x1]  ;;  %1570 = vrot.lane.b32.xlu0 %v1545_v19, %s3253_s21  ;;  %v1317_v47 = vld [vmem:[#allocation2 + $0x40] sm:$0xf]  ;;  %v3785_v61 = vsel %vm3613_vm10, %v2743_v28, %v1564_v39  ;;  %v1634_v62 = vrot.slane %v1632_v48, 4 }
 0x3bd   : > { %v1637_v63 = vrot.slane %v1635_v49, 5  ;;  %v1111_v52 = vshrl.u32 %v1067_v51, 16  ;;  %v1070_v1 = vld [vmem:[#allocation2 + $0x1c] sm:$0x1]  ;;  %v3789_v54 = vrot.slane %v1641_v50, 5  ;;  %v1114_v3 = vshll.u32 %v1067_v51, 16 }
 0x3be   : > { %v3787_v53 = vrot.slane %v1103_v44, 4  ;;  %v1120_v5 = vshll.u32 %v1068_v60, 16  ;;  %v1619_v6 = vld [vmem:[#allocation2 + $0x20] sm:$0xf]  ;;  %v1130_v8 = vrot.slane %v1128_v43, 5  ;;  %v1134_v55 = vshll.u32 %v1070_v1, 16  ;;  %1340 = vrot.lane.b32.xlu1 %v1317_v47, %s3253_s21 }
 0x3bf   : > { %v1638_v7 = vor.u32 %v1637_v63, %v1634_v62  ;;  %v1113_v58 = vrot.slane %v1111_v52, 4  ;;  %v1620_v9 = vld [vmem:[#allocation2 + $0x24] sm:$0x1]  ;;  %v3095_v11 = vld [vmem:[%s4321_s6 + $0xf8] sm:$0xff]   ;;  %v3799_v13 = vrot.slane %v1655_v45, 5  ;;  %v1116_v59 = vrot.slane %v1114_v3, 5 }
 0x3c0   : > { %v1109_v12 = vsel %vm3567_vm7, %v3787_v53, %v3774_v37  ;;  %v3801_v16 = vrot.slane %v1120_v5, 5  ;;  %v1621_v17 = vld [vmem:[#allocation2 + $0x28] sm:$0xf]  ;;  %1574 = vrot.lane.b32.xlu0 %v1553_v20, %s3253_s21  ;;  %v1131_v18 = vor.u32 %v1130_v8, %v1127_v57  ;;  %v3806_v19 = vrot.slane %v1134_v55, 5  ;;  %v1622_v23 = vld [vmem:[#allocation2 + $0x2c] sm:$0x1]  ;;  %2904 = vmatprep.subr.bf16.mxu1 %v3095_v11 }
 0x3c1   : > { %v3804_v2 = vrot.slane %v1638_v7, 4  ;;  %v1660_v22 = vshrl.u32 %v1619_v6, 16  ;;  %v3096_v24 = vld [vmem:[%s4321_s6 + $0x68] sm:$0xff]   ;;  %v1117_v25 = vor.u32 %v1116_v59, %v1113_v58  ;;  %v1663_v26 = vshll.u32 %v1619_v6, 16  ;;  %v1071_v14 = vld [vmem:[#allocation2 + $0x20] sm:$0xf] }
 0x3c2   : > { %v1669_v27 = vshll.u32 %v1620_v9, 16  ;;  %v1674_v29 = vshrl.u32 %v1621_v17, 16  ;;  %v3097_v20 = vld [vmem:[%s4321_s6 + $0xb8] sm:$0xff]   ;;  %v1658_v21 = vsel %vm3567_vm7, %v3772_v34, %v3799_v13  ;;  %v3818_v30 = vrot.slane %v1131_v18, 4  ;;  %v1072_v32 = vld [vmem:[#allocation2 + $0x24] sm:$0x1]  ;;  %2868 = vmatprep.subr.bf16.mxu0 %v3096_v24  ;;  %1568 = vrot.lane.b32.xlu1 %v3758_v10, %s3253_s21 }
 0x3c3   : > { %v1662_v4 = vrot.slane %v1660_v22, 4  ;;  %v1677_v28 = vshll.u32 %v1621_v17, 16  ;;  %v3098_v35 = vld [vmem:[%s4321_s6 + $0x28] sm:$0xff]   ;;  %v1644_v36 = vsel %vm3567_vm7, %v3804_v2, %v3789_v54  ;;  %v3829_v37 = vrot.slane %v1117_v25, 4  ;;  %2905 = vmatpush3.bf16.msra.mxu1 %v3097_v20  ;;  %v3099_v10 = vld [vmem:[%s4321_s6 + $0xf0] sm:$0xff]   ;;  %v3100_v53 = vld [vmem:[%s4321_s6 + $0x60] sm:$0xff]  }
 0x3c4   : > { %v1665_v39 = vrot.slane %v1663_v26, 5  ;;  %v1676_v40 = vrot.slane %v1674_v29, 4  ;;  %v1073_v48 = vld [vmem:[#allocation2 + $0x28] sm:$0xf]  ;;  %1578 = vrot.lane.b32.xlu0 %v3766_v31, %s3253_s21  ;;  %v3833_v49 = vrot.slane %v1669_v27, 5  ;;  %v1683_v56 = vshll.u32 %v1622_v23, 16  ;;  %2869 = vmatpush3.bf16.msra.mxu0 %v3098_v35 }
 0x3c5   : > { %v1679_v50 = vrot.slane %v1677_v28, 5  ;;  %v1139_v57 = vshrl.u32 %v1071_v14, 16  ;;  %v1137_v44 = vsel %vm3567_vm7, %v3818_v30, %v3806_v19  ;;  %v1142_v51 = vshll.u32 %v1071_v14, 16  ;;  %v1074_v43 = vld [vmem:[#allocation2 + $0x2c] sm:$0x1]  ;;  %2906 = vmatprep.subr.bf16.mxu1 %v3099_v10  ;;  %2870 = vmatprep.subr.bf16.mxu0 %v3100_v53  ;;  %v3101_v26 = vld [vmem:[%s4321_s6 + $0xb0] sm:$0xff]  }
 0x3c6   : > { %v1666_v45 = vor.u32 %v1665_v39, %v1662_v4  ;;  %v1148_v60 = vshll.u32 %v1072_v32, 16  ;;  %v1623_v31 = vld [vmem:[#allocation2 + $0x30] sm:$0xf]  ;;  %v1123_v47 = vsel %vm3567_vm7, %v3829_v37, %v3801_v16  ;;  %v1153_v52 = vshrl.u32 %v1073_v48, 16  ;;  %v1624_v1 = vld [vmem:[#allocation2 + $0x34] sm:$0x1]  ;;  %1572 = vrot.lane.b32.xlu1 %v3770_v33, %s3253_s21 }
 0x3c7   : > { %v1680_v62 = vor.u32 %v1679_v50, %v1676_v40  ;;  %v1141_v63 = vrot.slane %v1139_v57, 4  ;;  %v3853_v3 = vrot.slane %v1683_v56, 5  ;;  %v1144_v5 = vrot.slane %v1142_v51, 5  ;;  %v1625_v7 = vld [vmem:[#allocation2 + $0x38] sm:$0xf]  ;;  %v3102_v28 = vld [vmem:[%s4321_s6 + $0x20] sm:$0xff]   ;;  %2907 = vmatpush3.bf16.msra.mxu1 %v3101_v26 }
 0x3c8   : > { %v3851_v54 = vrot.slane %v1666_v45, 4  ;;  %v1156_v6 = vshll.u32 %v1073_v48, 16  ;;  %1196 = vrot.lane.b32.xlu0 %v1109_v12, %s3253_s21  ;;  %v1155_v8 = vrot.slane %v1153_v52, 4  ;;  %v1162_v55 = vshll.u32 %v1074_v43, 16  ;;  %v1626_v11 = vld [vmem:[#allocation2 + $0x3c] sm:$0x1]  ;;  %2871 = vmatpush3.bf16.msra.mxu0 %v3102_v28 }
 0x3c9   : > { %v3856_v58 = vrot.slane %v1680_v62, 4  ;;  %v1688_v9 = vshrl.u32 %v1623_v31, 16  ;;  %v1145_v59 = vor.u32 %v1144_v5, %v1141_v63  ;;  %v3858_v17 = vrot.slane %v1148_v60, 5  ;;  %v1075_v18 = vld [vmem:[#allocation2 + $0x30] sm:$0xf]  ;;  %v3103_v5 = vld [vmem:[%s4321_s6 + $0xe8] sm:$0xff]  }
 0x3ca   : > { %v1158_v33 = vrot.slane %v1156_v6, 5  ;;  %v1691_v2 = vshll.u32 %v1623_v31, 16  ;;  %v1672_v22 = vsel %vm3567_vm7, %v3851_v54, %v3833_v49  ;;  %v1697_v24 = vshll.u32 %v1624_v1, 16  ;;  %v1076_v25 = vld [vmem:[#allocation2 + $0x34] sm:$0x1]  ;;  %1576 = vrot.lane.b32.xlu1 %v3779_v46, %s3253_s21  ;;  %2908 = vmatprep.subr.bf16.mxu1 %v3103_v5  ;;  %v4124_v42 = vld [vmem:[%s4323_s8 + $0x8] sm:$0xff]  }
 0x3cb   : > { %v1686_v12 = vsel %vm3567_vm7, %v3856_v58, %v3853_v3  ;;  %v1690_v23 = vrot.slane %v1688_v9, 4  ;;  %v3873_v27 = vrot.slane %v1145_v59, 4  ;;  %v1702_v20 = vshrl.u32 %v1625_v7, 16  ;;  %v1077_v4 = vld [vmem:[#allocation2 + $0x38] sm:$0xf]  ;;  %v3109_v3 = vld [vmem:[%s4321_s6 + $0xa0] sm:$0xff]  }
 0x3cc   : > { %v1159_v29 = vor.u32 %v1158_v33, %v1155_v8  ;;  %v1693_v14 = vrot.slane %v1691_v2, 5  ;;  %1743 = vrot.lane.b32.xlu0 %v1644_v36, %s3253_s21  ;;  %v3879_v32 = vrot.slane %v1162_v55, 5  ;;  %v1705_v35 = vshll.u32 %v1625_v7, 16  ;;  %v1078_v48 = vld [vmem:[#allocation2 + $0x3c] sm:$0x1] }
 0x3cd   : > { %v1711_v39 = vshll.u32 %v1626_v11, 16  ;;  %v1167_v40 = vshrl.u32 %v1075_v18, 16  ;;  %v3883_v56 = vrot.slane %v1697_v24, 5  ;;  %v1704_v57 = vrot.slane %v1702_v20, 4  ;;  %v1627_v10 = vld [vmem:[#allocation2 + $0x40] sm:$0xf] }
 0x3ce   : > { %v3881_v46 = vrot.slane %v1159_v29, 4  ;;  %v1694_v50 = vor.u32 %v1693_v14, %v1690_v23  ;;  %v1151_v36 = vsel %vm3567_vm7, %v3873_v27, %v3858_v17  ;;  %v1707_v45 = vrot.slane %v1705_v35, 5  ;;  %v1628_v43 = vld [vmem:[#allocation2 + $0x44] sm:$0x1]  ;;  %v1231_v31 = vld [vmem:[#allocation2 + $0x10] sm:$0xe]  ;;  %1580 = vrot.lane.b32.xlu1 %v3785_v61, %s3253_s21 }
 0x3cf   : > { %v1169_v51 = vrot.slane %v1167_v40, 4  ;;  %v1170_v60 = vshll.u32 %v1075_v18, 16  ;;  %v3893_v63 = vrot.slane %v1711_v39, 5  ;;  %v1176_v52 = vshll.u32 %v1076_v25, 16  ;;  %v1232_v53 = vld [vmem:[#allocation2 + $0x14] sm:$0x1] }
 0x3d0   : > { %v3891_v62 = vrot.slane %v1694_v50, 4  ;;  %v1181_v1 = vshrl.u32 %v1077_v4, 16  ;;  %1198 = vrot.lane.b32.xlu0 %v1123_v47, %s3253_s21  ;;  %v1708_v6 = vor.u32 %v1707_v45, %v1704_v57  ;;  %v1184_v7 = vshll.u32 %v1077_v4, 16  ;;  %v1235_v55 = vld [vmem:[#allocation2 + $0x20] sm:$0xe]  ;;  %v3104_v11 = vld [vmem:[%s4321_s6 + $0x58] sm:$0xff]  }
 0x3d1   : > { %v1172_v61 = vrot.slane %v1170_v60, 5  ;;  %v1190_v8 = vshll.u32 %v1078_v48, 16  ;;  %v1236_v9 = vld [vmem:[#allocation2 + $0x24] sm:$0x1]  ;;  %v1165_v59 = vsel %vm3567_vm7, %v3881_v46, %v3879_v32  ;;  %v3911_v33 = vrot.slane %v1176_v52, 5  ;;  %v3105_v47 = vld [vmem:[%s4321_s6 + $0xa8] sm:$0xff]   ;;  %2872 = vmatprep.subr.bf16.mxu0 %v3104_v11 }
 0x3d2   : > { %v1183_v2 = vrot.slane %v1181_v1, 4  ;;  %v1716_v16 = vshrl.u32 %v1627_v10, 16  ;;  %v1230_v37 = vld [vmem:[#allocation2 + $0xc] sm:$0x1]  ;;  %v3916_v18 = vrot.slane %v1708_v6, 4  ;;  %v1186_v24 = vrot.slane %v1184_v7, 5  ;;  %1745 = vrot.lane.b32.xlu1 %v1658_v21, %s3253_s21  ;;  %2909 = vmatpush3.bf16.msra.mxu1 %v3105_v47 }
 0x3d3   : > { %v1173_v23 = vor.u32 %v1172_v61, %v1169_v51  ;;  %v3918_v25 = vrot.slane %v1190_v8, 5  ;;  %v1229_v26 = vld [vmem:[#allocation2 + $0x8] sm:$0xe]  ;;  %v1239_v29 = vld [vmem:[#allocation2 + $0x30] sm:$0xe]  ;;  %v3106_v14 = vld [vmem:[%s4321_s6 + $0x18] sm:$0xff]   ;;  %v1700_v40 = vsel %vm3567_vm7, %v3891_v62, %v3883_v56 }
 0x3d4   : > { %v1718_v20 = vrot.slane %v1716_v16, 4  ;;  %v1719_v4 = vshll.u32 %v1627_v10, 16  ;;  %v1725_v28 = vshll.u32 %v1628_v43, 16  ;;  %v2730_v35 = vrot.slane %v1231_v31, 9  ;;  %v1240_v39 = vld [vmem:[#allocation2 + $0x34] sm:$0x1]  ;;  %1747 = vrot.lane.b32.xlu0 %v1672_v22, %s3253_s21  ;;  %2873 = vmatpush3.bf16.msra.mxu0 %v3106_v14 }
 0x3d5   : > { %v3939_v34 = vrot.slane %v1173_v23, 4  ;;  %v1187_v13 = vor.u32 %v1186_v24, %v1183_v2  ;;  %v1272_v21 = vrot.slane %v1232_v53, 5  ;;  %v1233_v48 = vld [vmem:[#allocation2 + $0x18] sm:$0xe]  ;;  %v1234_v50 = vld [vmem:[#allocation2 + $0x1c] sm:$0x1]  ;;  %v1714_v49 = vsel %vm3567_vm7, %v3916_v18, %v3893_v63 }
 0x3d6   : > { %v1721_v57 = vrot.slane %v1719_v4, 5  ;;  %v3941_v10 = vrot.slane %v1725_v28, 5  ;;  %v2732_v45 = vrot.slane %v1235_v55, 9  ;;  %v1280_v51 = vrot.slane %v1236_v9, 5  ;;  %v1359_v60 = vld [vmem:[#allocation2 + $0xc] sm:$0x1]  ;;  %1200 = vrot.lane.b32.xlu1 %v1137_v44, %s3253_s21 }
 0x3d7   : > { %v3947_v54 = vrot.slane %v1187_v13, 4  ;;  %v1273_v22 = vsel %vm3613_vm10, %v2730_v35, %v1272_v21  ;;  %v1268_v56 = vrot.slane %v1230_v37, 5  ;;  %v1358_v43 = vld [vmem:[#allocation2 + $0x8] sm:$0xf]  ;;  %v2729_v1 = vrot.slane %v1229_v26, 9  ;;  %v3107_v8 = vld [vmem:[%s4321_s6 + $0xe0] sm:$0xff]  }
 0x3d8   : > { %v1237_v31 = vld [vmem:[#allocation2 + $0x28] sm:$0xe]  ;;  %v1722_v62 = vor.u32 %v1721_v57, %v1718_v20  ;;  %1304 = vst.msk [vmem:[#allocation3 + $0x2c] sm:$0xf] %vm858_vm3, %v1273_v22  ;;  %v1281_v52 = vsel %vm3613_vm10, %v2732_v45, %v1280_v51  ;;  %v2734_v53 = vrot.slane %v1239_v29, 9  ;;  %1202 = vrot.lane.b32.xlu0 %v1151_v36, %s3253_s21  ;;  %v1179_v19 = vsel %vm3567_vm7, %v3939_v34, %v3911_v33  ;;  %v3108_v11 = vld [vmem:[%s4321_s6 + $0x50] sm:$0xff]  }
 0x3d9   : > { %v1238_v5 = vld [vmem:[#allocation2 + $0x2c] sm:$0x1]  ;;  %v1362_v6 = vld [vmem:[#allocation2 + $0x18] sm:$0xf]  ;;  %1306 = vst.msk [vmem:[#allocation3 + $0x54] sm:$0xf] %vm858_vm3, %v1281_v52  ;;  %v1269_v17 = vsel %vm3613_vm10, %v2729_v1, %v1268_v56  ;;  %2910 = vmatprep.subr.bf16.mxu1 %v3107_v8  ;;  %v1193_v24 = vsel %vm3567_vm7, %v3947_v54, %v3918_v25  ;;  %2874 = vmatprep.subr.bf16.mxu0 %v3108_v11 }
 0x3da   : > { %v1288_v30 = vrot.slane %v1240_v39, 5  ;;  %v2731_v44 = vrot.slane %v1233_v48, 9  ;;  %v1276_v61 = vrot.slane %v1234_v50, 5  ;;  %v3971_v7 = vld [vmem:[#allocation2 + $0x1c] sm:$0x1]  ;;  %v3976_v55 = vrot.slane %v1722_v62, 4  ;;  %1749 = vrot.lane.b32.xlu1 %v1686_v12, %s3253_s21  ;;  %2911 = vmatpush3.bf16.msra.mxu1 %v3109_v3 }
 0x3db   : > { %v1384_v27 = vshll.u32 %v1359_v60, 16  ;;  %v1375_v36 = vshrl.u32 %v1358_v43, 16  ;;  %v1241_v9 = vld [vmem:[#allocation2 + $0x38] sm:$0xe]  ;;  %1303 = vst.msk [vmem:[#allocation3 + $0x18] sm:$0xf] %vm858_vm3, %v1269_v17 }
 0x3dc   : > { %v1289_v33 = vsel %vm3613_vm10, %v2734_v53, %v1288_v30  ;;  %v1277_v2 = vsel %vm3613_vm10, %v2731_v44, %v1276_v61  ;;  %v1378_v16 = vshll.u32 %v1358_v43, 16  ;;  %v2733_v37 = vrot.slane %v1237_v31, 9  ;;  %v1242_v47 = vld [vmem:[#allocation2 + $0x3c] sm:$0x1]  ;;  %v1366_v23 = vld [vmem:[#allocation2 + $0x28] sm:$0xf]  ;;  %1751 = vrot.lane.b32.xlu0 %v1700_v40, %s3253_s21 }
 0x3dd   : > { %v1728_v26 = vsel %vm3567_vm7, %v3976_v55, %v3941_v10  ;;  %1308 = vst.msk [vmem:[#allocation3 + $0x7c] sm:$0xf] %vm858_vm3, %v1289_v33  ;;  %1305 = vst.msk [vmem:[#allocation3 + $0x40] sm:$0xf] %vm858_vm3, %v1277_v2  ;;  %v1377_v29 = vrot.slane %v1375_v36, 4  ;;  %v1284_v14 = vrot.slane %v1238_v5, 5 }
 0x3de   : > { %v1367_v20 = vld [vmem:[#allocation2 + $0x2c] sm:$0x1]  ;;  %v1380_v58 = vrot.slane %v1378_v16, 5  ;;  %v1403_v12 = vshrl.u32 %v1362_v6, 16  ;;  %v1406_v4 = vshll.u32 %v1362_v6, 16  ;;  %v1412_v28 = vshll.u32 %v3971_v7, 16  ;;  %1204 = vrot.lane.b32.xlu1 %v1165_v59, %s3253_s21 }
 0x3df   : > { %v1360_v35 = vld [vmem:[#allocation2 + $0x10] sm:$0xf]  ;;  %v1285_v39 = vsel %vm3613_vm10, %v2733_v37, %v1284_v14  ;;  %v2735_v34 = vrot.slane %v1241_v9, 9  ;;  %v1292_v13 = vrot.slane %v1242_v47, 5  ;;  %v1431_v21 = vshrl.u32 %v1366_v23, 16  ;;  %v3111_v22 = vld [vmem:[%s4321_s6 + $0xd8] sm:$0xff]  }
 0x3e0   : > { %v4011_v48 = vld [vmem:[#allocation2 + $0x14] sm:$0x1]  ;;  %v1386_v40 = vrot.slane %v1384_v27, 5  ;;  %v1381_v57 = vor.u32 %v1380_v58, %v1377_v29  ;;  %1307 = vst.msk [vmem:[#allocation3 + $0x68] sm:$0xf] %vm858_vm3, %v1285_v39  ;;  %v1405_v45 = vrot.slane %v1403_v12, 4  ;;  %1206 = vrot.lane.b32.xlu0 %v1179_v19, %s3253_s21  ;;  %2912 = vmatprep.subr.bf16.mxu1 %v3111_v22 }
 0x3e1   : > { %v3110_v50 = vld [vmem:[%s4321_s6 + $0x10] sm:$0xff]   ;;  %v1408_v51 = vrot.slane %v1406_v4, 5  ;;  %v1370_v60 = vld [vmem:[#allocation2 + $0x38] sm:$0xf]  ;;  %v1293_v56 = vsel %vm3613_vm10, %v2735_v34, %v1292_v13  ;;  %v1433_v43 = vrot.slane %v1431_v21, 4  ;;  %v1434_v31 = vshll.u32 %v1366_v23, 16 }
 0x3e2   : > { %v1440_v62 = vshll.u32 %v1367_v20, 16  ;;  %v1371_v52 = vld [vmem:[#allocation2 + $0x3c] sm:$0x1]  ;;  %2875 = vmatpush3.bf16.msra.mxu0 %v3110_v50  ;;  %v3112_v1 = vld [vmem:[%s4321_s6 + $0x48] sm:$0xff]   ;;  %v1382_v53 = vrot.slane %v1381_v57, 4  ;;  %v1389_v32 = vshrl.u32 %v1360_v35, 16  ;;  %1753 = vrot.lane.b32.xlu1 %v1714_v49, %s3253_s21 }
 0x3e3   : > { %v1409_v5 = vor.u32 %v1408_v51, %v1405_v45  ;;  %1309 = vst.msk [vmem:[#allocation3 + $0x90] sm:$0xf] %vm858_vm3, %v1293_v56  ;;  %v1392_v46 = vshll.u32 %v1360_v35, 16  ;;  %v1364_v59 = vld [vmem:[#allocation2 + $0x20] sm:$0xf]  ;;  %v3113_v6 = vld [vmem:[%s4321_s6 + $0x98] sm:$0xff]   ;;  %2876 = vmatprep.subr.bf16.mxu0 %v3112_v1 }
 0x3e4   : > { %v1414_v30 = vrot.slane %v1412_v28, 5  ;;  %v1436_v44 = vrot.slane %v1434_v31, 5  ;;  %v1398_v61 = vshll.u32 %v4011_v48, 16  ;;  %v1459_v7 = vshrl.u32 %v1370_v60, 16  ;;  %v1365_v8 = vld [vmem:[#allocation2 + $0x24] sm:$0x1]  ;;  %2913 = vmatpush3.bf16.msra.mxu1 %v3113_v6  ;;  %1755 = vrot.lane.b32.xlu0 %v1728_v26, %s3253_s21 }
 0x3e5   : > { %v1387_v19 = vsel %vm3567_vm7, %v1382_v53, %v1386_v40  ;;  %v1410_v17 = vrot.slane %v1409_v5, 4  ;;  %v1391_v27 = vrot.slane %v1389_v32, 4  ;;  %v1394_v36 = vrot.slane %v1392_v46, 5  ;;  %v1368_v9 = vld [vmem:[#allocation2 + $0x30] sm:$0xf]  ;;  %v3114_v11 = vld [vmem:[%s4321_s6 + $0x8] sm:$0xff]  }
 0x3e6   : > { %1494 = vst.msk [vmem:[#allocation3 + $0x8] sm:$0xf] %vm858_vm3, %v1387_v19  ;;  %v1437_v33 = vor.u32 %v1436_v44, %v1433_v43  ;;  %v1442_v2 = vrot.slane %v1440_v62, 5  ;;  %v1461_v16 = vrot.slane %v1459_v7, 4  ;;  %v1462_v37 = vshll.u32 %v1370_v60, 16  ;;  %v3115_v23 = vld [vmem:[%s4321_s6 + $0xd0] sm:$0xff]   ;;  %2877 = vmatpush3.bf16.msra.mxu0 %v3114_v11  ;;  %1208 = vrot.lane.b32.xlu1 %v1193_v24, %s3253_s21 }
 0x3e7   : > { %v1048_v47 = vld [vmem:[#allocation2 + $0x8] sm:$0xf]  ;;  %v1415_v63 = vsel %vm3567_vm7, %v1410_v17, %v1414_v30  ;;  %v1395_v18 = vor.u32 %v1394_v36, %v1391_v27  ;;  %v1468_v49 = vshll.u32 %v1371_v52, 16  ;;  %v1417_v29 = vshrl.u32 %v1364_v59, 16  ;;  %v1372_v14 = vld [vmem:[#allocation2 + $0x40] sm:$0xf]  ;;  %2914 = vmatprep.subr.bf16.mxu1 %v3115_v23 }
 0x3e8   : > { %1056 = vst.msk [vmem:[#allocation3 + $0x14] sm:$0xf] %vm858_vm3, %v1048_v47  ;;  %1496 = vst.msk [vmem:[#allocation3 + $0x30] sm:$0xf] %vm858_vm3, %v1415_v63  ;;  %v1438_v20 = vrot.slane %v1437_v33, 4  ;;  %v1464_v3 = vrot.slane %v1462_v37, 5 }
 0x3e9   : > { %v1420_v58 = vshll.u32 %v1364_v59, 16  ;;  %v1426_v12 = vshll.u32 %v1365_v8, 16  ;;  %v4062_v4 = vld [vmem:[#allocation2 + $0x34] sm:$0x1]  ;;  %v4064_v10 = vld [vmem:[#allocation2 + $0x44] sm:$0x1] }
 0x3ea   : > { %v1599_v55 = vld [vmem:[#allocation2 + $0x10] sm:$0xf]  ;;  %v1396_v26 = vrot.slane %v1395_v18, 4  ;;  %v1400_v28 = vrot.slane %v1398_v61, 5  ;;  %v1419_v35 = vrot.slane %v1417_v29, 4  ;;  %v1445_v39 = vshrl.u32 %v1368_v9, 16  ;;  %1757 = vrot.lane.b32.xlu1 %v1742_v0, %s3253_s21 }
 0x3eb   : > { %1607 = vst.msk [vmem:[#allocation3 + $0xc] sm:$0xf] %vm858_vm3, %v1599_v55  ;;  %v3116_v34 = vld [vmem:[%s4321_s6 + $0x40] sm:$0xff]   ;;  %v3117_v13 = vld [vmem:[%s4321_s6 + $0x90] sm:$0xff]   ;;  %v1443_v21 = vsel %vm3567_vm7, %v1438_v20, %v1442_v2  ;;  %v1465_v48 = vor.u32 %v1464_v3, %v1461_v16  ;;  %v1470_v50 = vrot.slane %v1468_v49, 5  ;;  %v1422_v40 = vrot.slane %v1420_v58, 5 }
 0x3ec   : > { %v1600_v57 = vld [vmem:[#allocation2 + $0x18] sm:$0xf]  ;;  %v1049_v45 = vld [vmem:[#allocation2 + $0x10] sm:$0xf]  ;;  %1498 = vst.msk [vmem:[#allocation3 + $0x58] sm:$0xf] %vm858_vm3, %v1443_v21  ;;  %v1401_v51 = vsel %vm3567_vm7, %v1396_v26, %v1400_v28  ;;  %2878 = vmatprep.subr.bf16.mxu0 %v3116_v34  ;;  %2915 = vmatpush3.bf16.msra.mxu1 %v3117_v13 }
 0x3ed   : > { %v1428_v60 = vrot.slane %v1426_v12, 5  ;;  %v1447_v22 = vrot.slane %v1445_v39, 4  ;;  %v1448_v56 = vshll.u32 %v1368_v9, 16  ;;  %1608 = vst.msk [vmem:[#allocation3 + $0x20] sm:$0xf] %vm858_vm3, %v1600_v57  ;;  %v3118_v25 = vld [vmem:[%s4321_s6] sm:$0xff]   ;;  %v1423_v31 = vor.u32 %v1422_v40, %v1419_v35 }
 0x3ee   : > { %1057 = vst.msk [vmem:[#allocation3 + $0x28] sm:$0xf] %vm858_vm3, %v1049_v45  ;;  %v3122_v54 = vld [vmem:[%s4321_s6 + $0xc8] sm:$0xff]   ;;  %1495 = vst.msk [vmem:[#allocation3 + $0x1c] sm:$0xf] %vm858_vm3, %v1401_v51  ;;  %v1466_v43 = vrot.slane %v1465_v48, 4  ;;  %2879 = vmatpush3.bf16.msra.mxu0 %v3118_v25 }
 0x3ef   : > { %v3123_v24 = vld [vmem:[%s4321_s6 + $0x88] sm:$0xff]   ;;  %v1473_v62 = vshrl.u32 %v1372_v14, 16  ;;  %v1476_v52 = vshll.u32 %v1372_v14, 16  ;;  %v1050_v1 = vld [vmem:[#allocation2 + $0x18] sm:$0xf]  ;;  %v3124_v53 = vld [vmem:[%s4321_s6 + $0xc0] sm:$0xff]   ;;  %2916 = vmatprep.subr.bf16.mxu1 %v3122_v54 }
 0x3f0   : > { %v1450_v5 = vrot.slane %v1448_v56, 5  ;;  %v1454_v32 = vshll.u32 %v4062_v4, 16  ;;  %v1482_v46 = vshll.u32 %v4064_v10, 16  ;;  %1058 = vst.msk [vmem:[#allocation3 + $0x3c] sm:$0xf] %vm858_vm3, %v1050_v1  ;;  %v3125_v6 = vld [vmem:[%s4321_s6 + $0x80] sm:$0xff]   ;;  %v1471_v30 = vsel %vm3567_vm7, %v1466_v43, %v1470_v50  ;;  %2917 = vmatpush3.bf16.msra.mxu1 %v3123_v24 }
 0x3f1   : > { %v1601_v59 = vld [vmem:[#allocation2 + $0x20] sm:$0xf]  ;;  %v1424_v44 = vrot.slane %v1423_v31, 4  ;;  %v1475_v61 = vrot.slane %v1473_v62, 4  ;;  %v1478_v7 = vrot.slane %v1476_v52, 5  ;;  %v4117_v19 = vld [vmem:[%s4321_s6 + $0x118] sm:$0xff]   ;;  %2918 = vmatprep.subr.bf16.mxu1 %v3124_v53 }
 0x3f2   : > { %1609 = vst.msk [vmem:[#allocation3 + $0x34] sm:$0xf] %vm858_vm3, %v1601_v59  ;;  %v1602_v8 = vld [vmem:[#allocation2 + $0x28] sm:$0xf]  ;;  %1500 = vst.msk [vmem:[#allocation3 + $0x80] sm:$0xf] %vm858_vm3, %v1471_v30  ;;  %v1451_v17 = vor.u32 %v1450_v5, %v1447_v22  ;;  %3018 = vmatprep.subr.bf16.mxu0 %v4117_v19 }
 0x3f3   : > { %1610 = vst.msk [vmem:[#allocation3 + $0x48] sm:$0xf] %vm858_vm3, %v1602_v8  ;;  %v1051_v41 = vld [vmem:[#allocation2 + $0x20] sm:$0xf]  ;;  %v1052_v0 = vld [vmem:[#allocation2 + $0x28] sm:$0xf]  ;;  %v1429_v27 = vsel %vm3567_vm7, %v1424_v44, %v1428_v60  ;;  %v1479_v36 = vor.u32 %v1478_v7, %v1475_v61 }
 0x3f4   : > { %1059 = vst.msk [vmem:[#allocation3 + $0x50] sm:$0xf] %vm858_vm3, %v1051_v41  ;;  %1060 = vst.msk [vmem:[#allocation3 + $0x64] sm:$0xf] %vm858_vm3, %v1052_v0  ;;  %v1603_v9 = vld [vmem:[#allocation2 + $0x30] sm:$0xf]  ;;  %2919 = vmatpush3.bf16.msra.mxu1 %v3125_v6 }
 0x3f5   : > { %v1604_v11 = vld [vmem:[#allocation2 + $0x38] sm:$0xf]  ;;  %v1053_v33 = vld [vmem:[#allocation2 + $0x30] sm:$0xf]  ;;  %1497 = vst.msk [vmem:[#allocation3 + $0x44] sm:$0xf] %vm858_vm3, %v1429_v27  ;;  %3034 = vmatprep.subr.bf16.mxu1 %v4124_v42 }
 0x3f6   : > { %v1452_v2 = vrot.slane %v1451_v17, 4  ;;  %v1456_v16 = vrot.slane %v1454_v32, 5  ;;  %1611 = vst.msk [vmem:[#allocation3 + $0x5c] sm:$0xf] %vm858_vm3, %v1603_v9  ;;  %1612 = vst.msk [vmem:[#allocation3 + $0x70] sm:$0xf] %vm858_vm3, %v1604_v11 }
 0x3f7   : > { %1061 = vst.msk [vmem:[#allocation3 + $0x78] sm:$0xf] %vm858_vm3, %v1053_v33  ;;  %v1054_v37 = vld [vmem:[#allocation2 + $0x38] sm:$0xf]  ;;  %v1605_v47 = vld [vmem:[#allocation2 + $0x40] sm:$0xf] }
 0x3f8   : > { %v1480_v23 = vrot.slane %v1479_v36, 4  ;;  %v1484_v63 = vrot.slane %v1482_v46, 5  ;;  %1062 = vst.msk [vmem:[#allocation3 + $0x8c] sm:$0xf] %vm858_vm3, %v1054_v37  ;;  %1613 = vst.msk [vmem:[#allocation3 + $0x84] sm:$0xf] %vm858_vm3, %v1605_v47  ;;  %v1457_v49 = vsel %vm3567_vm7, %v1452_v2, %v1456_v16 }
 0x3f9   : > { %v1606_v18 = vld [vmem:[#allocation2 + $0x48] sm:$0xf]  ;;  %v1775_v29 = vld [vmem:[#allocation2 + $0x10] sm:$0xe]  ;;  %v1776_v14 = vld [vmem:[#allocation2 + $0x14] sm:$0x1] }
 0x3fa   : > { %1614 = vst.msk [vmem:[#allocation3 + $0x98] sm:$0xf] %vm858_vm3, %v1606_v18  ;;  %v1777_v20 = vld [vmem:[#allocation2 + $0x18] sm:$0xe]  ;;  %1499 = vst.msk [vmem:[#allocation3 + $0x6c] sm:$0xf] %vm858_vm3, %v1457_v49  ;;  %v1485_v3 = vsel %vm3567_vm7, %v1480_v23, %v1484_v63 }
 0x3fb   : > { %v1778_v58 = vld [vmem:[#allocation2 + $0x1c] sm:$0x1]  ;;  %v2744_v12 = vrot.slane %v1775_v29, 9  ;;  %v1809_v4 = vrot.slane %v1776_v14, 5  ;;  %v2745_v10 = vrot.slane %v1777_v20, 9  ;;  %v3135_v47 = vld [vmem:[%s4321_s6 + $0x110] sm:$0xff]  }
 0x3fc   : > { %1501 = vst.msk [vmem:[#allocation3 + $0x94] sm:$0xf] %vm858_vm3, %v1485_v3  ;;  %v1813_v55 = vrot.slane %v1778_v58, 5  ;;  %v1779_v26 = vld [vmem:[#allocation2 + $0x20] sm:$0xe]  ;;  %v3140_v18 = vld [vmem:[%s4321_s6 + $0x108] sm:$0xff]  }
 0x3fd   : > { %v1780_v28 = vld [vmem:[#allocation2 + $0x24] sm:$0x1]  ;;  %v1810_v35 = vsel %vm3613_vm10, %v2744_v12, %v1809_v4  ;;  %v1781_v39 = vld [vmem:[#allocation2 + $0x28] sm:$0xe]  ;;  %v1782_v34 = vld [vmem:[#allocation2 + $0x2c] sm:$0x1] }
 0x3fe   : > { %v2746_v13 = vrot.slane %v1779_v26, 9  ;;  %v1817_v21 = vrot.slane %v1780_v28, 5  ;;  %v1814_v38 = vsel %vm3613_vm10, %v2745_v10, %v1813_v55  ;;  %1847 = vst.msk [vmem:[#allocation3 + $0x10] sm:$0xf] %vm858_vm3, %v1810_v35  ;;  %v2747_v48 = vrot.slane %v1781_v39, 9  ;;  %v3149_v14 = vld [vmem:[%s4321_s6 + $0x100] sm:$0xff]  }
 0x3ff   : > { %v1821_v50 = vrot.slane %v1782_v34, 5  ;;  %v1783_v40 = vld [vmem:[#allocation2 + $0x30] sm:$0xe]  ;;  %v1784_v57 = vld [vmem:[#allocation2 + $0x34] sm:$0x1]  ;;  %v3141_v12 = vld [vmem:[%s4323_s8] sm:$0xff]  }
 0x400   : > { %1848 = vst.msk [vmem:[#allocation3 + $0x24] sm:$0xf] %vm858_vm3, %v1814_v38  ;;  %v1818_v45 = vsel %vm3613_vm10, %v2746_v13, %v1817_v21  ;;  %v1785_v51 = vld [vmem:[#allocation2 + $0x38] sm:$0xe]  ;;  %v1786_v60 = vld [vmem:[#allocation2 + $0x3c] sm:$0x1] }
 0x401   : > { %v2748_v22 = vrot.slane %v1783_v40, 9  ;;  %v1825_v56 = vrot.slane %v1784_v57, 5  ;;  %v1822_v25 = vsel %vm3613_vm10, %v2747_v48, %v1821_v50  ;;  %1849 = vst.msk [vmem:[#allocation3 + $0x38] sm:$0xf] %vm858_vm3, %v1818_v45  ;;  %v2749_v54 = vrot.slane %v1785_v51, 9  ;;  %s2835_s21 = sshll.u32 %s3333_s17, 10 }
 0x402   : > { %v1829_v24 = vrot.slane %v1786_v60, 5  ;;  %1850 = vst.msk [vmem:[#allocation3 + $0x4c] sm:$0xf] %vm858_vm3, %v1822_v25  ;;  %v1787_v31 = vld [vmem:[#allocation2 + $0x40] sm:$0xe]  ;;  %s4265_s11 = scalar_lea.hbm %s4325_s10, %s2835_s21  ;;  %s4275_s17 = scalar_lea.sflag [#allocation5], %s365_s26 }
 0x403   : > { %v1826_v43 = vsel %vm3613_vm10, %v2748_v22, %v1825_v56  ;;  %v1788_v62 = vld [vmem:[#allocation2 + $0x44] sm:$0x1]  ;;  %v2750_v1 = vrot.slane %v1787_v31, 9 }
 0x404   : > { %v1830_v52 = vsel %vm3613_vm10, %v2749_v54, %v1829_v24  ;;  %1851 = vst.msk [vmem:[#allocation3 + $0x60] sm:$0xf] %vm858_vm3, %v1826_v43  ;;  %v1833_v53 = vrot.slane %v1788_v62, 5  ;;  %v2481_v54 = vld [vmem:[%s377_s25] sm:$0xff]  ;;  %v2482_v24 = vld [vmem:[%s377_s25 + $0x8] sm:$0xff] }
 0x405   : > { %1852 = vst.msk [vmem:[#allocation3 + $0x74] sm:$0xf] %vm858_vm3, %v1830_v52  ;;  %v2489_v52 = vpack.c.bf16 %v2482_v24, %v2481_v54 }
 0x406   : > { %v1834_v5 = vsel %vm3613_vm10, %v2750_v1, %v1833_v53  ;;  %v2483_v1 = vld [vmem:[%s377_s25 + $0x10] sm:$0xff]  ;;  %v2484_v53 = vld [vmem:[%s377_s25 + $0x18] sm:$0xff] }
 0x407   : > { %1853 = vst.msk [vmem:[#allocation3 + $0x88] sm:$0xf] %vm858_vm3, %v1834_v5  ;;  %v3146_v43 = vld [vmem:[#allocation3 + $0x10] ss:$20 sps:$4 sm:$0xff]  }
 0x409   : > { %v3151_v5 = vld [vmem:[#allocation3 + $0x38] ss:$20 sps:$4 sm:$0xff]  }
 0x41d   : > { %v1331_v32 = vpop.permute.xlu0 %1330 }
 0x41e   : > { %1352 = vst.msk [vmem:[#allocation3 + $0x2c] sm:$0xf] %vm1218_vm13, %v1331_v32  ;;  %v2485_v32 = vld [vmem:[%s377_s25 + $0x20] sm:$0xff] }
 0x420   : > { %v1327_v46 = vpop.permute.xlu1 %1326 }
 0x421   : > { %1350 = vst.msk [vmem:[#allocation3 + $0x4] sm:$0xf] %vm1218_vm13, %v1327_v46  ;;  %v2486_v46 = vld [vmem:[%s377_s25 + $0x28] sm:$0xff] }
 0x422   : > { %v1335_v59 = vpop.permute.xlu0 %1334 }
 0x423   : > { %1354 = vst.msk [vmem:[#allocation3 + $0x54] sm:$0xf] %vm1218_vm13, %v1335_v59  ;;  %v3152_v59 = vld [vmem:[#allocation3 + $0x60] ss:$20 sps:$4 sm:$0xff]  }
 0x424   : > { %v1329_v6 = vpop.permute.xlu1 %1328 }
 0x425   : > { %1351 = vst.msk [vmem:[#allocation3 + $0x18] sm:$0xf] %vm1218_vm13, %v1329_v6  ;;  %v2490_v6 = vpack.c.bf16 %v2484_v53, %v2483_v1 }
 0x426   : > { %v1339_v30 = vpop.permute.xlu0 %1338 }
 0x427   : > { %1356 = vst.msk [vmem:[#allocation3 + $0x7c] sm:$0xf] %vm1218_vm13, %v1339_v30  ;;  %v2491_v30 = vpack.c.bf16 %v2486_v46, %v2485_v32 }
 0x428   : > { %v1333_v44 = vpop.permute.xlu1 %1332 }
 0x429   : > { %1353 = vst.msk [vmem:[#allocation3 + $0x40] sm:$0xf] %vm1218_vm13, %v1333_v44  ;;  %v2487_v44 = vld [vmem:[%s377_s25 + $0x30] sm:$0xff] }
 0x42a   : > { %v1567_v15 = vpop.permute.xlu0 %1566 }
 0x42b   : > { %1590 = vst.msk [vmem:[#allocation3 + $0x8] sm:$0xf] %vm1218_vm13, %v1567_v15  ;;  %v2488_v15 = vld [vmem:[%s377_s25 + $0x38] sm:$0xff] }
 0x42c   : > { %v1337_v61 = vpop.permute.xlu1 %1336  ;;  %v3121_v37 = vld [vmem:[#allocation3 + $0x4] ss:$20 sps:$4 sm:$0xff]  }
 0x42d   : > { %1355 = vst.msk [vmem:[#allocation3 + $0x68] sm:$0xf] %vm1218_vm13, %v1337_v61  ;;  %2318 = vmatprep.mubr.bf16.mxu0 %v3121_v37  ;;  %v3153_v61 = vld [vmem:[#allocation3 + $0x88] ss:$20 sps:$4 sm:$0xff]  }
 0x42e   : > { %v1571_v7 = vpop.permute.xlu0 %1570 }
 0x42f   : > { %1592 = vst.msk [vmem:[#allocation3 + $0x30] sm:$0xf] %vm1218_vm13, %v1571_v7  ;;  %v2492_v7 = vpack.c.bf16 %v2488_v15, %v2487_v44 }
 0x430   : > { %v1341_v8 = vpop.permute.xlu1 %1340  ;;  %v3131_v26 = vld [vmem:[#allocation3 + $0x2c] ss:$20 sps:$4 sm:$0xff]  }
 0x431   : > { %1357 = vst.msk [vmem:[#allocation3 + $0x90] sm:$0xf] %vm1218_vm13, %v1341_v8 }
 0x432   : > { %v1575_v17 = vpop.permute.xlu0 %1574 }
 0x433   : > { %1594 = vst.msk [vmem:[#allocation3 + $0x58] sm:$0xf] %vm1218_vm13, %v1575_v17 }
 0x434   : > { %v1569_v41 = vpop.permute.xlu1 %1568  ;;  %v3136_v57 = vld [vmem:[#allocation3 + $0x54] ss:$20 sps:$4 sm:$0xff]  }
 0x435   : > { %1591 = vst.msk [vmem:[#allocation3 + $0x1c] sm:$0xf] %vm1218_vm13, %v1569_v41 }
 0x436   : > { %v1579_v0 = vpop.permute.xlu0 %1578 }
 0x437   : > { %1596 = vst.msk [vmem:[#allocation3 + $0x80] sm:$0xf] %vm1218_vm13, %v1579_v0 }
 0x438   : > { %v1573_v27 = vpop.permute.xlu1 %1572  ;;  %v3143_v56 = vld [vmem:[#allocation3 + $0x7c] ss:$20 sps:$4 sm:$0xff]  }
 0x439   : > { %1593 = vst.msk [vmem:[#allocation3 + $0x44] sm:$0xf] %vm1218_vm13, %v1573_v27 }
 0x43a   : > { %v1197_v36 = vpop.permute.xlu0 %1196 }
 0x43b   : > { %1220 = vst.msk [vmem:[#allocation3 + $0x14] sm:$0xf] %vm1218_vm13, %v1197_v36 }
 0x43c   : > { %v1577_v9 = vpop.permute.xlu1 %1576  ;;  %v3126_v20 = vld [vmem:[#allocation3 + $0x8] ss:$20 sps:$4 sm:$0xff]  }
 0x43d   : > { %1595 = vst.msk [vmem:[#allocation3 + $0x6c] sm:$0xf] %vm1218_vm13, %v1577_v9 }
 0x43e   : > { %v1744_v11 = vpop.permute.xlu0 %1743 }
 0x43f   : > { %1767 = vst.msk [vmem:[#allocation3 + $0xc] sm:$0xf] %vm1218_vm13, %v1744_v11 }
 0x440   : > { %v1581_v33 = vpop.permute.xlu1 %1580 }
 0x441   : > { %1597 = vst.msk [vmem:[#allocation3 + $0x94] sm:$0xf] %vm1218_vm13, %v1581_v33 }
 0x442   : > { %v1199_v2 = vpop.permute.xlu0 %1198  ;;  %v3119_v16 = vld [vmem:[#allocation3] ss:$20 sps:$4 sm:$0xff]  }
 0x443   : > { %1221 = vst.msk [vmem:[#allocation3 + $0x28] sm:$0xf] %vm1218_vm13, %v1199_v2  ;;  %2319 = vmatmul.mubr.bf16.vlgmr.msra.gmra.mxu0 %v3119_v16 }
 0x444   : > { %v1746_v23 = vpop.permute.xlu1 %1745  ;;  %3019 = vmatpush3.bf16.msra.mxu0 %v4117_v19  ;;  %2326 = vmatprep.mubr.bf16.mxu0 %v3131_v26  ;;  %v3142_v22 = vld [vmem:[#allocation3 + $0x58] ss:$20 sps:$4 sm:$0xff]  }
 0x445   : > { %1768 = vst.msk [vmem:[#allocation3 + $0x20] sm:$0xf] %vm1218_vm13, %v1746_v23  ;;  %3020 = vmatprep.subr.bf16.mxu0 %v3135_v47 }
 0x446   : > { %v1748_v63 = vpop.permute.xlu0 %1747 }
 0x447   : > { %1769 = vst.msk [vmem:[#allocation3 + $0x34] sm:$0xf] %vm1218_vm13, %v1748_v63 }
 0x448   : > { %v1201_v49 = vpop.permute.xlu1 %1200  ;;  %3021 = vmatpush3.bf16.msra.mxu0 %v3135_v47  ;;  %v3150_v62 = vld [vmem:[#allocation3 + $0x80] ss:$20 sps:$4 sm:$0xff]  }
 0x449   : > { %1222 = vst.msk [vmem:[#allocation3 + $0x3c] sm:$0xf] %vm1218_vm13, %v1201_v49  ;;  %3022 = vmatprep.subr.bf16.mxu0 %v3140_v18 }
 0x44a   : > { %v1203_v29 = vpop.permute.xlu0 %1202  ;;  %v1861_v10 = vld [vmem:[#allocation3 + $0x28] sm:$0xff] }
 0x44b   : > { %1223 = vst.msk [vmem:[#allocation3 + $0x50] sm:$0xf] %vm1218_vm13, %v1203_v29 }
 0x44c   : > { %v1750_v19 = vpop.permute.xlu1 %1749  ;;  %v3128_v3 = vld [vmem:[#allocation3 + $0xc] ss:$20 sps:$4 sm:$0xff]   ;;  %3023 = vmatpush3.bf16.msra.mxu0 %v3140_v18 }
 0x44d   : > { %1770 = vst.msk [vmem:[#allocation3 + $0x48] sm:$0xf] %vm1218_vm13, %v1750_v19  ;;  %2383 = vmatprep.mubr.bf16.mxu1 %v3128_v3  ;;  %3024 = vmatprep.subr.bf16.mxu0 %v3149_v14 }
 0x44e   : > { %v1752_v58 = vpop.permute.xlu0 %1751  ;;  %2384 = vmatmul.mubr.bf16.vlgmr.msra.gmra.mxu1 %v3126_v20  ;;  %v1862_v34 = vld [vmem:[#allocation3 + $0x30] sm:$0xff] }
 0x44f   : > { %1771 = vst.msk [vmem:[#allocation3 + $0x5c] sm:$0xf] %vm1218_vm13, %v1752_v58  ;;  %3035 = vmatpush3.bf16.msra.mxu1 %v4124_v42 }
 0x450   : > { %v1205_v4 = vpop.permute.xlu1 %1204  ;;  %v1864_v55 = vld [vmem:[#allocation3 + $0x3c] sm:$0xff]  ;;  %3036 = vmatprep.subr.bf16.mxu1 %v3141_v12  ;;  %3025 = vmatpush3.bf16.msra.mxu0 %v3149_v14 }
 0x451   : > { %1224 = vst.msk [vmem:[#allocation3 + $0x64] sm:$0xf] %vm1218_vm13, %v1205_v4  ;;  %v2758_v35 = vcombine.low %v1861_v10, %v1864_v55 }
 0x452   : > { %v1207_v28 = vpop.permute.xlu0 %1206  ;;  %v1867_v50 = vld [vmem:[#allocation3 + $0x50] sm:$0xff] }
 0x453   : > { %1225 = vst.msk [vmem:[#allocation3 + $0x78] sm:$0xf] %vm1218_vm13, %v1207_v28  ;;  %2327 = vmatmul.mubr.bf16.gmra.mxu0 %v2758_v35  ;;  %3037 = vmatpush3.bf16.msra.mxu1 %v3141_v12 }
 0x454   : > { %v1754_v39 = vpop.permute.xlu1 %1753  ;;  %v1865_v13 = vld [vmem:[#allocation3 + $0x44] sm:$0xff]  ;;  %2334 = vmatprep.mubr.bf16.mxu0 %v3136_v57 }
 0x455   : > { %v3133_v21 = vld [vmem:[#allocation3 + $0x34] ss:$20 sps:$4 sm:$0xff]   ;;  %1772 = vst.msk [vmem:[#allocation3 + $0x70] sm:$0xf] %vm1218_vm13, %v1754_v39  ;;  %v2760_v42 = vcombine.low %v1862_v34, %v1865_v13 }
 0x456   : > { %v1756_v38 = vpop.permute.xlu0 %1755  ;;  %2391 = vmatprep.mubr.bf16.mxu1 %v3133_v21  ;;  %v2752_v21 = vld [vmem:[%s4322_s7] ss:$0 sm:$0xff] }
 0x457   : > { %1773 = vst.msk [vmem:[#allocation3 + $0x84] sm:$0xf] %vm1218_vm13, %v1756_v38  ;;  %2392 = vmatmul.mubr.bf16.gmra.mxu1 %v2760_v42 }
 0x458   : > { %v1209_v48 = vpop.permute.xlu1 %1208  ;;  %v1870_v40 = vld [vmem:[#allocation3 + $0x64] sm:$0xff] }
 0x459   : > { %1226 = vst.msk [vmem:[#allocation3 + $0x8c] sm:$0xf] %vm1218_vm13, %v1209_v48  ;;  %v2763_v45 = vcombine.low %v1867_v50, %v1870_v40 }
 0x45b   : > { %2335 = vmatmul.mubr.bf16.gmra.mxu0 %v2763_v45 }
 0x45c   : > { %v1758_v51 = vpop.permute.xlu1 %1757  ;;  %v3138_v60 = vld [vmem:[#allocation3 + $0x5c] ss:$20 sps:$4 sm:$0xff]   ;;  %2342 = vmatprep.mubr.bf16.mxu0 %v3143_v56 }
 0x45d   : > { %1774 = vst.msk [vmem:[#allocation3 + $0x98] sm:$0xf] %vm1218_vm13, %v1758_v51  ;;  %2399 = vmatprep.mubr.bf16.mxu1 %v3138_v60  ;;  %v4233_v60 = vld [vmem:[%s4324_s9] ss:$0 sm:$0xff] }
 0x45f   : > { %2400 = vmatmul.mubr.bf16.gmra.mxu1 %v3142_v22 }
 0x460   : > { %v3145_v25 = vld [vmem:[#allocation3 + $0x78] ss:$20 sps:$4 sm:$0xff]  }
 0x463   : > { %2343 = vmatmul.mubr.bf16.gmra.mxu0 %v3145_v25 }
 0x464   : > { %3026 = vmatprep.mubr.msk.bf16.mxu0 %vm401_vm1, %v3146_v43  ;;  %v3147_v31 = vld [vmem:[#allocation3 + $0x84] ss:$20 sps:$4 sm:$0xff]  }
 0x465   : > { %2407 = vmatprep.mubr.bf16.mxu1 %v3147_v31 }
 0x467   : > { %2408 = vmatmul.mubr.bf16.gmra.mxu1 %v3150_v62 }
 0x468   : > { %3038 = vmatprep.mubr.msk.bf16.mxu1 %vm498_vm2, %v2489_v52 }
 0x46b   : > { %3027 = vmatmul.mubr.msk.bf16.vlgmr.msra.gmra.mxu0 %vm401_vm1, %v3151_v5 }
 0x46c   : > { %3030 = vmatprep.mubr.msk.bf16.mxu0 %vm401_vm1, %v3152_v59 }
 0x46f   : > { %3039 = vmatmul.mubr.msk.bf16.vlgmr.msra.gmra.mxu1 %vm498_vm2, %v2490_v6 }
 0x470   : > { %3042 = vmatprep.mubr.msk.bf16.mxu1 %vm498_vm2, %v2491_v30 }
 0x473   : > { %3031 = vmatmul.mubr.msk.bf16.gmra.mxu0 %vm401_vm1, %v3153_v61 }
 0x477   : > { %3043 = vmatmul.mubr.msk.bf16.gmra.mxu1 %vm498_vm2, %v2492_v7 }
 0x503   : > { %v2880_v8 = vpop.f32.mrf.mxu0 }
 0x505   : > { %v2881_v17 = vpop.f32.mrf.mxu0 }
 0x506   : > { %v2882_v34 = vadd.f32 %v2881_v17, %v2880_v8 }
 0x507   : > { %v2883_v41 = vpop.f32.mrf.mxu0 }
 0x508   : > { %v2321_v22 = vadd.f32 %v2882_v34, %v2752_v21 }
 0x509   : > { %v2884_v27 = vpop.f32.mrf.mxu0 }
 0x50a   : > { %v2885_v57 = vadd.f32 %v2884_v27, %v2883_v41 }
 0x50c   : > { %v2324_v5 = vadd.f32 %v2885_v57, %v2752_v21 }
 0x50e   : > { %v2920_v0 = vpop.f32.mrf.mxu1 }
 0x510   : > { %v2921_v36 = vpop.f32.mrf.mxu1 }
 0x511   : > { %v2922_v48 = vadd.f32 %v2921_v36, %v2920_v0 }
 0x512   : > { %v2923_v11 = vpop.f32.mrf.mxu1 }
 0x513   : > { %v2886_v9 = vpop.f32.mrf.mxu0  ;;  %v2386_v1 = vadd.f32 %v2922_v48, %v2321_v22 }
 0x514   : > { %v2924_v2 = vpop.f32.mrf.mxu1 }
 0x515   : > { %v2887_v33 = vpop.f32.mrf.mxu0  ;;  %v2925_v54 = vadd.f32 %v2924_v2, %v2923_v11 }
 0x516   : > { %v2888_v28 = vadd.f32 %v2887_v33, %v2886_v9 }
 0x517   : > { %v2889_v16 = vpop.f32.mrf.mxu0  ;;  %v2926_v37 = vpop.f32.mrf.mxu1  ;;  %v2389_v17 = vadd.f32 %v2925_v54, %v2324_v5 }
 0x518   : > { %v2329_v50 = vadd.f32 %v2888_v28, %v2752_v21 }
 0x519   : > { %v2890_v47 = vpop.f32.mrf.mxu0  ;;  %v2927_v23 = vpop.f32.mrf.mxu1 }
 0x51a   : > { %v2928_v13 = vadd.f32 %v2927_v23, %v2926_v37  ;;  %v2891_v40 = vadd.f32 %v2890_v47, %v2889_v16 }
 0x51b   : > { %v2892_v63 = vpop.f32.mrf.mxu0  ;;  %v2929_v18 = vpop.f32.mrf.mxu1 }
 0x51c   : > { %v2394_v25 = vadd.f32 %v2928_v13, %v2329_v50  ;;  %v2332_v62 = vadd.f32 %v2891_v40, %v2752_v21 }
 0x51d   : > { %v2893_v49 = vpop.f32.mrf.mxu0  ;;  %v2930_v29 = vpop.f32.mrf.mxu1 }
 0x51e   : > { %v2931_v56 = vadd.f32 %v2930_v29, %v2929_v18  ;;  %v2894_v32 = vadd.f32 %v2893_v49, %v2892_v63 }
 0x51f   : > { %v2895_v14 = vpop.f32.mrf.mxu0  ;;  %v2932_v19 = vpop.f32.mrf.mxu1 }
 0x520   : > { %v2397_v44 = vadd.f32 %v2931_v56, %v2332_v62  ;;  %v2337_v33 = vadd.f32 %v2894_v32, %v2752_v21 }
 0x521   : > { %v2896_v20 = vpop.f32.mrf.mxu0  ;;  %v2933_v3 = vpop.f32.mrf.mxu1 }
 0x522   : > { %v2934_v7 = vadd.f32 %v2933_v3, %v2932_v19  ;;  %v2897_v2 = vadd.f32 %v2896_v20, %v2895_v14 }
 0x523   : > { %v2898_v58 = vpop.f32.mrf.mxu0  ;;  %v4224_v12 = vpop.f32.mrf.mxu1 }
 0x524   : > { %v2402_v19 = vadd.f32 %v2934_v7, %v2337_v33 }
 0x525   : > { %v2899_v4 = vpop.f32.mrf.mxu0  ;;  %v2936_v10 = vpop.f32.mrf.mxu1 }
 0x526   : > { %v2900_v24 = vadd.f32 %v2899_v4, %v2898_v58  ;;  %v2937_v29 = vadd.f32 %v2936_v10, %v4224_v12 }
 0x527   : > { %v2901_v55 = vpop.f32.mrf.mxu0  ;;  %v2938_v26 = vpop.f32.mrf.mxu1 }
 0x528   : > { %v2345_v8 = vadd.f32 %v2900_v24, %v2752_v21 }
 0x529   : > { %v2902_v35 = vpop.f32.mrf.mxu0  ;;  %v2939_v39 = vpop.f32.mrf.mxu1 }
 0x52a   : > { %v2940_v46 = vadd.f32 %v2939_v39, %v2938_v26  ;;  %v2903_v27 = vadd.f32 %v2902_v35, %v2901_v55  ;;  %v2340_v26 = vadd.f32 %v2897_v2, %v2752_v21 }
 0x52b   : > { %v2941_v42 = vpop.f32.mrf.mxu1  ;;  %v3028_v38 = vpop.f32.mrf.mxu0 }
 0x52c   : > { %v2459_v52 = vadd.f32 %v3028_v38, %v2394_v25  ;;  %v2410_v16 = vadd.f32 %v2940_v46, %v2345_v8  ;;  %v2348_v4 = vadd.f32 %v2903_v27, %v2752_v21  ;;  %v2405_v38 = vadd.f32 %v2937_v29, %v2340_v26 }
 0x52d   : > { %v2942_v45 = vpop.f32.mrf.mxu1  ;;  %v2450_v51 = vpop.f32.mrf.mxu0 }
 0x52e   : > { %v2451_v30 = vadd.f32 %v2450_v51, %v2386_v1  ;;  %v2943_v23 = vadd.f32 %v2942_v45, %v2941_v42 }
 0x52f   : > { %v3029_v43 = vpop.f32.mrf.mxu0  ;;  %v3040_v31 = vpop.f32.mrf.mxu1 }
 0x530   : > { %v2571_v53 = vadd.f32 %v3040_v31, %v4233_v60  ;;  %v2462_v36 = vadd.f32 %v3029_v43, %v2397_v44  ;;  %v2413_v12 = vadd.f32 %v2943_v23, %v2348_v4 }
 0x531   : > { %v2453_v59 = vpop.f32.mrf.mxu0  ;;  %v2562_v6 = vpop.f32.mrf.mxu1 }
 0x532   : > { %v2595_v15 = vadd.f32 %v2571_v53, %v2459_v52  ;;  %v2563_v61 = vadd.f32 %v4233_v60, %v2562_v6  ;;  %v2454_v63 = vadd.f32 %v2453_v59, %v2389_v17 }
 0x533   : > { %v3032_v41 = vpop.f32.mrf.mxu0  ;;  %v3041_v0 = vpop.f32.mrf.mxu1 }
 0x534   : > { %2603 = vst.msk [vmem:[%s4239_s12 + $0x10] sm:$0xff] %vm401_vm1, %v2595_v15  ;;  %v2593_v9 = vadd.f32 %v2563_v61, %v2451_v30  ;;  %v2574_v11 = vadd.f32 %v3041_v0, %v4233_v60  ;;  %v2475_v55 = vadd.f32 %v3032_v41, %v2410_v16 }
 0x535   : > { %v2466_v37 = vpop.f32.mrf.mxu0  ;;  %v2565_v47 = vpop.f32.mrf.mxu1 }
 0x536   : > { %2601 = vst.msk [vmem:[%s4239_s12] sm:$0xff] %vm401_vm1, %v2593_v9  ;;  %v2596_v18 = vadd.f32 %v2574_v11, %v2462_v36  ;;  %v2566_v49 = vadd.f32 %v4233_v60, %v2565_v47  ;;  %v2467_v35 = vadd.f32 %v2466_v37, %v2402_v19 }
 0x537   : > { %v3033_v3 = vpop.f32.mrf.mxu0  ;;  %v3044_v58 = vpop.f32.mrf.mxu1 }
 0x538   : > { %2604 = vst.msk [vmem:[%s4239_s12 + $0x18] sm:$0xff] %vm401_vm1, %v2596_v18  ;;  %v2594_v14 = vadd.f32 %v2566_v49, %v2454_v63  ;;  %v2587_v20 = vadd.f32 %v3044_v58, %v4233_v60  ;;  %v2478_v42 = vadd.f32 %v3033_v3, %v2413_v12 }
 0x539   : > { %v2578_v28 = vpop.f32.mrf.mxu1  ;;  %v2469_v34 = vpop.f32.mrf.mxu0 }
 0x53a   : > { %2602 = vst.msk [vmem:[%s4239_s12 + $0x8] sm:$0xff] %vm401_vm1, %v2594_v14  ;;  %v2599_v10 = vadd.f32 %v2587_v20, %v2475_v55  ;;  %v2579_v39 = vadd.f32 %v4233_v60, %v2578_v28  ;;  %v2470_v40 = vadd.f32 %v2469_v34, %v2405_v38 }
 0x53b   : > { %v3045_v13 = vpop.f32.mrf.mxu1 }
 0x53c   : > { %2607 = vst.msk [vmem:[%s4239_s12 + $0x30] sm:$0xff] %vm401_vm1, %v2599_v10  ;;  %v2597_v48 = vadd.f32 %v2579_v39, %v2467_v35  ;;  %v2590_v21 = vadd.f32 %v3045_v13, %v4233_v60 }
 0x53d   : > { %v2581_v50 = vpop.f32.mrf.mxu1 }
 0x53e   : > { %2605 = vst.msk [vmem:[%s4239_s12 + $0x20] sm:$0xff] %vm401_vm1, %v2597_v48  ;;  %v2600_v57 = vadd.f32 %v2590_v21, %v2478_v42  ;;  %v2582_v45 = vadd.f32 %v4233_v60, %v2581_v50 }
 0x540   : > { %2608 = vst.msk [vmem:[%s4239_s12 + $0x38] sm:$0xff] %vm401_vm1, %v2600_v57  ;;  %v2598_v51 = vadd.f32 %v2582_v45, %v2470_v40 }
 0x542   : > { %2606 = vst.msk [vmem:[%s4239_s12 + $0x28] sm:$0xff] %vm401_vm1, %v2598_v51 }
 0x543   : > { %3201 = shalt.err (!%p3198_p3)
}
 0x544   : > { %s3202_s26 = scalar_lea.hbm %s4265_s11, 1024  ;;  %s3206_s20 = scalar_lea.hbm %s4325_s10, 2048 }
 0x545   : > { %p3203_p4 = scmp.ne.s32.totalorder %s4265_s11, %s3202_s26  ;;  %p3207_p9 = scmp.lt.s32.totalorder %s4265_s11, %s4325_s10 }
 0x546   : > { %p3208_p10 = scmp.lt.s32.totalorder %s3206_s20, %s3202_s26 }
 0x547   : > { %p3204_p7 = pnand %p3203_p4, %p3350_p5 }
 0x548   : > { %p3209_p11 = por %p3208_p10, %p3207_p9 }
 0x549   : > { %p3205_p8 = pneg %p3204_p7 }
 0x54b   : > { %p3210_p12 = pnand %p3209_p11, %p3205_p8 }
 0x54d   : > { %3213 = shalt.err (!%p3210_p12)
}
 0x54e   : > { %s3255_s27 = smov 128   ;;  %s3256_s29 = smov 8  }
 0x54f   : > { %3046 = dma.vmem_to_hbm [thread:$0]  (%p3350_p5), %s4267_s18, 1024, %s4265_s11, %s4275_s17, %s3255_s27, %s3255_s27, %s3256_s29  }
 0x550 PF: > { %p3052_p13 = scmp.ge.s32.totalorder %s3248_s16, 2  ;;  %s2638_s30 = sand.u32 1, %s3236_s13  }
 0x551   : > { %s2639_s26 = scalar_lea.sflag [#allocation5], %s2638_s30 }
 0x552   : > { %p3049_p0 = pnand %p3052_p13, %p3354_p6 }
 0x554   : > { %p3050_p1 = pneg %p3049_p0 }
 0x556   : > { %3231 = dma.done.wait (%p3050_p1), %s2639_s26, 1024  }
 0x557   : > { %3233 = vsyncadd (%p3050_p1), %s2639_s26, 4294966272  ;;  %p20_p2 = scmp.ge.s32.totalorder %s3337_s19, 4   ;;  %s4336_s13 = smov %s3240_s14 }
 0x558   : > { %s4337_s14 = smov %s3244_s15  ;;  %s4338_s15 = smov %s3348_s22 }
 0x559   : > { %s4339_s16 = smov %s3337_s19  ;;  %22 = sbr.rel (!%p20_p2) target bundleno = 3 (0x3), region = 100 }
 0x55e   :  { %2644 = vsyncpa [#allocation5], 1 }
 0x55f   :  { %2646 = vsyncpa [#allocation5 + $0x1], 1 }

</bundles_post_ra>
